<compile_context>
chip_gen: v6e
topology: v6e:2x2x1
jax: 0.10.0
libtpu: 0.0.40
codegen_flags: <defaults>
</compile_context>

<pallas_src>
import functools

import jax
import jax.numpy as jnp
from jax.experimental import pallas as pl
from jax.experimental.pallas import tpu as pltpu

EPS = 1e-5

# Order in which per-block parameters are created/stacked in init_params.
BLOCK_KEYS = (
    'ln1_g', 'ln1_b', 'wqkv', 'bqkv', 'wo', 'bo',
    'ln2_g', 'ln2_b', 'wq_e', 'bq_e', 'wk_e', 'bk_e',
    'wv_e', 'bv_e', 'wo_e', 'bo_e', 'wg', 'bg',
    'ln3_g', 'ln3_b', 'w1', 'b1', 'w2', 'b2',
)


def _layernorm(x, g, b):
    mu = jnp.mean(x, axis=-1, keepdims=True)
    var = jnp.mean((x - mu) ** 2, axis=-1, keepdims=True)
    return (x - mu) * jax.lax.rsqrt(var + EPS) * g + b


# ---------------------------------------------------------------------------
# Fused per-item kernel: embedding -> n_blocks x (self-attn, gated ext-attn, FFN) -> head
# ---------------------------------------------------------------------------

def ivyspt_item_kernel(feat_ref, ext_ref, wA_ref, wE_ref, wB_ref, vec_ref, emb_ref,
                       out_ref, *, n_heads, n_query):
    S = feat_ref.shape[1]          # tokens per item (surface + query)
    D = emb_ref.shape[1]           # d_embedding
    F = wB_ref.shape[1]            # ffn hidden dim
    n_blocks = wA_ref.shape[0]
    H = n_heads
    dh = D // H
    scale = 1.0 / (dh ** 0.5)

    # ---------------- embedding: one [S,5] x [5,D] matmul ----------------
    # fk columns: [log-moneyness, time-to-maturity, total-variance, kernel, 1]
    # emb rows 0..4:         [we0+wp0, we1+wp1, we2, kv, be]
    f = feat_ref[0].astype(jnp.float32)                       # [S, 3]
    lm, tt = f[:, 0:1], f[:, 1:2]
    kern = jnp.exp(-0.5 * (lm * lm + tt * tt))                # smooth surface "kernel" feature
    ones = jnp.ones((S, 1), jnp.float32)
    fk = jnp.concatenate([f, kern, ones], axis=-1)            # [S, 5]
    x = jnp.dot(fk, emb_ref[0:5, :], preferred_element_type=jnp.float32)   # [S, D]

    ext = ext_ref[0].astype(jnp.float32)                      # [E, Dext]

    def mha(q, k, v):
        """Per-head attention over one item; contexts kept as values, single lane-concat."""
        ctxs = []
        for h in range(H):
            sl = slice(h * dh, (h + 1) * dh)
            s = jax.lax.dot_general(q[:, sl], k[:, sl], (((1,), (1,)), ((), ())),
                                    preferred_element_type=jnp.float32) * scale
            s = s - jnp.max(s, axis=-1, keepdims=True)
            p = jnp.exp(s)
            p = p * pl.reciprocal(jnp.sum(p, axis=-1, keepdims=True), approx=True)
            ctxs.append(jnp.dot(p, v[:, sl], preferred_element_type=jnp.float32))
        return jnp.concatenate(ctxs, axis=-1)

    # TODO(synk): replace this static unroll with lax.fori_loop over the stacked layer axis
    # if num_encoder_blocks is ever scaled beyond a handful of blocks.
    for l in range(n_blocks):
        # --- multi-head self attention (pre-LN, residual); no mask needed per item ---
        h1 = _layernorm(x, vec_ref[l, 0:1, 0:D], vec_ref[l, 1:2, 0:D])
        qkv = jnp.dot(h1, wA_ref[l, :, 0:3 * D],
                      preferred_element_type=jnp.float32) + vec_ref[l, 2:3, 0:3 * D]
        ctx = mha(qkv[:, 0:D], qkv[:, D:2 * D], qkv[:, 2 * D:3 * D])
        x = x + jnp.dot(ctx, wA_ref[l, :, 3 * D:4 * D],
                        preferred_element_type=jnp.float32) + vec_ref[l, 3:4, 0:D]
        # attention-dropout = identity (eval)

        # --- gated external cross attention (q & gate projections fused; k & v fused) ---
        h2 = _layernorm(x, vec_ref[l, 4:5, 0:D], vec_ref[l, 5:6, 0:D])
        qg = jnp.dot(h2, wA_ref[l, :, 4 * D:6 * D],
                     preferred_element_type=jnp.float32) + vec_ref[l, 6:7, 0:2 * D]
        kve = jnp.dot(ext, wE_ref[l],
                      preferred_element_type=jnp.float32) + vec_ref[l, 7:8, 0:2 * D]
        ctx_e = mha(qg[:, 0:D], kve[:, 0:D], kve[:, D:2 * D])
        attn_out = jnp.dot(ctx_e, wA_ref[l, :, 6 * D:7 * D],
                           preferred_element_type=jnp.float32) + vec_ref[l, 8:9, 0:D]
        gate = jax.nn.sigmoid(qg[:, D:2 * D])      # gate bias init = 10.0 -> gate ~= 1
        x = x + gate * attn_out                    # gate-dropout = identity (eval)

        # --- FFN (pre-LN, residual) ---
        h3 = _layernorm(x, vec_ref[l, 9:10, 0:D], vec_ref[l, 10:11, 0:D])
        y = jax.nn.gelu(jnp.dot(h3, wA_ref[l, :, 7 * D:7 * D + F],
                                preferred_element_type=jnp.float32) + vec_ref[l, 11:12, 0:F])
        x = x + jnp.dot(y, wB_ref[l],
                        preferred_element_type=jnp.float32) + vec_ref[l, 12:13, 0:D]
        # ffn-dropout = identity (eval)

    # ---------------- final Linear(D, 1) on trailing query tokens ----------------
    xq = x[S - n_query:, :]                                    # [Q, D] static slice
    tv = jax.lax.dot_general(emb_ref[5:6, :], xq, (((1,), (1,)), ((), ())),
                             preferred_element_type=jnp.float32)      # [1, Q]
    tv = tv + emb_ref[6:7, 0:1]                                # + final bias
    out_ref[0] = tv.astype(out_ref.dtype)


# ---------------------------------------------------------------------------
# Parameter init (per-block params stacked along a leading layer axis)
# ---------------------------------------------------------------------------

def init_params(key, d_embedding, num_encoder_blocks, n_heads, ffn_hidden_dim, external_dim,
                weight_initializer_std=0.02, linear_bias_initializer_value=0.0,
                gate_bias_initializer_value=10.0):
    keys = iter(jax.random.split(key, 256))

    def nrm(shape, std=weight_initializer_std):
        return (std * jax.random.normal(next(keys), shape)).astype(jnp.float32)

    def const(shape, v):
        return jnp.full(shape, v, jnp.float32)

    D, F = d_embedding, ffn_hidden_dim
    block_list = []
    for _ in range(num_encoder_blocks):
        block_list.append({
            'ln1_g': jnp.ones((1, D), jnp.float32), 'ln1_b': jnp.zeros((1, D), jnp.float32),
            'wqkv': nrm((D, 3 * D)), 'bqkv': const((1, 3 * D), linear_bias_initializer_value),
            'wo': nrm((D, D)), 'bo': const((1, D), linear_bias_initializer_value),
            'ln2_g': jnp.ones((1, D), jnp.float32), 'ln2_b': jnp.zeros((1, D), jnp.float32),
            'wq_e': nrm((D, D)), 'bq_e': const((1, D), linear_bias_initializer_value),
            'wk_e': nrm((external_dim, D)), 'bk_e': const((1, D), linear_bias_initializer_value),
            'wv_e': nrm((external_dim, D)), 'bv_e': const((1, D), linear_bias_initializer_value),
            'wo_e': nrm((D, D)), 'bo_e': const((1, D), linear_bias_initializer_value),
            'wg': nrm((D, D)), 'bg': const((1, D), gate_bias_initializer_value),
            'ln3_g': jnp.ones((1, D), jnp.float32), 'ln3_b': jnp.zeros((1, D), jnp.float32),
            'w1': nrm((D, F)), 'b1': const((1, F), linear_bias_initializer_value),
            'w2': nrm((F, D)), 'b2': const((1, D), linear_bias_initializer_value),
        })
    blocks_stacked = {k: jnp.stack([blk[k] for blk in block_list]) for k in BLOCK_KEYS}

    params = {
        'n_heads': n_heads,
        'embed': {'we': nrm((3, D)), 'be': const((1, D), linear_bias_initializer_value),
                  'wp': nrm((2, D)), 'kv': nrm((1, D))},
        'blocks': blocks_stacked,
        'final_w': nrm((1, D), weight_initializer_std
                       * (1.0 / (2 * (num_encoder_blocks + 1)) ** 0.5)),
        'final_b': const((1, 1), linear_bias_initializer_value),
    }
    return params


# ---------------------------------------------------------------------------
# Parameter packing: ~38 tiny arrays -> 5 VMEM-resident slabs
# ---------------------------------------------------------------------------

def _pack_params(params):
    emb = params['embed']
    blk = params['blocks']
    D = emb['we'].shape[1]
    F = blk['w1'].shape[2]

    # embedding + head slab [7, D]: rows [we0+wp0, we1+wp1, we2, kv, be, final_w, final_b]
    we_eff = emb['we'].at[0:2, :].add(emb['wp'])    # fold positional embedding into we
    fb_row = jnp.full((1, D), params['final_b'][0, 0], jnp.float32)
    emb_slab = jnp.concatenate([we_eff, emb['kv'], emb['be'],
                                params['final_w'], fb_row], axis=0)

    # per-block D-input weights [L, D, 7D+F]: [wqkv | wo | wq_e | wg | wo_e | w1]
    wA = jnp.concatenate([blk['wqkv'], blk['wo'], blk['wq_e'], blk['wg'],
                          blk['wo_e'], blk['w1']], axis=2)
    # external-input weights [L, Dext, 2D]: [wk_e | wv_e]
    wE = jnp.concatenate([blk['wk_e'], blk['wv_e']], axis=2)
    # FFN down-projection [L, F, D]
    wB = blk['w2']

    # bias / LayerNorm vector slab [L, 13, WV], rows zero-padded to a common width
    WV = max(3 * D, 2 * D, F)

    def pad(a):
        return jnp.pad(a, ((0, 0), (0, 0), (0, WV - a.shape[2])))

    rows = [blk['ln1_g'], blk['ln1_b'], blk['bqkv'], blk['bo'],
            blk['ln2_g'], blk['ln2_b'],
            jnp.concatenate([blk['bq_e'], blk['bg']], axis=2),
            jnp.concatenate([blk['bk_e'], blk['bv_e']], axis=2),
            blk['bo_e'], blk['ln3_g'], blk['ln3_b'], blk['b1'], blk['b2']]
    vec = jnp.concatenate([pad(r) for r in rows], axis=1)
    return emb_slab, wA, wE, wB, vec


# ---------------------------------------------------------------------------
# Full forward: one pallas_call, grid over batch items
# ---------------------------------------------------------------------------

def ivyspt_forward(params, batch, output_attention_map=False):
    sp, qp = batch['Surface Points'], batch['Query Points']
    sp_feats = jnp.stack([sp['Log Moneyness'], sp['Time to Maturity'],
                          sp['Total Variance']], axis=-1)
    qp_feats = jnp.stack([qp['Log Moneyness'], qp['Time to Maturity'],
                          jnp.zeros_like(qp['Log Moneyness'])], axis=-1)
    feats = jnp.concatenate([sp_feats, qp_feats], axis=1).astype(jnp.float32)   # [B, S, 3]
    ext = batch['External Features'].astype(jnp.float32)                        # [B, E, Dext]

    B, S, _ = feats.shape
    _, E, Dext = ext.shape
    Q = qp['Log Moneyness'].shape[1]

    emb_slab, wA, wE, wB, vec = _pack_params(params)

    kern_fn = functools.partial(ivyspt_item_kernel,
                                n_heads=params['n_heads'], n_query=Q)
    tv3 = pl.pallas_call(
        kern_fn,
        out_shape=jax.ShapeDtypeStruct((B, 1, Q), jnp.float32),
        grid=(B,),
        in_specs=[
            pl.BlockSpec((1, S, 3), lambda b: (b, 0, 0)),       # per-item features
            pl.BlockSpec((1, E, Dext), lambda b: (b, 0, 0)),    # per-item external tokens
            pl.BlockSpec(wA.shape, lambda b: (0, 0, 0)),        # weight slabs: constant block
            pl.BlockSpec(wE.shape, lambda b: (0, 0, 0)),        # index -> VMEM-resident
            pl.BlockSpec(wB.shape, lambda b: (0, 0, 0)),
            pl.BlockSpec(vec.shape, lambda b: (0, 0, 0)),
            pl.BlockSpec(emb_slab.shape, lambda b: (0, 0)),
        ],
        out_specs=pl.BlockSpec((1, 1, Q), lambda b: (b, 0, 0)),
        compiler_params=pltpu.CompilerParams(
            dimension_semantics=("parallel",)),                 # shards items across TCs (v7x)
    )(feats, ext, wA, wE, wB, vec, emb_slab)

    # dense stacked output; original model returns ragged per-item lists
    return tv3[:, 0, :], None, None


if __name__ == "__main__":
    B = 2
    d_embedding = 32
    num_encoder_blocks = 2
    n_heads = 4
    ffn_hidden_dim = 64
    external_dim = 8
    n_surface, n_query, n_ext_tokens = 12, 4, 4

    key = jax.random.PRNGKey(0)
    k_param, k_data = jax.random.split(key)
    params = init_params(k_param, d_embedding, num_encoder_blocks, n_heads,
                         ffn_hidden_dim, external_dim)

    kd = jax.random.split(k_data, 6)
    batch = {
        'Surface Points': {
            'Log Moneyness': 0.2 * jax.random.normal(kd[0], (B, n_surface)),
            'Time to Maturity': jax.random.uniform(kd[1], (B, n_surface), minval=0.05, maxval=2.0),
            'Total Variance': jax.random.uniform(kd[2], (B, n_surface), minval=0.01, maxval=0.3),
        },
        'Query Points': {
            'Log Moneyness': 0.2 * jax.random.normal(kd[3], (B, n_query)),
            'Time to Maturity': jax.random.uniform(kd[4], (B, n_query), minval=0.05, maxval=2.0),
        },
        'External Features': jax.random.normal(kd[5], (B, n_ext_tokens, external_dim)),
    }

    tv_estimates, _, _ = ivyspt_forward(params, batch)
    tv_estimates = jax.block_until_ready(tv_estimates)
    assert tv_estimates.shape == (B, n_query)
    assert bool(jnp.all(jnp.isfinite(tv_estimates)))
    print("KERNEL_OK")
</pallas_src>

<mosaic_0001>
module attributes {stable_mosaic.version = 11 : i64} {
  func.func @ivyspt_item_kernel(%arg0: i32, %arg1: memref<1x16x3xf32, #tpu.memory_space<vmem>>, %arg2: memref<1x4x8xf32, #tpu.memory_space<vmem>>, %arg3: memref<2x32x288xf32, #tpu.memory_space<vmem>>, %arg4: memref<2x8x64xf32, #tpu.memory_space<vmem>>, %arg5: memref<2x64x32xf32, #tpu.memory_space<vmem>>, %arg6: memref<2x13x96xf32, #tpu.memory_space<vmem>>, %arg7: memref<7x32xf32, #tpu.memory_space<vmem>>, %arg8: memref<1x1x4xf32, #tpu.memory_space<vmem>>) attributes {dimension_semantics = [#tpu.dimension_semantics<parallel>], iteration_bounds = array<i64: 2>, scalar_prefetch = 0 : i64, scratch_operands = 0 : i64, tpu.core_type = #tpu.core_type<tc>, window_params = [{transform_indices = @transform_0, window_bounds = array<i64: 1, 16, 3>}, {transform_indices = @transform_1, window_bounds = array<i64: 1, 4, 8>}, {pipeline_mode = #tpu.pipeline_mode<synchronous>, transform_indices = @transform_2, window_bounds = array<i64: 2, 32, 288>}, {pipeline_mode = #tpu.pipeline_mode<synchronous>, transform_indices = @transform_3, window_bounds = array<i64: 2, 8, 64>}, {pipeline_mode = #tpu.pipeline_mode<synchronous>, transform_indices = @transform_4, window_bounds = array<i64: 2, 64, 32>}, {pipeline_mode = #tpu.pipeline_mode<synchronous>, transform_indices = @transform_5, window_bounds = array<i64: 2, 13, 96>}, {pipeline_mode = #tpu.pipeline_mode<synchronous>, transform_indices = @transform_6, window_bounds = array<i64: 7, 32>}, {transform_indices = @transform_7, window_bounds = array<i64: 1, 1, 4>}]} {
    %c0 = arith.constant 0 : index
    %c0_0 = arith.constant 0 : index
    %c0_1 = arith.constant 0 : index
    %0 = vector.load %arg1[%c0, %c0_0, %c0_1] : memref<1x16x3xf32, #tpu.memory_space<vmem>>, vector<1x16x3xf32>
    %1 = vector.shape_cast %0 : vector<1x16x3xf32> to vector<16x3xf32>
    %2 = vector.extract_strided_slice %1 {offsets = [0, 0], sizes = [16, 1], strides = [1, 1]} : vector<16x3xf32> to vector<16x1xf32>
    %3 = vector.extract_strided_slice %1 {offsets = [0, 1], sizes = [16, 1], strides = [1, 1]} : vector<16x3xf32> to vector<16x1xf32>
    %4 = arith.mulf %2, %2 : vector<16x1xf32>
    %5 = arith.mulf %3, %3 : vector<16x1xf32>
    %6 = arith.addf %4, %5 : vector<16x1xf32>
    %cst = arith.constant -5.000000e-01 : f32
    %7 = vector.broadcast %cst : f32 to vector<16x1xf32>
    %8 = arith.mulf %7, %6 : vector<16x1xf32>
    %9 = math.exp %8 : vector<16x1xf32>
    %cst_2 = arith.constant 1.000000e+00 : f32
    %10 = vector.broadcast %cst_2 : f32 to vector<16x1xf32>
    %11 = tpu.concatenate %1, %9, %10 in 1 : vector<16x3xf32>, vector<16x1xf32>, vector<16x1xf32> -> vector<16x5xf32>
    %c0_3 = arith.constant 0 : index
    %c0_4 = arith.constant 0 : index
    %12 = vector.load %arg7[%c0_3, %c0_4] : memref<7x32xf32, #tpu.memory_space<vmem>>, vector<5x32xf32>
    %cst_5 = arith.constant dense<0.000000e+00> : vector<16x32xf32>
    %13 = tpu.matmul %11, %12, %cst_5 {dimension_numbers = #tpu.dot_dimension_numbers<[1], [0], [0], [1], [0, 0, 1, 1], [], []>} : vector<16x5xf32>, vector<5x32xf32>, vector<16x32xf32> -> vector<16x32xf32>
    %c0_6 = arith.constant 0 : index
    %c0_7 = arith.constant 0 : index
    %c0_8 = arith.constant 0 : index
    %14 = vector.load %arg2[%c0_6, %c0_7, %c0_8] : memref<1x4x8xf32, #tpu.memory_space<vmem>>, vector<1x4x8xf32>
    %15 = vector.shape_cast %14 : vector<1x4x8xf32> to vector<4x8xf32>
    %c0_9 = arith.constant 0 : index
    %c0_10 = arith.constant 0 : index
    %c0_11 = arith.constant 0 : index
    %16 = vector.load %arg6[%c0_9, %c0_10, %c0_11] : memref<2x13x96xf32, #tpu.memory_space<vmem>>, vector<1x1x32xf32>
    %17 = vector.shape_cast %16 : vector<1x1x32xf32> to vector<1x32xf32>
    %c0_12 = arith.constant 0 : index
    %c1 = arith.constant 1 : index
    %c0_13 = arith.constant 0 : index
    %18 = vector.load %arg6[%c0_12, %c1, %c0_13] : memref<2x13x96xf32, #tpu.memory_space<vmem>>, vector<1x1x32xf32>
    %19 = vector.shape_cast %18 : vector<1x1x32xf32> to vector<1x32xf32>
    %cst_14 = arith.constant dense<0.000000e+00> : vector<16xf32>
    %20 = vector.multi_reduction <add>, %13, %cst_14 [1] : vector<16x32xf32> to vector<16xf32>
    %21 = vector.shape_cast %20 : vector<16xf32> to vector<16x1xf32>
    %cst_15 = arith.constant 3.200000e+01 : f32
    %22 = vector.broadcast %cst_15 : f32 to vector<16x1xf32>
    %23 = arith.divf %21, %22 : vector<16x1xf32>
    %24 = vector.broadcast %23 : vector<16x1xf32> to vector<16x32xf32>
    %25 = arith.subf %13, %24 : vector<16x32xf32>
    %26 = arith.mulf %25, %25 : vector<16x32xf32>
    %cst_16 = arith.constant dense<0.000000e+00> : vector<16xf32>
    %27 = vector.multi_reduction <add>, %26, %cst_16 [1] : vector<16x32xf32> to vector<16xf32>
    %28 = vector.shape_cast %27 : vector<16xf32> to vector<16x1xf32>
    %cst_17 = arith.constant 3.200000e+01 : f32
    %29 = vector.broadcast %cst_17 : f32 to vector<16x1xf32>
    %30 = arith.divf %28, %29 : vector<16x1xf32>
    %31 = vector.broadcast %23 : vector<16x1xf32> to vector<16x32xf32>
    %32 = arith.subf %13, %31 : vector<16x32xf32>
    %cst_18 = arith.constant 9.99999974E-6 : f32
    %33 = vector.broadcast %cst_18 : f32 to vector<16x1xf32>
    %34 = arith.addf %30, %33 : vector<16x1xf32>
    %35 = math.rsqrt %34 : vector<16x1xf32>
    %36 = vector.broadcast %35 : vector<16x1xf32> to vector<16x32xf32>
    %37 = arith.mulf %32, %36 : vector<16x32xf32>
    %38 = vector.broadcast %17 : vector<1x32xf32> to vector<16x32xf32>
    %39 = arith.mulf %37, %38 : vector<16x32xf32>
    %40 = vector.broadcast %19 : vector<1x32xf32> to vector<16x32xf32>
    %41 = arith.addf %39, %40 : vector<16x32xf32>
    %c0_19 = arith.constant 0 : index
    %c0_20 = arith.constant 0 : index
    %c0_21 = arith.constant 0 : index
    %42 = vector.load %arg3[%c0_19, %c0_20, %c0_21] : memref<2x32x288xf32, #tpu.memory_space<vmem>>, vector<1x32x96xf32>
    %43 = vector.shape_cast %42 : vector<1x32x96xf32> to vector<32x96xf32>
    %cst_22 = arith.constant dense<0.000000e+00> : vector<16x96xf32>
    %44 = tpu.matmul %41, %43, %cst_22 {dimension_numbers = #tpu.dot_dimension_numbers<[1], [0], [0], [1], [0, 0, 1, 1], [], []>} : vector<16x32xf32>, vector<32x96xf32>, vector<16x96xf32> -> vector<16x96xf32>
    %c0_23 = arith.constant 0 : index
    %c2 = arith.constant 2 : index
    %c0_24 = arith.constant 0 : index
    %45 = vector.load %arg6[%c0_23, %c2, %c0_24] : memref<2x13x96xf32, #tpu.memory_space<vmem>>, vector<1x1x96xf32>
    %46 = vector.shape_cast %45 : vector<1x1x96xf32> to vector<1x96xf32>
    %47 = vector.broadcast %46 : vector<1x96xf32> to vector<16x96xf32>
    %48 = arith.addf %44, %47 : vector<16x96xf32>
    %49 = vector.extract_strided_slice %48 {offsets = [0, 0], sizes = [16, 32], strides = [1, 1]} : vector<16x96xf32> to vector<16x32xf32>
    %50 = vector.extract_strided_slice %48 {offsets = [0, 32], sizes = [16, 32], strides = [1, 1]} : vector<16x96xf32> to vector<16x32xf32>
    %51 = vector.extract_strided_slice %48 {offsets = [0, 64], sizes = [16, 32], strides = [1, 1]} : vector<16x96xf32> to vector<16x32xf32>
    %52 = vector.extract_strided_slice %49 {offsets = [0, 0], sizes = [16, 8], strides = [1, 1]} : vector<16x32xf32> to vector<16x8xf32>
    %53 = vector.extract_strided_slice %50 {offsets = [0, 0], sizes = [16, 8], strides = [1, 1]} : vector<16x32xf32> to vector<16x8xf32>
    %cst_25 = arith.constant dense<0.000000e+00> : vector<16x16xf32>
    %54 = tpu.matmul %52, %53, %cst_25 {dimension_numbers = #tpu.dot_dimension_numbers<[1], [1], [0], [0], [0, 0, 1, 0], [], []>} : vector<16x8xf32>, vector<16x8xf32>, vector<16x16xf32> -> vector<16x16xf32>
    %cst_26 = arith.constant 0.353553385 : f32
    %55 = vector.broadcast %cst_26 : f32 to vector<16x16xf32>
    %56 = arith.mulf %54, %55 : vector<16x16xf32>
    %cst_27 = arith.constant dense<0xFF800000> : vector<16xf32>
    %57 = vector.multi_reduction <maximumf>, %56, %cst_27 [1] : vector<16x16xf32> to vector<16xf32>
    %58 = vector.shape_cast %57 : vector<16xf32> to vector<16x1xf32>
    %59 = vector.broadcast %58 : vector<16x1xf32> to vector<16x16xf32>
    %60 = arith.subf %56, %59 : vector<16x16xf32>
    %61 = math.exp %60 : vector<16x16xf32>
    %cst_28 = arith.constant dense<0.000000e+00> : vector<16xf32>
    %62 = vector.multi_reduction <add>, %61, %cst_28 [1] : vector<16x16xf32> to vector<16xf32>
    %63 = vector.shape_cast %62 : vector<16xf32> to vector<16x1xf32>
    %64 = tpu.reciprocal %63 {approx = true} : vector<16x1xf32> -> vector<16x1xf32>
    %65 = vector.broadcast %64 : vector<16x1xf32> to vector<16x16xf32>
    %66 = arith.mulf %61, %65 : vector<16x16xf32>
    %67 = vector.extract_strided_slice %51 {offsets = [0, 0], sizes = [16, 8], strides = [1, 1]} : vector<16x32xf32> to vector<16x8xf32>
    %cst_29 = arith.constant dense<0.000000e+00> : vector<16x8xf32>
    %68 = tpu.matmul %66, %67, %cst_29 {dimension_numbers = #tpu.dot_dimension_numbers<[1], [0], [0], [1], [0, 0, 1, 1], [], []>} : vector<16x16xf32>, vector<16x8xf32>, vector<16x8xf32> -> vector<16x8xf32>
    %69 = vector.extract_strided_slice %49 {offsets = [0, 8], sizes = [16, 8], strides = [1, 1]} : vector<16x32xf32> to vector<16x8xf32>
    %70 = vector.extract_strided_slice %50 {offsets = [0, 8], sizes = [16, 8], strides = [1, 1]} : vector<16x32xf32> to vector<16x8xf32>
    %cst_30 = arith.constant dense<0.000000e+00> : vector<16x16xf32>
    %71 = tpu.matmul %69, %70, %cst_30 {dimension_numbers = #tpu.dot_dimension_numbers<[1], [1], [0], [0], [0, 0, 1, 0], [], []>} : vector<16x8xf32>, vector<16x8xf32>, vector<16x16xf32> -> vector<16x16xf32>
    %cst_31 = arith.constant 0.353553385 : f32
    %72 = vector.broadcast %cst_31 : f32 to vector<16x16xf32>
    %73 = arith.mulf %71, %72 : vector<16x16xf32>
    %cst_32 = arith.constant dense<0xFF800000> : vector<16xf32>
    %74 = vector.multi_reduction <maximumf>, %73, %cst_32 [1] : vector<16x16xf32> to vector<16xf32>
    %75 = vector.shape_cast %74 : vector<16xf32> to vector<16x1xf32>
    %76 = vector.broadcast %75 : vector<16x1xf32> to vector<16x16xf32>
    %77 = arith.subf %73, %76 : vector<16x16xf32>
    %78 = math.exp %77 : vector<16x16xf32>
    %cst_33 = arith.constant dense<0.000000e+00> : vector<16xf32>
    %79 = vector.multi_reduction <add>, %78, %cst_33 [1] : vector<16x16xf32> to vector<16xf32>
    %80 = vector.shape_cast %79 : vector<16xf32> to vector<16x1xf32>
    %81 = tpu.reciprocal %80 {approx = true} : vector<16x1xf32> -> vector<16x1xf32>
    %82 = vector.broadcast %81 : vector<16x1xf32> to vector<16x16xf32>
    %83 = arith.mulf %78, %82 : vector<16x16xf32>
    %84 = vector.extract_strided_slice %51 {offsets = [0, 8], sizes = [16, 8], strides = [1, 1]} : vector<16x32xf32> to vector<16x8xf32>
    %cst_34 = arith.constant dense<0.000000e+00> : vector<16x8xf32>
    %85 = tpu.matmul %83, %84, %cst_34 {dimension_numbers = #tpu.dot_dimension_numbers<[1], [0], [0], [1], [0, 0, 1, 1], [], []>} : vector<16x16xf32>, vector<16x8xf32>, vector<16x8xf32> -> vector<16x8xf32>
    %86 = vector.extract_strided_slice %49 {offsets = [0, 16], sizes = [16, 8], strides = [1, 1]} : vector<16x32xf32> to vector<16x8xf32>
    %87 = vector.extract_strided_slice %50 {offsets = [0, 16], sizes = [16, 8], strides = [1, 1]} : vector<16x32xf32> to vector<16x8xf32>
    %cst_35 = arith.constant dense<0.000000e+00> : vector<16x16xf32>
    %88 = tpu.matmul %86, %87, %cst_35 {dimension_numbers = #tpu.dot_dimension_numbers<[1], [1], [0], [0], [0, 0, 1, 0], [], []>} : vector<16x8xf32>, vector<16x8xf32>, vector<16x16xf32> -> vector<16x16xf32>
    %cst_36 = arith.constant 0.353553385 : f32
    %89 = vector.broadcast %cst_36 : f32 to vector<16x16xf32>
    %90 = arith.mulf %88, %89 : vector<16x16xf32>
    %cst_37 = arith.constant dense<0xFF800000> : vector<16xf32>
    %91 = vector.multi_reduction <maximumf>, %90, %cst_37 [1] : vector<16x16xf32> to vector<16xf32>
    %92 = vector.shape_cast %91 : vector<16xf32> to vector<16x1xf32>
    %93 = vector.broadcast %92 : vector<16x1xf32> to vector<16x16xf32>
    %94 = arith.subf %90, %93 : vector<16x16xf32>
    %95 = math.exp %94 : vector<16x16xf32>
    %cst_38 = arith.constant dense<0.000000e+00> : vector<16xf32>
    %96 = vector.multi_reduction <add>, %95, %cst_38 [1] : vector<16x16xf32> to vector<16xf32>
    %97 = vector.shape_cast %96 : vector<16xf32> to vector<16x1xf32>
    %98 = tpu.reciprocal %97 {approx = true} : vector<16x1xf32> -> vector<16x1xf32>
    %99 = vector.broadcast %98 : vector<16x1xf32> to vector<16x16xf32>
    %100 = arith.mulf %95, %99 : vector<16x16xf32>
    %101 = vector.extract_strided_slice %51 {offsets = [0, 16], sizes = [16, 8], strides = [1, 1]} : vector<16x32xf32> to vector<16x8xf32>
    %cst_39 = arith.constant dense<0.000000e+00> : vector<16x8xf32>
    %102 = tpu.matmul %100, %101, %cst_39 {dimension_numbers = #tpu.dot_dimension_numbers<[1], [0], [0], [1], [0, 0, 1, 1], [], []>} : vector<16x16xf32>, vector<16x8xf32>, vector<16x8xf32> -> vector<16x8xf32>
    %103 = vector.extract_strided_slice %49 {offsets = [0, 24], sizes = [16, 8], strides = [1, 1]} : vector<16x32xf32> to vector<16x8xf32>
    %104 = vector.extract_strided_slice %50 {offsets = [0, 24], sizes = [16, 8], strides = [1, 1]} : vector<16x32xf32> to vector<16x8xf32>
    %cst_40 = arith.constant dense<0.000000e+00> : vector<16x16xf32>
    %105 = tpu.matmul %103, %104, %cst_40 {dimension_numbers = #tpu.dot_dimension_numbers<[1], [1], [0], [0], [0, 0, 1, 0], [], []>} : vector<16x8xf32>, vector<16x8xf32>, vector<16x16xf32> -> vector<16x16xf32>
    %cst_41 = arith.constant 0.353553385 : f32
    %106 = vector.broadcast %cst_41 : f32 to vector<16x16xf32>
    %107 = arith.mulf %105, %106 : vector<16x16xf32>
    %cst_42 = arith.constant dense<0xFF800000> : vector<16xf32>
    %108 = vector.multi_reduction <maximumf>, %107, %cst_42 [1] : vector<16x16xf32> to vector<16xf32>
    %109 = vector.shape_cast %108 : vector<16xf32> to vector<16x1xf32>
    %110 = vector.broadcast %109 : vector<16x1xf32> to vector<16x16xf32>
    %111 = arith.subf %107, %110 : vector<16x16xf32>
    %112 = math.exp %111 : vector<16x16xf32>
    %cst_43 = arith.constant dense<0.000000e+00> : vector<16xf32>
    %113 = vector.multi_reduction <add>, %112, %cst_43 [1] : vector<16x16xf32> to vector<16xf32>
    %114 = vector.shape_cast %113 : vector<16xf32> to vector<16x1xf32>
    %115 = tpu.reciprocal %114 {approx = true} : vector<16x1xf32> -> vector<16x1xf32>
    %116 = vector.broadcast %115 : vector<16x1xf32> to vector<16x16xf32>
    %117 = arith.mulf %112, %116 : vector<16x16xf32>
    %118 = vector.extract_strided_slice %51 {offsets = [0, 24], sizes = [16, 8], strides = [1, 1]} : vector<16x32xf32> to vector<16x8xf32>
    %cst_44 = arith.constant dense<0.000000e+00> : vector<16x8xf32>
    %119 = tpu.matmul %117, %118, %cst_44 {dimension_numbers = #tpu.dot_dimension_numbers<[1], [0], [0], [1], [0, 0, 1, 1], [], []>} : vector<16x16xf32>, vector<16x8xf32>, vector<16x8xf32> -> vector<16x8xf32>
    %120 = tpu.concatenate %68, %85, %102, %119 in 1 : vector<16x8xf32>, vector<16x8xf32>, vector<16x8xf32>, vector<16x8xf32> -> vector<16x32xf32>
    %c0_45 = arith.constant 0 : index
    %c0_46 = arith.constant 0 : index
    %c96 = arith.constant 96 : index
    %121 = vector.load %arg3[%c0_45, %c0_46, %c96] : memref<2x32x288xf32, #tpu.memory_space<vmem>>, vector<1x32x32xf32>
    %122 = vector.shape_cast %121 : vector<1x32x32xf32> to vector<32x32xf32>
    %cst_47 = arith.constant dense<0.000000e+00> : vector<16x32xf32>
    %123 = tpu.matmul %120, %122, %cst_47 {dimension_numbers = #tpu.dot_dimension_numbers<[1], [0], [0], [1], [0, 0, 1, 1], [], []>} : vector<16x32xf32>, vector<32x32xf32>, vector<16x32xf32> -> vector<16x32xf32>
    %124 = arith.addf %13, %123 : vector<16x32xf32>
    %c0_48 = arith.constant 0 : index
    %c3 = arith.constant 3 : index
    %c0_49 = arith.constant 0 : index
    %125 = vector.load %arg6[%c0_48, %c3, %c0_49] : memref<2x13x96xf32, #tpu.memory_space<vmem>>, vector<1x1x32xf32>
    %126 = vector.shape_cast %125 : vector<1x1x32xf32> to vector<1x32xf32>
    %127 = vector.broadcast %126 : vector<1x32xf32> to vector<16x32xf32>
    %128 = arith.addf %124, %127 : vector<16x32xf32>
    %c0_50 = arith.constant 0 : index
    %c4 = arith.constant 4 : index
    %c0_51 = arith.constant 0 : index
    %129 = vector.load %arg6[%c0_50, %c4, %c0_51] : memref<2x13x96xf32, #tpu.memory_space<vmem>>, vector<1x1x32xf32>
    %130 = vector.shape_cast %129 : vector<1x1x32xf32> to vector<1x32xf32>
    %c0_52 = arith.constant 0 : index
    %c5 = arith.constant 5 : index
    %c0_53 = arith.constant 0 : index
    %131 = vector.load %arg6[%c0_52, %c5, %c0_53] : memref<2x13x96xf32, #tpu.memory_space<vmem>>, vector<1x1x32xf32>
    %132 = vector.shape_cast %131 : vector<1x1x32xf32> to vector<1x32xf32>
    %cst_54 = arith.constant dense<0.000000e+00> : vector<16xf32>
    %133 = vector.multi_reduction <add>, %128, %cst_54 [1] : vector<16x32xf32> to vector<16xf32>
    %134 = vector.shape_cast %133 : vector<16xf32> to vector<16x1xf32>
    %cst_55 = arith.constant 3.200000e+01 : f32
    %135 = vector.broadcast %cst_55 : f32 to vector<16x1xf32>
    %136 = arith.divf %134, %135 : vector<16x1xf32>
    %137 = vector.broadcast %136 : vector<16x1xf32> to vector<16x32xf32>
    %138 = arith.subf %128, %137 : vector<16x32xf32>
    %139 = arith.mulf %138, %138 : vector<16x32xf32>
    %cst_56 = arith.constant dense<0.000000e+00> : vector<16xf32>
    %140 = vector.multi_reduction <add>, %139, %cst_56 [1] : vector<16x32xf32> to vector<16xf32>
    %141 = vector.shape_cast %140 : vector<16xf32> to vector<16x1xf32>
    %cst_57 = arith.constant 3.200000e+01 : f32
    %142 = vector.broadcast %cst_57 : f32 to vector<16x1xf32>
    %143 = arith.divf %141, %142 : vector<16x1xf32>
    %144 = vector.broadcast %136 : vector<16x1xf32> to vector<16x32xf32>
    %145 = arith.subf %128, %144 : vector<16x32xf32>
    %cst_58 = arith.constant 9.99999974E-6 : f32
    %146 = vector.broadcast %cst_58 : f32 to vector<16x1xf32>
    %147 = arith.addf %143, %146 : vector<16x1xf32>
    %148 = math.rsqrt %147 : vector<16x1xf32>
    %149 = vector.broadcast %148 : vector<16x1xf32> to vector<16x32xf32>
    %150 = arith.mulf %145, %149 : vector<16x32xf32>
    %151 = vector.broadcast %130 : vector<1x32xf32> to vector<16x32xf32>
    %152 = arith.mulf %150, %151 : vector<16x32xf32>
    %153 = vector.broadcast %132 : vector<1x32xf32> to vector<16x32xf32>
    %154 = arith.addf %152, %153 : vector<16x32xf32>
    %c0_59 = arith.constant 0 : index
    %c0_60 = arith.constant 0 : index
    %c128 = arith.constant 128 : index
    %155 = vector.load %arg3[%c0_59, %c0_60, %c128] : memref<2x32x288xf32, #tpu.memory_space<vmem>>, vector<1x32x64xf32>
    %156 = vector.shape_cast %155 : vector<1x32x64xf32> to vector<32x64xf32>
    %cst_61 = arith.constant dense<0.000000e+00> : vector<16x64xf32>
    %157 = tpu.matmul %154, %156, %cst_61 {dimension_numbers = #tpu.dot_dimension_numbers<[1], [0], [0], [1], [0, 0, 1, 1], [], []>} : vector<16x32xf32>, vector<32x64xf32>, vector<16x64xf32> -> vector<16x64xf32>
    %c0_62 = arith.constant 0 : index
    %c6 = arith.constant 6 : index
    %c0_63 = arith.constant 0 : index
    %158 = vector.load %arg6[%c0_62, %c6, %c0_63] : memref<2x13x96xf32, #tpu.memory_space<vmem>>, vector<1x1x64xf32>
    %159 = vector.shape_cast %158 : vector<1x1x64xf32> to vector<1x64xf32>
    %160 = vector.broadcast %159 : vector<1x64xf32> to vector<16x64xf32>
    %161 = arith.addf %157, %160 : vector<16x64xf32>
    %c0_64 = arith.constant 0 : index
    %c0_65 = arith.constant 0 : index
    %c0_66 = arith.constant 0 : index
    %162 = vector.load %arg4[%c0_64, %c0_65, %c0_66] : memref<2x8x64xf32, #tpu.memory_space<vmem>>, vector<1x8x64xf32>
    %163 = vector.shape_cast %162 : vector<1x8x64xf32> to vector<8x64xf32>
    %cst_67 = arith.constant dense<0.000000e+00> : vector<4x64xf32>
    %164 = tpu.matmul %15, %163, %cst_67 {dimension_numbers = #tpu.dot_dimension_numbers<[1], [0], [0], [1], [0, 0, 1, 1], [], []>} : vector<4x8xf32>, vector<8x64xf32>, vector<4x64xf32> -> vector<4x64xf32>
    %c0_68 = arith.constant 0 : index
    %c7 = arith.constant 7 : index
    %c0_69 = arith.constant 0 : index
    %165 = vector.load %arg6[%c0_68, %c7, %c0_69] : memref<2x13x96xf32, #tpu.memory_space<vmem>>, vector<1x1x64xf32>
    %166 = vector.shape_cast %165 : vector<1x1x64xf32> to vector<1x64xf32>
    %167 = vector.broadcast %166 : vector<1x64xf32> to vector<4x64xf32>
    %168 = arith.addf %164, %167 : vector<4x64xf32>
    %169 = vector.extract_strided_slice %161 {offsets = [0, 0], sizes = [16, 32], strides = [1, 1]} : vector<16x64xf32> to vector<16x32xf32>
    %170 = vector.extract_strided_slice %168 {offsets = [0, 0], sizes = [4, 32], strides = [1, 1]} : vector<4x64xf32> to vector<4x32xf32>
    %171 = vector.extract_strided_slice %168 {offsets = [0, 32], sizes = [4, 32], strides = [1, 1]} : vector<4x64xf32> to vector<4x32xf32>
    %172 = vector.extract_strided_slice %169 {offsets = [0, 0], sizes = [16, 8], strides = [1, 1]} : vector<16x32xf32> to vector<16x8xf32>
    %173 = vector.extract_strided_slice %170 {offsets = [0, 0], sizes = [4, 8], strides = [1, 1]} : vector<4x32xf32> to vector<4x8xf32>
    %cst_70 = arith.constant dense<0.000000e+00> : vector<16x4xf32>
    %174 = tpu.matmul %172, %173, %cst_70 {dimension_numbers = #tpu.dot_dimension_numbers<[1], [1], [0], [0], [0, 0, 1, 0], [], []>} : vector<16x8xf32>, vector<4x8xf32>, vector<16x4xf32> -> vector<16x4xf32>
    %cst_71 = arith.constant 0.353553385 : f32
    %175 = vector.broadcast %cst_71 : f32 to vector<16x4xf32>
    %176 = arith.mulf %174, %175 : vector<16x4xf32>
    %cst_72 = arith.constant dense<0xFF800000> : vector<16xf32>
    %177 = vector.multi_reduction <maximumf>, %176, %cst_72 [1] : vector<16x4xf32> to vector<16xf32>
    %178 = vector.shape_cast %177 : vector<16xf32> to vector<16x1xf32>
    %179 = vector.broadcast %178 : vector<16x1xf32> to vector<16x4xf32>
    %180 = arith.subf %176, %179 : vector<16x4xf32>
    %181 = math.exp %180 : vector<16x4xf32>
    %cst_73 = arith.constant dense<0.000000e+00> : vector<16xf32>
    %182 = vector.multi_reduction <add>, %181, %cst_73 [1] : vector<16x4xf32> to vector<16xf32>
    %183 = vector.shape_cast %182 : vector<16xf32> to vector<16x1xf32>
    %184 = tpu.reciprocal %183 {approx = true} : vector<16x1xf32> -> vector<16x1xf32>
    %185 = vector.broadcast %184 : vector<16x1xf32> to vector<16x4xf32>
    %186 = arith.mulf %181, %185 : vector<16x4xf32>
    %187 = vector.extract_strided_slice %171 {offsets = [0, 0], sizes = [4, 8], strides = [1, 1]} : vector<4x32xf32> to vector<4x8xf32>
    %cst_74 = arith.constant dense<0.000000e+00> : vector<16x8xf32>
    %188 = tpu.matmul %186, %187, %cst_74 {dimension_numbers = #tpu.dot_dimension_numbers<[1], [0], [0], [1], [0, 0, 1, 1], [], []>} : vector<16x4xf32>, vector<4x8xf32>, vector<16x8xf32> -> vector<16x8xf32>
    %189 = vector.extract_strided_slice %169 {offsets = [0, 8], sizes = [16, 8], strides = [1, 1]} : vector<16x32xf32> to vector<16x8xf32>
    %190 = vector.extract_strided_slice %170 {offsets = [0, 8], sizes = [4, 8], strides = [1, 1]} : vector<4x32xf32> to vector<4x8xf32>
    %cst_75 = arith.constant dense<0.000000e+00> : vector<16x4xf32>
    %191 = tpu.matmul %189, %190, %cst_75 {dimension_numbers = #tpu.dot_dimension_numbers<[1], [1], [0], [0], [0, 0, 1, 0], [], []>} : vector<16x8xf32>, vector<4x8xf32>, vector<16x4xf32> -> vector<16x4xf32>
    %cst_76 = arith.constant 0.353553385 : f32
    %192 = vector.broadcast %cst_76 : f32 to vector<16x4xf32>
    %193 = arith.mulf %191, %192 : vector<16x4xf32>
    %cst_77 = arith.constant dense<0xFF800000> : vector<16xf32>
    %194 = vector.multi_reduction <maximumf>, %193, %cst_77 [1] : vector<16x4xf32> to vector<16xf32>
    %195 = vector.shape_cast %194 : vector<16xf32> to vector<16x1xf32>
    %196 = vector.broadcast %195 : vector<16x1xf32> to vector<16x4xf32>
    %197 = arith.subf %193, %196 : vector<16x4xf32>
    %198 = math.exp %197 : vector<16x4xf32>
    %cst_78 = arith.constant dense<0.000000e+00> : vector<16xf32>
    %199 = vector.multi_reduction <add>, %198, %cst_78 [1] : vector<16x4xf32> to vector<16xf32>
    %200 = vector.shape_cast %199 : vector<16xf32> to vector<16x1xf32>
    %201 = tpu.reciprocal %200 {approx = true} : vector<16x1xf32> -> vector<16x1xf32>
    %202 = vector.broadcast %201 : vector<16x1xf32> to vector<16x4xf32>
    %203 = arith.mulf %198, %202 : vector<16x4xf32>
    %204 = vector.extract_strided_slice %171 {offsets = [0, 8], sizes = [4, 8], strides = [1, 1]} : vector<4x32xf32> to vector<4x8xf32>
    %cst_79 = arith.constant dense<0.000000e+00> : vector<16x8xf32>
    %205 = tpu.matmul %203, %204, %cst_79 {dimension_numbers = #tpu.dot_dimension_numbers<[1], [0], [0], [1], [0, 0, 1, 1], [], []>} : vector<16x4xf32>, vector<4x8xf32>, vector<16x8xf32> -> vector<16x8xf32>
    %206 = vector.extract_strided_slice %169 {offsets = [0, 16], sizes = [16, 8], strides = [1, 1]} : vector<16x32xf32> to vector<16x8xf32>
    %207 = vector.extract_strided_slice %170 {offsets = [0, 16], sizes = [4, 8], strides = [1, 1]} : vector<4x32xf32> to vector<4x8xf32>
    %cst_80 = arith.constant dense<0.000000e+00> : vector<16x4xf32>
    %208 = tpu.matmul %206, %207, %cst_80 {dimension_numbers = #tpu.dot_dimension_numbers<[1], [1], [0], [0], [0, 0, 1, 0], [], []>} : vector<16x8xf32>, vector<4x8xf32>, vector<16x4xf32> -> vector<16x4xf32>
    %cst_81 = arith.constant 0.353553385 : f32
    %209 = vector.broadcast %cst_81 : f32 to vector<16x4xf32>
    %210 = arith.mulf %208, %209 : vector<16x4xf32>
    %cst_82 = arith.constant dense<0xFF800000> : vector<16xf32>
    %211 = vector.multi_reduction <maximumf>, %210, %cst_82 [1] : vector<16x4xf32> to vector<16xf32>
    %212 = vector.shape_cast %211 : vector<16xf32> to vector<16x1xf32>
    %213 = vector.broadcast %212 : vector<16x1xf32> to vector<16x4xf32>
    %214 = arith.subf %210, %213 : vector<16x4xf32>
    %215 = math.exp %214 : vector<16x4xf32>
    %cst_83 = arith.constant dense<0.000000e+00> : vector<16xf32>
    %216 = vector.multi_reduction <add>, %215, %cst_83 [1] : vector<16x4xf32> to vector<16xf32>
    %217 = vector.shape_cast %216 : vector<16xf32> to vector<16x1xf32>
    %218 = tpu.reciprocal %217 {approx = true} : vector<16x1xf32> -> vector<16x1xf32>
    %219 = vector.broadcast %218 : vector<16x1xf32> to vector<16x4xf32>
    %220 = arith.mulf %215, %219 : vector<16x4xf32>
    %221 = vector.extract_strided_slice %171 {offsets = [0, 16], sizes = [4, 8], strides = [1, 1]} : vector<4x32xf32> to vector<4x8xf32>
    %cst_84 = arith.constant dense<0.000000e+00> : vector<16x8xf32>
    %222 = tpu.matmul %220, %221, %cst_84 {dimension_numbers = #tpu.dot_dimension_numbers<[1], [0], [0], [1], [0, 0, 1, 1], [], []>} : vector<16x4xf32>, vector<4x8xf32>, vector<16x8xf32> -> vector<16x8xf32>
    %223 = vector.extract_strided_slice %169 {offsets = [0, 24], sizes = [16, 8], strides = [1, 1]} : vector<16x32xf32> to vector<16x8xf32>
    %224 = vector.extract_strided_slice %170 {offsets = [0, 24], sizes = [4, 8], strides = [1, 1]} : vector<4x32xf32> to vector<4x8xf32>
    %cst_85 = arith.constant dense<0.000000e+00> : vector<16x4xf32>
    %225 = tpu.matmul %223, %224, %cst_85 {dimension_numbers = #tpu.dot_dimension_numbers<[1], [1], [0], [0], [0, 0, 1, 0], [], []>} : vector<16x8xf32>, vector<4x8xf32>, vector<16x4xf32> -> vector<16x4xf32>
    %cst_86 = arith.constant 0.353553385 : f32
    %226 = vector.broadcast %cst_86 : f32 to vector<16x4xf32>
    %227 = arith.mulf %225, %226 : vector<16x4xf32>
    %cst_87 = arith.constant dense<0xFF800000> : vector<16xf32>
    %228 = vector.multi_reduction <maximumf>, %227, %cst_87 [1] : vector<16x4xf32> to vector<16xf32>
    %229 = vector.shape_cast %228 : vector<16xf32> to vector<16x1xf32>
    %230 = vector.broadcast %229 : vector<16x1xf32> to vector<16x4xf32>
    %231 = arith.subf %227, %230 : vector<16x4xf32>
    %232 = math.exp %231 : vector<16x4xf32>
    %cst_88 = arith.constant dense<0.000000e+00> : vector<16xf32>
    %233 = vector.multi_reduction <add>, %232, %cst_88 [1] : vector<16x4xf32> to vector<16xf32>
    %234 = vector.shape_cast %233 : vector<16xf32> to vector<16x1xf32>
    %235 = tpu.reciprocal %234 {approx = true} : vector<16x1xf32> -> vector<16x1xf32>
    %236 = vector.broadcast %235 : vector<16x1xf32> to vector<16x4xf32>
    %237 = arith.mulf %232, %236 : vector<16x4xf32>
    %238 = vector.extract_strided_slice %171 {offsets = [0, 24], sizes = [4, 8], strides = [1, 1]} : vector<4x32xf32> to vector<4x8xf32>
    %cst_89 = arith.constant dense<0.000000e+00> : vector<16x8xf32>
    %239 = tpu.matmul %237, %238, %cst_89 {dimension_numbers = #tpu.dot_dimension_numbers<[1], [0], [0], [1], [0, 0, 1, 1], [], []>} : vector<16x4xf32>, vector<4x8xf32>, vector<16x8xf32> -> vector<16x8xf32>
    %240 = tpu.concatenate %188, %205, %222, %239 in 1 : vector<16x8xf32>, vector<16x8xf32>, vector<16x8xf32>, vector<16x8xf32> -> vector<16x32xf32>
    %c0_90 = arith.constant 0 : index
    %c0_91 = arith.constant 0 : index
    %c192 = arith.constant 192 : index
    %241 = vector.load %arg3[%c0_90, %c0_91, %c192] : memref<2x32x288xf32, #tpu.memory_space<vmem>>, vector<1x32x32xf32>
    %242 = vector.shape_cast %241 : vector<1x32x32xf32> to vector<32x32xf32>
    %cst_92 = arith.constant dense<0.000000e+00> : vector<16x32xf32>
    %243 = tpu.matmul %240, %242, %cst_92 {dimension_numbers = #tpu.dot_dimension_numbers<[1], [0], [0], [1], [0, 0, 1, 1], [], []>} : vector<16x32xf32>, vector<32x32xf32>, vector<16x32xf32> -> vector<16x32xf32>
    %c0_93 = arith.constant 0 : index
    %c8 = arith.constant 8 : index
    %c0_94 = arith.constant 0 : index
    %244 = vector.load %arg6[%c0_93, %c8, %c0_94] : memref<2x13x96xf32, #tpu.memory_space<vmem>>, vector<1x1x32xf32>
    %245 = vector.shape_cast %244 : vector<1x1x32xf32> to vector<1x32xf32>
    %246 = vector.broadcast %245 : vector<1x32xf32> to vector<16x32xf32>
    %247 = arith.addf %243, %246 : vector<16x32xf32>
    %248 = vector.extract_strided_slice %161 {offsets = [0, 32], sizes = [16, 32], strides = [1, 1]} : vector<16x64xf32> to vector<16x32xf32>
    %249 = arith.negf %248 : vector<16x32xf32>
    %250 = math.exp %249 : vector<16x32xf32>
    %cst_95 = arith.constant 1.000000e+00 : f32
    %251 = vector.broadcast %cst_95 : f32 to vector<16x32xf32>
    %252 = arith.addf %251, %250 : vector<16x32xf32>
    %253 = arith.divf %251, %252 : vector<16x32xf32>
    %254 = arith.mulf %253, %247 : vector<16x32xf32>
    %255 = arith.addf %128, %254 : vector<16x32xf32>
    %c0_96 = arith.constant 0 : index
    %c9 = arith.constant 9 : index
    %c0_97 = arith.constant 0 : index
    %256 = vector.load %arg6[%c0_96, %c9, %c0_97] : memref<2x13x96xf32, #tpu.memory_space<vmem>>, vector<1x1x32xf32>
    %257 = vector.shape_cast %256 : vector<1x1x32xf32> to vector<1x32xf32>
    %c0_98 = arith.constant 0 : index
    %c10 = arith.constant 10 : index
    %c0_99 = arith.constant 0 : index
    %258 = vector.load %arg6[%c0_98, %c10, %c0_99] : memref<2x13x96xf32, #tpu.memory_space<vmem>>, vector<1x1x32xf32>
    %259 = vector.shape_cast %258 : vector<1x1x32xf32> to vector<1x32xf32>
    %cst_100 = arith.constant dense<0.000000e+00> : vector<16xf32>
    %260 = vector.multi_reduction <add>, %255, %cst_100 [1] : vector<16x32xf32> to vector<16xf32>
    %261 = vector.shape_cast %260 : vector<16xf32> to vector<16x1xf32>
    %cst_101 = arith.constant 3.200000e+01 : f32
    %262 = vector.broadcast %cst_101 : f32 to vector<16x1xf32>
    %263 = arith.divf %261, %262 : vector<16x1xf32>
    %264 = vector.broadcast %263 : vector<16x1xf32> to vector<16x32xf32>
    %265 = arith.subf %255, %264 : vector<16x32xf32>
    %266 = arith.mulf %265, %265 : vector<16x32xf32>
    %cst_102 = arith.constant dense<0.000000e+00> : vector<16xf32>
    %267 = vector.multi_reduction <add>, %266, %cst_102 [1] : vector<16x32xf32> to vector<16xf32>
    %268 = vector.shape_cast %267 : vector<16xf32> to vector<16x1xf32>
    %cst_103 = arith.constant 3.200000e+01 : f32
    %269 = vector.broadcast %cst_103 : f32 to vector<16x1xf32>
    %270 = arith.divf %268, %269 : vector<16x1xf32>
    %271 = vector.broadcast %263 : vector<16x1xf32> to vector<16x32xf32>
    %272 = arith.subf %255, %271 : vector<16x32xf32>
    %cst_104 = arith.constant 9.99999974E-6 : f32
    %273 = vector.broadcast %cst_104 : f32 to vector<16x1xf32>
    %274 = arith.addf %270, %273 : vector<16x1xf32>
    %275 = math.rsqrt %274 : vector<16x1xf32>
    %276 = vector.broadcast %275 : vector<16x1xf32> to vector<16x32xf32>
    %277 = arith.mulf %272, %276 : vector<16x32xf32>
    %278 = vector.broadcast %257 : vector<1x32xf32> to vector<16x32xf32>
    %279 = arith.mulf %277, %278 : vector<16x32xf32>
    %280 = vector.broadcast %259 : vector<1x32xf32> to vector<16x32xf32>
    %281 = arith.addf %279, %280 : vector<16x32xf32>
    %c0_105 = arith.constant 0 : index
    %c0_106 = arith.constant 0 : index
    %c224 = arith.constant 224 : index
    %282 = vector.load %arg3[%c0_105, %c0_106, %c224] : memref<2x32x288xf32, #tpu.memory_space<vmem>>, vector<1x32x64xf32>
    %283 = vector.shape_cast %282 : vector<1x32x64xf32> to vector<32x64xf32>
    %cst_107 = arith.constant dense<0.000000e+00> : vector<16x64xf32>
    %284 = tpu.matmul %281, %283, %cst_107 {dimension_numbers = #tpu.dot_dimension_numbers<[1], [0], [0], [1], [0, 0, 1, 1], [], []>} : vector<16x32xf32>, vector<32x64xf32>, vector<16x64xf32> -> vector<16x64xf32>
    %c0_108 = arith.constant 0 : index
    %c11 = arith.constant 11 : index
    %c0_109 = arith.constant 0 : index
    %285 = vector.load %arg6[%c0_108, %c11, %c0_109] : memref<2x13x96xf32, #tpu.memory_space<vmem>>, vector<1x1x64xf32>
    %286 = vector.shape_cast %285 : vector<1x1x64xf32> to vector<1x64xf32>
    %287 = vector.broadcast %286 : vector<1x64xf32> to vector<16x64xf32>
    %288 = arith.addf %284, %287 : vector<16x64xf32>
    %289 = arith.mulf %288, %288 : vector<16x64xf32>
    %290 = arith.mulf %288, %289 : vector<16x64xf32>
    %cst_110 = arith.constant 4.471500e-02 : f32
    %291 = vector.broadcast %cst_110 : f32 to vector<16x64xf32>
    %292 = arith.mulf %291, %290 : vector<16x64xf32>
    %293 = arith.addf %288, %292 : vector<16x64xf32>
    %cst_111 = arith.constant 0.797884583 : f32
    %294 = vector.broadcast %cst_111 : f32 to vector<16x64xf32>
    %295 = arith.mulf %294, %293 : vector<16x64xf32>
    %296 = math.tanh %295 : vector<16x64xf32>
    %cst_112 = arith.constant 1.000000e+00 : f32
    %297 = vector.broadcast %cst_112 : f32 to vector<16x64xf32>
    %298 = arith.addf %297, %296 : vector<16x64xf32>
    %cst_113 = arith.constant 5.000000e-01 : f32
    %299 = vector.broadcast %cst_113 : f32 to vector<16x64xf32>
    %300 = arith.mulf %299, %298 : vector<16x64xf32>
    %301 = arith.mulf %288, %300 : vector<16x64xf32>
    %c0_114 = arith.constant 0 : index
    %c0_115 = arith.constant 0 : index
    %c0_116 = arith.constant 0 : index
    %302 = vector.load %arg5[%c0_114, %c0_115, %c0_116] : memref<2x64x32xf32, #tpu.memory_space<vmem>>, vector<1x64x32xf32>
    %303 = vector.shape_cast %302 : vector<1x64x32xf32> to vector<64x32xf32>
    %cst_117 = arith.constant dense<0.000000e+00> : vector<16x32xf32>
    %304 = tpu.matmul %301, %303, %cst_117 {dimension_numbers = #tpu.dot_dimension_numbers<[1], [0], [0], [1], [0, 0, 1, 1], [], []>} : vector<16x64xf32>, vector<64x32xf32>, vector<16x32xf32> -> vector<16x32xf32>
    %305 = arith.addf %255, %304 : vector<16x32xf32>
    %c0_118 = arith.constant 0 : index
    %c12 = arith.constant 12 : index
    %c0_119 = arith.constant 0 : index
    %306 = vector.load %arg6[%c0_118, %c12, %c0_119] : memref<2x13x96xf32, #tpu.memory_space<vmem>>, vector<1x1x32xf32>
    %307 = vector.shape_cast %306 : vector<1x1x32xf32> to vector<1x32xf32>
    %308 = vector.broadcast %307 : vector<1x32xf32> to vector<16x32xf32>
    %309 = arith.addf %305, %308 : vector<16x32xf32>
    %c1_120 = arith.constant 1 : index
    %c0_121 = arith.constant 0 : index
    %c0_122 = arith.constant 0 : index
    %310 = vector.load %arg6[%c1_120, %c0_121, %c0_122] : memref<2x13x96xf32, #tpu.memory_space<vmem>>, vector<1x1x32xf32>
    %311 = vector.shape_cast %310 : vector<1x1x32xf32> to vector<1x32xf32>
    %c1_123 = arith.constant 1 : index
    %c1_124 = arith.constant 1 : index
    %c0_125 = arith.constant 0 : index
    %312 = vector.load %arg6[%c1_123, %c1_124, %c0_125] : memref<2x13x96xf32, #tpu.memory_space<vmem>>, vector<1x1x32xf32>
    %313 = vector.shape_cast %312 : vector<1x1x32xf32> to vector<1x32xf32>
    %cst_126 = arith.constant dense<0.000000e+00> : vector<16xf32>
    %314 = vector.multi_reduction <add>, %309, %cst_126 [1] : vector<16x32xf32> to vector<16xf32>
    %315 = vector.shape_cast %314 : vector<16xf32> to vector<16x1xf32>
    %cst_127 = arith.constant 3.200000e+01 : f32
    %316 = vector.broadcast %cst_127 : f32 to vector<16x1xf32>
    %317 = arith.divf %315, %316 : vector<16x1xf32>
    %318 = vector.broadcast %317 : vector<16x1xf32> to vector<16x32xf32>
    %319 = arith.subf %309, %318 : vector<16x32xf32>
    %320 = arith.mulf %319, %319 : vector<16x32xf32>
    %cst_128 = arith.constant dense<0.000000e+00> : vector<16xf32>
    %321 = vector.multi_reduction <add>, %320, %cst_128 [1] : vector<16x32xf32> to vector<16xf32>
    %322 = vector.shape_cast %321 : vector<16xf32> to vector<16x1xf32>
    %cst_129 = arith.constant 3.200000e+01 : f32
    %323 = vector.broadcast %cst_129 : f32 to vector<16x1xf32>
    %324 = arith.divf %322, %323 : vector<16x1xf32>
    %325 = vector.broadcast %317 : vector<16x1xf32> to vector<16x32xf32>
    %326 = arith.subf %309, %325 : vector<16x32xf32>
    %cst_130 = arith.constant 9.99999974E-6 : f32
    %327 = vector.broadcast %cst_130 : f32 to vector<16x1xf32>
    %328 = arith.addf %324, %327 : vector<16x1xf32>
    %329 = math.rsqrt %328 : vector<16x1xf32>
    %330 = vector.broadcast %329 : vector<16x1xf32> to vector<16x32xf32>
    %331 = arith.mulf %326, %330 : vector<16x32xf32>
    %332 = vector.broadcast %311 : vector<1x32xf32> to vector<16x32xf32>
    %333 = arith.mulf %331, %332 : vector<16x32xf32>
    %334 = vector.broadcast %313 : vector<1x32xf32> to vector<16x32xf32>
    %335 = arith.addf %333, %334 : vector<16x32xf32>
    %c1_131 = arith.constant 1 : index
    %c0_132 = arith.constant 0 : index
    %c0_133 = arith.constant 0 : index
    %336 = vector.load %arg3[%c1_131, %c0_132, %c0_133] : memref<2x32x288xf32, #tpu.memory_space<vmem>>, vector<1x32x96xf32>
    %337 = vector.shape_cast %336 : vector<1x32x96xf32> to vector<32x96xf32>
    %cst_134 = arith.constant dense<0.000000e+00> : vector<16x96xf32>
    %338 = tpu.matmul %335, %337, %cst_134 {dimension_numbers = #tpu.dot_dimension_numbers<[1], [0], [0], [1], [0, 0, 1, 1], [], []>} : vector<16x32xf32>, vector<32x96xf32>, vector<16x96xf32> -> vector<16x96xf32>
    %c1_135 = arith.constant 1 : index
    %c2_136 = arith.constant 2 : index
    %c0_137 = arith.constant 0 : index
    %339 = vector.load %arg6[%c1_135, %c2_136, %c0_137] : memref<2x13x96xf32, #tpu.memory_space<vmem>>, vector<1x1x96xf32>
    %340 = vector.shape_cast %339 : vector<1x1x96xf32> to vector<1x96xf32>
    %341 = vector.broadcast %340 : vector<1x96xf32> to vector<16x96xf32>
    %342 = arith.addf %338, %341 : vector<16x96xf32>
    %343 = vector.extract_strided_slice %342 {offsets = [0, 0], sizes = [16, 32], strides = [1, 1]} : vector<16x96xf32> to vector<16x32xf32>
    %344 = vector.extract_strided_slice %342 {offsets = [0, 32], sizes = [16, 32], strides = [1, 1]} : vector<16x96xf32> to vector<16x32xf32>
    %345 = vector.extract_strided_slice %342 {offsets = [0, 64], sizes = [16, 32], strides = [1, 1]} : vector<16x96xf32> to vector<16x32xf32>
    %346 = vector.extract_strided_slice %343 {offsets = [0, 0], sizes = [16, 8], strides = [1, 1]} : vector<16x32xf32> to vector<16x8xf32>
    %347 = vector.extract_strided_slice %344 {offsets = [0, 0], sizes = [16, 8], strides = [1, 1]} : vector<16x32xf32> to vector<16x8xf32>
    %cst_138 = arith.constant dense<0.000000e+00> : vector<16x16xf32>
    %348 = tpu.matmul %346, %347, %cst_138 {dimension_numbers = #tpu.dot_dimension_numbers<[1], [1], [0], [0], [0, 0, 1, 0], [], []>} : vector<16x8xf32>, vector<16x8xf32>, vector<16x16xf32> -> vector<16x16xf32>
    %cst_139 = arith.constant 0.353553385 : f32
    %349 = vector.broadcast %cst_139 : f32 to vector<16x16xf32>
    %350 = arith.mulf %348, %349 : vector<16x16xf32>
    %cst_140 = arith.constant dense<0xFF800000> : vector<16xf32>
    %351 = vector.multi_reduction <maximumf>, %350, %cst_140 [1] : vector<16x16xf32> to vector<16xf32>
    %352 = vector.shape_cast %351 : vector<16xf32> to vector<16x1xf32>
    %353 = vector.broadcast %352 : vector<16x1xf32> to vector<16x16xf32>
    %354 = arith.subf %350, %353 : vector<16x16xf32>
    %355 = math.exp %354 : vector<16x16xf32>
    %cst_141 = arith.constant dense<0.000000e+00> : vector<16xf32>
    %356 = vector.multi_reduction <add>, %355, %cst_141 [1] : vector<16x16xf32> to vector<16xf32>
    %357 = vector.shape_cast %356 : vector<16xf32> to vector<16x1xf32>
    %358 = tpu.reciprocal %357 {approx = true} : vector<16x1xf32> -> vector<16x1xf32>
    %359 = vector.broadcast %358 : vector<16x1xf32> to vector<16x16xf32>
    %360 = arith.mulf %355, %359 : vector<16x16xf32>
    %361 = vector.extract_strided_slice %345 {offsets = [0, 0], sizes = [16, 8], strides = [1, 1]} : vector<16x32xf32> to vector<16x8xf32>
    %cst_142 = arith.constant dense<0.000000e+00> : vector<16x8xf32>
    %362 = tpu.matmul %360, %361, %cst_142 {dimension_numbers = #tpu.dot_dimension_numbers<[1], [0], [0], [1], [0, 0, 1, 1], [], []>} : vector<16x16xf32>, vector<16x8xf32>, vector<16x8xf32> -> vector<16x8xf32>
    %363 = vector.extract_strided_slice %343 {offsets = [0, 8], sizes = [16, 8], strides = [1, 1]} : vector<16x32xf32> to vector<16x8xf32>
    %364 = vector.extract_strided_slice %344 {offsets = [0, 8], sizes = [16, 8], strides = [1, 1]} : vector<16x32xf32> to vector<16x8xf32>
    %cst_143 = arith.constant dense<0.000000e+00> : vector<16x16xf32>
    %365 = tpu.matmul %363, %364, %cst_143 {dimension_numbers = #tpu.dot_dimension_numbers<[1], [1], [0], [0], [0, 0, 1, 0], [], []>} : vector<16x8xf32>, vector<16x8xf32>, vector<16x16xf32> -> vector<16x16xf32>
    %cst_144 = arith.constant 0.353553385 : f32
    %366 = vector.broadcast %cst_144 : f32 to vector<16x16xf32>
    %367 = arith.mulf %365, %366 : vector<16x16xf32>
    %cst_145 = arith.constant dense<0xFF800000> : vector<16xf32>
    %368 = vector.multi_reduction <maximumf>, %367, %cst_145 [1] : vector<16x16xf32> to vector<16xf32>
    %369 = vector.shape_cast %368 : vector<16xf32> to vector<16x1xf32>
    %370 = vector.broadcast %369 : vector<16x1xf32> to vector<16x16xf32>
    %371 = arith.subf %367, %370 : vector<16x16xf32>
    %372 = math.exp %371 : vector<16x16xf32>
    %cst_146 = arith.constant dense<0.000000e+00> : vector<16xf32>
    %373 = vector.multi_reduction <add>, %372, %cst_146 [1] : vector<16x16xf32> to vector<16xf32>
    %374 = vector.shape_cast %373 : vector<16xf32> to vector<16x1xf32>
    %375 = tpu.reciprocal %374 {approx = true} : vector<16x1xf32> -> vector<16x1xf32>
    %376 = vector.broadcast %375 : vector<16x1xf32> to vector<16x16xf32>
    %377 = arith.mulf %372, %376 : vector<16x16xf32>
    %378 = vector.extract_strided_slice %345 {offsets = [0, 8], sizes = [16, 8], strides = [1, 1]} : vector<16x32xf32> to vector<16x8xf32>
    %cst_147 = arith.constant dense<0.000000e+00> : vector<16x8xf32>
    %379 = tpu.matmul %377, %378, %cst_147 {dimension_numbers = #tpu.dot_dimension_numbers<[1], [0], [0], [1], [0, 0, 1, 1], [], []>} : vector<16x16xf32>, vector<16x8xf32>, vector<16x8xf32> -> vector<16x8xf32>
    %380 = vector.extract_strided_slice %343 {offsets = [0, 16], sizes = [16, 8], strides = [1, 1]} : vector<16x32xf32> to vector<16x8xf32>
    %381 = vector.extract_strided_slice %344 {offsets = [0, 16], sizes = [16, 8], strides = [1, 1]} : vector<16x32xf32> to vector<16x8xf32>
    %cst_148 = arith.constant dense<0.000000e+00> : vector<16x16xf32>
    %382 = tpu.matmul %380, %381, %cst_148 {dimension_numbers = #tpu.dot_dimension_numbers<[1], [1], [0], [0], [0, 0, 1, 0], [], []>} : vector<16x8xf32>, vector<16x8xf32>, vector<16x16xf32> -> vector<16x16xf32>
    %cst_149 = arith.constant 0.353553385 : f32
    %383 = vector.broadcast %cst_149 : f32 to vector<16x16xf32>
    %384 = arith.mulf %382, %383 : vector<16x16xf32>
    %cst_150 = arith.constant dense<0xFF800000> : vector<16xf32>
    %385 = vector.multi_reduction <maximumf>, %384, %cst_150 [1] : vector<16x16xf32> to vector<16xf32>
    %386 = vector.shape_cast %385 : vector<16xf32> to vector<16x1xf32>
    %387 = vector.broadcast %386 : vector<16x1xf32> to vector<16x16xf32>
    %388 = arith.subf %384, %387 : vector<16x16xf32>
    %389 = math.exp %388 : vector<16x16xf32>
    %cst_151 = arith.constant dense<0.000000e+00> : vector<16xf32>
    %390 = vector.multi_reduction <add>, %389, %cst_151 [1] : vector<16x16xf32> to vector<16xf32>
    %391 = vector.shape_cast %390 : vector<16xf32> to vector<16x1xf32>
    %392 = tpu.reciprocal %391 {approx = true} : vector<16x1xf32> -> vector<16x1xf32>
    %393 = vector.broadcast %392 : vector<16x1xf32> to vector<16x16xf32>
    %394 = arith.mulf %389, %393 : vector<16x16xf32>
    %395 = vector.extract_strided_slice %345 {offsets = [0, 16], sizes = [16, 8], strides = [1, 1]} : vector<16x32xf32> to vector<16x8xf32>
    %cst_152 = arith.constant dense<0.000000e+00> : vector<16x8xf32>
    %396 = tpu.matmul %394, %395, %cst_152 {dimension_numbers = #tpu.dot_dimension_numbers<[1], [0], [0], [1], [0, 0, 1, 1], [], []>} : vector<16x16xf32>, vector<16x8xf32>, vector<16x8xf32> -> vector<16x8xf32>
    %397 = vector.extract_strided_slice %343 {offsets = [0, 24], sizes = [16, 8], strides = [1, 1]} : vector<16x32xf32> to vector<16x8xf32>
    %398 = vector.extract_strided_slice %344 {offsets = [0, 24], sizes = [16, 8], strides = [1, 1]} : vector<16x32xf32> to vector<16x8xf32>
    %cst_153 = arith.constant dense<0.000000e+00> : vector<16x16xf32>
    %399 = tpu.matmul %397, %398, %cst_153 {dimension_numbers = #tpu.dot_dimension_numbers<[1], [1], [0], [0], [0, 0, 1, 0], [], []>} : vector<16x8xf32>, vector<16x8xf32>, vector<16x16xf32> -> vector<16x16xf32>
    %cst_154 = arith.constant 0.353553385 : f32
    %400 = vector.broadcast %cst_154 : f32 to vector<16x16xf32>
    %401 = arith.mulf %399, %400 : vector<16x16xf32>
    %cst_155 = arith.constant dense<0xFF800000> : vector<16xf32>
    %402 = vector.multi_reduction <maximumf>, %401, %cst_155 [1] : vector<16x16xf32> to vector<16xf32>
    %403 = vector.shape_cast %402 : vector<16xf32> to vector<16x1xf32>
    %404 = vector.broadcast %403 : vector<16x1xf32> to vector<16x16xf32>
    %405 = arith.subf %401, %404 : vector<16x16xf32>
    %406 = math.exp %405 : vector<16x16xf32>
    %cst_156 = arith.constant dense<0.000000e+00> : vector<16xf32>
    %407 = vector.multi_reduction <add>, %406, %cst_156 [1] : vector<16x16xf32> to vector<16xf32>
    %408 = vector.shape_cast %407 : vector<16xf32> to vector<16x1xf32>
    %409 = tpu.reciprocal %408 {approx = true} : vector<16x1xf32> -> vector<16x1xf32>
    %410 = vector.broadcast %409 : vector<16x1xf32> to vector<16x16xf32>
    %411 = arith.mulf %406, %410 : vector<16x16xf32>
    %412 = vector.extract_strided_slice %345 {offsets = [0, 24], sizes = [16, 8], strides = [1, 1]} : vector<16x32xf32> to vector<16x8xf32>
    %cst_157 = arith.constant dense<0.000000e+00> : vector<16x8xf32>
    %413 = tpu.matmul %411, %412, %cst_157 {dimension_numbers = #tpu.dot_dimension_numbers<[1], [0], [0], [1], [0, 0, 1, 1], [], []>} : vector<16x16xf32>, vector<16x8xf32>, vector<16x8xf32> -> vector<16x8xf32>
    %414 = tpu.concatenate %362, %379, %396, %413 in 1 : vector<16x8xf32>, vector<16x8xf32>, vector<16x8xf32>, vector<16x8xf32> -> vector<16x32xf32>
    %c1_158 = arith.constant 1 : index
    %c0_159 = arith.constant 0 : index
    %c96_160 = arith.constant 96 : index
    %415 = vector.load %arg3[%c1_158, %c0_159, %c96_160] : memref<2x32x288xf32, #tpu.memory_space<vmem>>, vector<1x32x32xf32>
    %416 = vector.shape_cast %415 : vector<1x32x32xf32> to vector<32x32xf32>
    %cst_161 = arith.constant dense<0.000000e+00> : vector<16x32xf32>
    %417 = tpu.matmul %414, %416, %cst_161 {dimension_numbers = #tpu.dot_dimension_numbers<[1], [0], [0], [1], [0, 0, 1, 1], [], []>} : vector<16x32xf32>, vector<32x32xf32>, vector<16x32xf32> -> vector<16x32xf32>
    %418 = arith.addf %309, %417 : vector<16x32xf32>
    %c1_162 = arith.constant 1 : index
    %c3_163 = arith.constant 3 : index
    %c0_164 = arith.constant 0 : index
    %419 = vector.load %arg6[%c1_162, %c3_163, %c0_164] : memref<2x13x96xf32, #tpu.memory_space<vmem>>, vector<1x1x32xf32>
    %420 = vector.shape_cast %419 : vector<1x1x32xf32> to vector<1x32xf32>
    %421 = vector.broadcast %420 : vector<1x32xf32> to vector<16x32xf32>
    %422 = arith.addf %418, %421 : vector<16x32xf32>
    %c1_165 = arith.constant 1 : index
    %c4_166 = arith.constant 4 : index
    %c0_167 = arith.constant 0 : index
    %423 = vector.load %arg6[%c1_165, %c4_166, %c0_167] : memref<2x13x96xf32, #tpu.memory_space<vmem>>, vector<1x1x32xf32>
    %424 = vector.shape_cast %423 : vector<1x1x32xf32> to vector<1x32xf32>
    %c1_168 = arith.constant 1 : index
    %c5_169 = arith.constant 5 : index
    %c0_170 = arith.constant 0 : index
    %425 = vector.load %arg6[%c1_168, %c5_169, %c0_170] : memref<2x13x96xf32, #tpu.memory_space<vmem>>, vector<1x1x32xf32>
    %426 = vector.shape_cast %425 : vector<1x1x32xf32> to vector<1x32xf32>
    %cst_171 = arith.constant dense<0.000000e+00> : vector<16xf32>
    %427 = vector.multi_reduction <add>, %422, %cst_171 [1] : vector<16x32xf32> to vector<16xf32>
    %428 = vector.shape_cast %427 : vector<16xf32> to vector<16x1xf32>
    %cst_172 = arith.constant 3.200000e+01 : f32
    %429 = vector.broadcast %cst_172 : f32 to vector<16x1xf32>
    %430 = arith.divf %428, %429 : vector<16x1xf32>
    %431 = vector.broadcast %430 : vector<16x1xf32> to vector<16x32xf32>
    %432 = arith.subf %422, %431 : vector<16x32xf32>
    %433 = arith.mulf %432, %432 : vector<16x32xf32>
    %cst_173 = arith.constant dense<0.000000e+00> : vector<16xf32>
    %434 = vector.multi_reduction <add>, %433, %cst_173 [1] : vector<16x32xf32> to vector<16xf32>
    %435 = vector.shape_cast %434 : vector<16xf32> to vector<16x1xf32>
    %cst_174 = arith.constant 3.200000e+01 : f32
    %436 = vector.broadcast %cst_174 : f32 to vector<16x1xf32>
    %437 = arith.divf %435, %436 : vector<16x1xf32>
    %438 = vector.broadcast %430 : vector<16x1xf32> to vector<16x32xf32>
    %439 = arith.subf %422, %438 : vector<16x32xf32>
    %cst_175 = arith.constant 9.99999974E-6 : f32
    %440 = vector.broadcast %cst_175 : f32 to vector<16x1xf32>
    %441 = arith.addf %437, %440 : vector<16x1xf32>
    %442 = math.rsqrt %441 : vector<16x1xf32>
    %443 = vector.broadcast %442 : vector<16x1xf32> to vector<16x32xf32>
    %444 = arith.mulf %439, %443 : vector<16x32xf32>
    %445 = vector.broadcast %424 : vector<1x32xf32> to vector<16x32xf32>
    %446 = arith.mulf %444, %445 : vector<16x32xf32>
    %447 = vector.broadcast %426 : vector<1x32xf32> to vector<16x32xf32>
    %448 = arith.addf %446, %447 : vector<16x32xf32>
    %c1_176 = arith.constant 1 : index
    %c0_177 = arith.constant 0 : index
    %c128_178 = arith.constant 128 : index
    %449 = vector.load %arg3[%c1_176, %c0_177, %c128_178] : memref<2x32x288xf32, #tpu.memory_space<vmem>>, vector<1x32x64xf32>
    %450 = vector.shape_cast %449 : vector<1x32x64xf32> to vector<32x64xf32>
    %cst_179 = arith.constant dense<0.000000e+00> : vector<16x64xf32>
    %451 = tpu.matmul %448, %450, %cst_179 {dimension_numbers = #tpu.dot_dimension_numbers<[1], [0], [0], [1], [0, 0, 1, 1], [], []>} : vector<16x32xf32>, vector<32x64xf32>, vector<16x64xf32> -> vector<16x64xf32>
    %c1_180 = arith.constant 1 : index
    %c6_181 = arith.constant 6 : index
    %c0_182 = arith.constant 0 : index
    %452 = vector.load %arg6[%c1_180, %c6_181, %c0_182] : memref<2x13x96xf32, #tpu.memory_space<vmem>>, vector<1x1x64xf32>
    %453 = vector.shape_cast %452 : vector<1x1x64xf32> to vector<1x64xf32>
    %454 = vector.broadcast %453 : vector<1x64xf32> to vector<16x64xf32>
    %455 = arith.addf %451, %454 : vector<16x64xf32>
    %c1_183 = arith.constant 1 : index
    %c0_184 = arith.constant 0 : index
    %c0_185 = arith.constant 0 : index
    %456 = vector.load %arg4[%c1_183, %c0_184, %c0_185] : memref<2x8x64xf32, #tpu.memory_space<vmem>>, vector<1x8x64xf32>
    %457 = vector.shape_cast %456 : vector<1x8x64xf32> to vector<8x64xf32>
    %cst_186 = arith.constant dense<0.000000e+00> : vector<4x64xf32>
    %458 = tpu.matmul %15, %457, %cst_186 {dimension_numbers = #tpu.dot_dimension_numbers<[1], [0], [0], [1], [0, 0, 1, 1], [], []>} : vector<4x8xf32>, vector<8x64xf32>, vector<4x64xf32> -> vector<4x64xf32>
    %c1_187 = arith.constant 1 : index
    %c7_188 = arith.constant 7 : index
    %c0_189 = arith.constant 0 : index
    %459 = vector.load %arg6[%c1_187, %c7_188, %c0_189] : memref<2x13x96xf32, #tpu.memory_space<vmem>>, vector<1x1x64xf32>
    %460 = vector.shape_cast %459 : vector<1x1x64xf32> to vector<1x64xf32>
    %461 = vector.broadcast %460 : vector<1x64xf32> to vector<4x64xf32>
    %462 = arith.addf %458, %461 : vector<4x64xf32>
    %463 = vector.extract_strided_slice %455 {offsets = [0, 0], sizes = [16, 32], strides = [1, 1]} : vector<16x64xf32> to vector<16x32xf32>
    %464 = vector.extract_strided_slice %462 {offsets = [0, 0], sizes = [4, 32], strides = [1, 1]} : vector<4x64xf32> to vector<4x32xf32>
    %465 = vector.extract_strided_slice %462 {offsets = [0, 32], sizes = [4, 32], strides = [1, 1]} : vector<4x64xf32> to vector<4x32xf32>
    %466 = vector.extract_strided_slice %463 {offsets = [0, 0], sizes = [16, 8], strides = [1, 1]} : vector<16x32xf32> to vector<16x8xf32>
    %467 = vector.extract_strided_slice %464 {offsets = [0, 0], sizes = [4, 8], strides = [1, 1]} : vector<4x32xf32> to vector<4x8xf32>
    %cst_190 = arith.constant dense<0.000000e+00> : vector<16x4xf32>
    %468 = tpu.matmul %466, %467, %cst_190 {dimension_numbers = #tpu.dot_dimension_numbers<[1], [1], [0], [0], [0, 0, 1, 0], [], []>} : vector<16x8xf32>, vector<4x8xf32>, vector<16x4xf32> -> vector<16x4xf32>
    %cst_191 = arith.constant 0.353553385 : f32
    %469 = vector.broadcast %cst_191 : f32 to vector<16x4xf32>
    %470 = arith.mulf %468, %469 : vector<16x4xf32>
    %cst_192 = arith.constant dense<0xFF800000> : vector<16xf32>
    %471 = vector.multi_reduction <maximumf>, %470, %cst_192 [1] : vector<16x4xf32> to vector<16xf32>
    %472 = vector.shape_cast %471 : vector<16xf32> to vector<16x1xf32>
    %473 = vector.broadcast %472 : vector<16x1xf32> to vector<16x4xf32>
    %474 = arith.subf %470, %473 : vector<16x4xf32>
    %475 = math.exp %474 : vector<16x4xf32>
    %cst_193 = arith.constant dense<0.000000e+00> : vector<16xf32>
    %476 = vector.multi_reduction <add>, %475, %cst_193 [1] : vector<16x4xf32> to vector<16xf32>
    %477 = vector.shape_cast %476 : vector<16xf32> to vector<16x1xf32>
    %478 = tpu.reciprocal %477 {approx = true} : vector<16x1xf32> -> vector<16x1xf32>
    %479 = vector.broadcast %478 : vector<16x1xf32> to vector<16x4xf32>
    %480 = arith.mulf %475, %479 : vector<16x4xf32>
    %481 = vector.extract_strided_slice %465 {offsets = [0, 0], sizes = [4, 8], strides = [1, 1]} : vector<4x32xf32> to vector<4x8xf32>
    %cst_194 = arith.constant dense<0.000000e+00> : vector<16x8xf32>
    %482 = tpu.matmul %480, %481, %cst_194 {dimension_numbers = #tpu.dot_dimension_numbers<[1], [0], [0], [1], [0, 0, 1, 1], [], []>} : vector<16x4xf32>, vector<4x8xf32>, vector<16x8xf32> -> vector<16x8xf32>
    %483 = vector.extract_strided_slice %463 {offsets = [0, 8], sizes = [16, 8], strides = [1, 1]} : vector<16x32xf32> to vector<16x8xf32>
    %484 = vector.extract_strided_slice %464 {offsets = [0, 8], sizes = [4, 8], strides = [1, 1]} : vector<4x32xf32> to vector<4x8xf32>
    %cst_195 = arith.constant dense<0.000000e+00> : vector<16x4xf32>
    %485 = tpu.matmul %483, %484, %cst_195 {dimension_numbers = #tpu.dot_dimension_numbers<[1], [1], [0], [0], [0, 0, 1, 0], [], []>} : vector<16x8xf32>, vector<4x8xf32>, vector<16x4xf32> -> vector<16x4xf32>
    %cst_196 = arith.constant 0.353553385 : f32
    %486 = vector.broadcast %cst_196 : f32 to vector<16x4xf32>
    %487 = arith.mulf %485, %486 : vector<16x4xf32>
    %cst_197 = arith.constant dense<0xFF800000> : vector<16xf32>
    %488 = vector.multi_reduction <maximumf>, %487, %cst_197 [1] : vector<16x4xf32> to vector<16xf32>
    %489 = vector.shape_cast %488 : vector<16xf32> to vector<16x1xf32>
    %490 = vector.broadcast %489 : vector<16x1xf32> to vector<16x4xf32>
    %491 = arith.subf %487, %490 : vector<16x4xf32>
    %492 = math.exp %491 : vector<16x4xf32>
    %cst_198 = arith.constant dense<0.000000e+00> : vector<16xf32>
    %493 = vector.multi_reduction <add>, %492, %cst_198 [1] : vector<16x4xf32> to vector<16xf32>
    %494 = vector.shape_cast %493 : vector<16xf32> to vector<16x1xf32>
    %495 = tpu.reciprocal %494 {approx = true} : vector<16x1xf32> -> vector<16x1xf32>
    %496 = vector.broadcast %495 : vector<16x1xf32> to vector<16x4xf32>
    %497 = arith.mulf %492, %496 : vector<16x4xf32>
    %498 = vector.extract_strided_slice %465 {offsets = [0, 8], sizes = [4, 8], strides = [1, 1]} : vector<4x32xf32> to vector<4x8xf32>
    %cst_199 = arith.constant dense<0.000000e+00> : vector<16x8xf32>
    %499 = tpu.matmul %497, %498, %cst_199 {dimension_numbers = #tpu.dot_dimension_numbers<[1], [0], [0], [1], [0, 0, 1, 1], [], []>} : vector<16x4xf32>, vector<4x8xf32>, vector<16x8xf32> -> vector<16x8xf32>
    %500 = vector.extract_strided_slice %463 {offsets = [0, 16], sizes = [16, 8], strides = [1, 1]} : vector<16x32xf32> to vector<16x8xf32>
    %501 = vector.extract_strided_slice %464 {offsets = [0, 16], sizes = [4, 8], strides = [1, 1]} : vector<4x32xf32> to vector<4x8xf32>
    %cst_200 = arith.constant dense<0.000000e+00> : vector<16x4xf32>
    %502 = tpu.matmul %500, %501, %cst_200 {dimension_numbers = #tpu.dot_dimension_numbers<[1], [1], [0], [0], [0, 0, 1, 0], [], []>} : vector<16x8xf32>, vector<4x8xf32>, vector<16x4xf32> -> vector<16x4xf32>
    %cst_201 = arith.constant 0.353553385 : f32
    %503 = vector.broadcast %cst_201 : f32 to vector<16x4xf32>
    %504 = arith.mulf %502, %503 : vector<16x4xf32>
    %cst_202 = arith.constant dense<0xFF800000> : vector<16xf32>
    %505 = vector.multi_reduction <maximumf>, %504, %cst_202 [1] : vector<16x4xf32> to vector<16xf32>
    %506 = vector.shape_cast %505 : vector<16xf32> to vector<16x1xf32>
    %507 = vector.broadcast %506 : vector<16x1xf32> to vector<16x4xf32>
    %508 = arith.subf %504, %507 : vector<16x4xf32>
    %509 = math.exp %508 : vector<16x4xf32>
    %cst_203 = arith.constant dense<0.000000e+00> : vector<16xf32>
    %510 = vector.multi_reduction <add>, %509, %cst_203 [1] : vector<16x4xf32> to vector<16xf32>
    %511 = vector.shape_cast %510 : vector<16xf32> to vector<16x1xf32>
    %512 = tpu.reciprocal %511 {approx = true} : vector<16x1xf32> -> vector<16x1xf32>
    %513 = vector.broadcast %512 : vector<16x1xf32> to vector<16x4xf32>
    %514 = arith.mulf %509, %513 : vector<16x4xf32>
    %515 = vector.extract_strided_slice %465 {offsets = [0, 16], sizes = [4, 8], strides = [1, 1]} : vector<4x32xf32> to vector<4x8xf32>
    %cst_204 = arith.constant dense<0.000000e+00> : vector<16x8xf32>
    %516 = tpu.matmul %514, %515, %cst_204 {dimension_numbers = #tpu.dot_dimension_numbers<[1], [0], [0], [1], [0, 0, 1, 1], [], []>} : vector<16x4xf32>, vector<4x8xf32>, vector<16x8xf32> -> vector<16x8xf32>
    %517 = vector.extract_strided_slice %463 {offsets = [0, 24], sizes = [16, 8], strides = [1, 1]} : vector<16x32xf32> to vector<16x8xf32>
    %518 = vector.extract_strided_slice %464 {offsets = [0, 24], sizes = [4, 8], strides = [1, 1]} : vector<4x32xf32> to vector<4x8xf32>
    %cst_205 = arith.constant dense<0.000000e+00> : vector<16x4xf32>
    %519 = tpu.matmul %517, %518, %cst_205 {dimension_numbers = #tpu.dot_dimension_numbers<[1], [1], [0], [0], [0, 0, 1, 0], [], []>} : vector<16x8xf32>, vector<4x8xf32>, vector<16x4xf32> -> vector<16x4xf32>
    %cst_206 = arith.constant 0.353553385 : f32
    %520 = vector.broadcast %cst_206 : f32 to vector<16x4xf32>
    %521 = arith.mulf %519, %520 : vector<16x4xf32>
    %cst_207 = arith.constant dense<0xFF800000> : vector<16xf32>
    %522 = vector.multi_reduction <maximumf>, %521, %cst_207 [1] : vector<16x4xf32> to vector<16xf32>
    %523 = vector.shape_cast %522 : vector<16xf32> to vector<16x1xf32>
    %524 = vector.broadcast %523 : vector<16x1xf32> to vector<16x4xf32>
    %525 = arith.subf %521, %524 : vector<16x4xf32>
    %526 = math.exp %525 : vector<16x4xf32>
    %cst_208 = arith.constant dense<0.000000e+00> : vector<16xf32>
    %527 = vector.multi_reduction <add>, %526, %cst_208 [1] : vector<16x4xf32> to vector<16xf32>
    %528 = vector.shape_cast %527 : vector<16xf32> to vector<16x1xf32>
    %529 = tpu.reciprocal %528 {approx = true} : vector<16x1xf32> -> vector<16x1xf32>
    %530 = vector.broadcast %529 : vector<16x1xf32> to vector<16x4xf32>
    %531 = arith.mulf %526, %530 : vector<16x4xf32>
    %532 = vector.extract_strided_slice %465 {offsets = [0, 24], sizes = [4, 8], strides = [1, 1]} : vector<4x32xf32> to vector<4x8xf32>
    %cst_209 = arith.constant dense<0.000000e+00> : vector<16x8xf32>
    %533 = tpu.matmul %531, %532, %cst_209 {dimension_numbers = #tpu.dot_dimension_numbers<[1], [0], [0], [1], [0, 0, 1, 1], [], []>} : vector<16x4xf32>, vector<4x8xf32>, vector<16x8xf32> -> vector<16x8xf32>
    %534 = tpu.concatenate %482, %499, %516, %533 in 1 : vector<16x8xf32>, vector<16x8xf32>, vector<16x8xf32>, vector<16x8xf32> -> vector<16x32xf32>
    %c1_210 = arith.constant 1 : index
    %c0_211 = arith.constant 0 : index
    %c192_212 = arith.constant 192 : index
    %535 = vector.load %arg3[%c1_210, %c0_211, %c192_212] : memref<2x32x288xf32, #tpu.memory_space<vmem>>, vector<1x32x32xf32>
    %536 = vector.shape_cast %535 : vector<1x32x32xf32> to vector<32x32xf32>
    %cst_213 = arith.constant dense<0.000000e+00> : vector<16x32xf32>
    %537 = tpu.matmul %534, %536, %cst_213 {dimension_numbers = #tpu.dot_dimension_numbers<[1], [0], [0], [1], [0, 0, 1, 1], [], []>} : vector<16x32xf32>, vector<32x32xf32>, vector<16x32xf32> -> vector<16x32xf32>
    %c1_214 = arith.constant 1 : index
    %c8_215 = arith.constant 8 : index
    %c0_216 = arith.constant 0 : index
    %538 = vector.load %arg6[%c1_214, %c8_215, %c0_216] : memref<2x13x96xf32, #tpu.memory_space<vmem>>, vector<1x1x32xf32>
    %539 = vector.shape_cast %538 : vector<1x1x32xf32> to vector<1x32xf32>
    %540 = vector.broadcast %539 : vector<1x32xf32> to vector<16x32xf32>
    %541 = arith.addf %537, %540 : vector<16x32xf32>
    %542 = vector.extract_strided_slice %455 {offsets = [0, 32], sizes = [16, 32], strides = [1, 1]} : vector<16x64xf32> to vector<16x32xf32>
    %543 = arith.negf %542 : vector<16x32xf32>
    %544 = math.exp %543 : vector<16x32xf32>
    %cst_217 = arith.constant 1.000000e+00 : f32
    %545 = vector.broadcast %cst_217 : f32 to vector<16x32xf32>
    %546 = arith.addf %545, %544 : vector<16x32xf32>
    %547 = arith.divf %545, %546 : vector<16x32xf32>
    %548 = arith.mulf %547, %541 : vector<16x32xf32>
    %549 = arith.addf %422, %548 : vector<16x32xf32>
    %c1_218 = arith.constant 1 : index
    %c9_219 = arith.constant 9 : index
    %c0_220 = arith.constant 0 : index
    %550 = vector.load %arg6[%c1_218, %c9_219, %c0_220] : memref<2x13x96xf32, #tpu.memory_space<vmem>>, vector<1x1x32xf32>
    %551 = vector.shape_cast %550 : vector<1x1x32xf32> to vector<1x32xf32>
    %c1_221 = arith.constant 1 : index
    %c10_222 = arith.constant 10 : index
    %c0_223 = arith.constant 0 : index
    %552 = vector.load %arg6[%c1_221, %c10_222, %c0_223] : memref<2x13x96xf32, #tpu.memory_space<vmem>>, vector<1x1x32xf32>
    %553 = vector.shape_cast %552 : vector<1x1x32xf32> to vector<1x32xf32>
    %cst_224 = arith.constant dense<0.000000e+00> : vector<16xf32>
    %554 = vector.multi_reduction <add>, %549, %cst_224 [1] : vector<16x32xf32> to vector<16xf32>
    %555 = vector.shape_cast %554 : vector<16xf32> to vector<16x1xf32>
    %cst_225 = arith.constant 3.200000e+01 : f32
    %556 = vector.broadcast %cst_225 : f32 to vector<16x1xf32>
    %557 = arith.divf %555, %556 : vector<16x1xf32>
    %558 = vector.broadcast %557 : vector<16x1xf32> to vector<16x32xf32>
    %559 = arith.subf %549, %558 : vector<16x32xf32>
    %560 = arith.mulf %559, %559 : vector<16x32xf32>
    %cst_226 = arith.constant dense<0.000000e+00> : vector<16xf32>
    %561 = vector.multi_reduction <add>, %560, %cst_226 [1] : vector<16x32xf32> to vector<16xf32>
    %562 = vector.shape_cast %561 : vector<16xf32> to vector<16x1xf32>
    %cst_227 = arith.constant 3.200000e+01 : f32
    %563 = vector.broadcast %cst_227 : f32 to vector<16x1xf32>
    %564 = arith.divf %562, %563 : vector<16x1xf32>
    %565 = vector.broadcast %557 : vector<16x1xf32> to vector<16x32xf32>
    %566 = arith.subf %549, %565 : vector<16x32xf32>
    %cst_228 = arith.constant 9.99999974E-6 : f32
    %567 = vector.broadcast %cst_228 : f32 to vector<16x1xf32>
    %568 = arith.addf %564, %567 : vector<16x1xf32>
    %569 = math.rsqrt %568 : vector<16x1xf32>
    %570 = vector.broadcast %569 : vector<16x1xf32> to vector<16x32xf32>
    %571 = arith.mulf %566, %570 : vector<16x32xf32>
    %572 = vector.broadcast %551 : vector<1x32xf32> to vector<16x32xf32>
    %573 = arith.mulf %571, %572 : vector<16x32xf32>
    %574 = vector.broadcast %553 : vector<1x32xf32> to vector<16x32xf32>
    %575 = arith.addf %573, %574 : vector<16x32xf32>
    %c1_229 = arith.constant 1 : index
    %c0_230 = arith.constant 0 : index
    %c224_231 = arith.constant 224 : index
    %576 = vector.load %arg3[%c1_229, %c0_230, %c224_231] : memref<2x32x288xf32, #tpu.memory_space<vmem>>, vector<1x32x64xf32>
    %577 = vector.shape_cast %576 : vector<1x32x64xf32> to vector<32x64xf32>
    %cst_232 = arith.constant dense<0.000000e+00> : vector<16x64xf32>
    %578 = tpu.matmul %575, %577, %cst_232 {dimension_numbers = #tpu.dot_dimension_numbers<[1], [0], [0], [1], [0, 0, 1, 1], [], []>} : vector<16x32xf32>, vector<32x64xf32>, vector<16x64xf32> -> vector<16x64xf32>
    %c1_233 = arith.constant 1 : index
    %c11_234 = arith.constant 11 : index
    %c0_235 = arith.constant 0 : index
    %579 = vector.load %arg6[%c1_233, %c11_234, %c0_235] : memref<2x13x96xf32, #tpu.memory_space<vmem>>, vector<1x1x64xf32>
    %580 = vector.shape_cast %579 : vector<1x1x64xf32> to vector<1x64xf32>
    %581 = vector.broadcast %580 : vector<1x64xf32> to vector<16x64xf32>
    %582 = arith.addf %578, %581 : vector<16x64xf32>
    %583 = arith.mulf %582, %582 : vector<16x64xf32>
    %584 = arith.mulf %582, %583 : vector<16x64xf32>
    %cst_236 = arith.constant 4.471500e-02 : f32
    %585 = vector.broadcast %cst_236 : f32 to vector<16x64xf32>
    %586 = arith.mulf %585, %584 : vector<16x64xf32>
    %587 = arith.addf %582, %586 : vector<16x64xf32>
    %cst_237 = arith.constant 0.797884583 : f32
    %588 = vector.broadcast %cst_237 : f32 to vector<16x64xf32>
    %589 = arith.mulf %588, %587 : vector<16x64xf32>
    %590 = math.tanh %589 : vector<16x64xf32>
    %cst_238 = arith.constant 1.000000e+00 : f32
    %591 = vector.broadcast %cst_238 : f32 to vector<16x64xf32>
    %592 = arith.addf %591, %590 : vector<16x64xf32>
    %cst_239 = arith.constant 5.000000e-01 : f32
    %593 = vector.broadcast %cst_239 : f32 to vector<16x64xf32>
    %594 = arith.mulf %593, %592 : vector<16x64xf32>
    %595 = arith.mulf %582, %594 : vector<16x64xf32>
    %c1_240 = arith.constant 1 : index
    %c0_241 = arith.constant 0 : index
    %c0_242 = arith.constant 0 : index
    %596 = vector.load %arg5[%c1_240, %c0_241, %c0_242] : memref<2x64x32xf32, #tpu.memory_space<vmem>>, vector<1x64x32xf32>
    %597 = vector.shape_cast %596 : vector<1x64x32xf32> to vector<64x32xf32>
    %cst_243 = arith.constant dense<0.000000e+00> : vector<16x32xf32>
    %598 = tpu.matmul %595, %597, %cst_243 {dimension_numbers = #tpu.dot_dimension_numbers<[1], [0], [0], [1], [0, 0, 1, 1], [], []>} : vector<16x64xf32>, vector<64x32xf32>, vector<16x32xf32> -> vector<16x32xf32>
    %599 = arith.addf %549, %598 : vector<16x32xf32>
    %c1_244 = arith.constant 1 : index
    %c12_245 = arith.constant 12 : index
    %c0_246 = arith.constant 0 : index
    %600 = vector.load %arg6[%c1_244, %c12_245, %c0_246] : memref<2x13x96xf32, #tpu.memory_space<vmem>>, vector<1x1x32xf32>
    %601 = vector.shape_cast %600 : vector<1x1x32xf32> to vector<1x32xf32>
    %602 = vector.broadcast %601 : vector<1x32xf32> to vector<16x32xf32>
    %603 = arith.addf %599, %602 : vector<16x32xf32>
    %604 = vector.extract_strided_slice %603 {offsets = [12, 0], sizes = [4, 32], strides = [1, 1]} : vector<16x32xf32> to vector<4x32xf32>
    %c5_247 = arith.constant 5 : index
    %c0_248 = arith.constant 0 : index
    %605 = vector.load %arg7[%c5_247, %c0_248] : memref<7x32xf32, #tpu.memory_space<vmem>>, vector<1x32xf32>
    %cst_249 = arith.constant dense<0.000000e+00> : vector<1x4xf32>
    %606 = tpu.matmul %605, %604, %cst_249 {dimension_numbers = #tpu.dot_dimension_numbers<[1], [1], [0], [0], [0, 0, 1, 0], [], []>} : vector<1x32xf32>, vector<4x32xf32>, vector<1x4xf32> -> vector<1x4xf32>
    %c6_250 = arith.constant 6 : index
    %c0_251 = arith.constant 0 : index
    %607 = vector.load %arg7[%c6_250, %c0_251] : memref<7x32xf32, #tpu.memory_space<vmem>>, vector<1x1xf32>
    %608 = vector.broadcast %607 : vector<1x1xf32> to vector<1x4xf32>
    %609 = arith.addf %606, %608 : vector<1x4xf32>
    %c0_252 = arith.constant 0 : index
    %c0_253 = arith.constant 0 : index
    %c0_254 = arith.constant 0 : index
    %610 = vector.load %arg8[%c0_252, %c0_253, %c0_254] : memref<1x1x4xf32, #tpu.memory_space<vmem>>, vector<1x1x4xf32>
    %611 = vector.shape_cast %610 : vector<1x1x4xf32> to vector<1x4xf32>
    %612 = vector.shape_cast %609 : vector<1x4xf32> to vector<1x1x4xf32>
    tpu.vector_store %arg8[%c0_252, %c0_253, %c0_254], %612 {strides = array<i32>} : memref<1x1x4xf32, #tpu.memory_space<vmem>>, vector<1x1x4xf32>,
    return
  }
  func.func @transform_0(%arg0: i32) -> (i32, i32, i32) {
    %c0_i32 = arith.constant 0 : i32
    %c0_i32_0 = arith.constant 0 : i32
    %c0_i32_1 = arith.constant 0 : i32
    return %arg0, %c0_i32, %c0_i32_0 : i32, i32, i32
  }
  func.func @transform_1(%arg0: i32) -> (i32, i32, i32) {
    %c0_i32 = arith.constant 0 : i32
    %c0_i32_0 = arith.constant 0 : i32
    %c0_i32_1 = arith.constant 0 : i32
    return %arg0, %c0_i32, %c0_i32_0 : i32, i32, i32
  }
  func.func @transform_2(%arg0: i32) -> (i32, i32, i32) {
    %c0_i32 = arith.constant 0 : i32
    %c0_i32_0 = arith.constant 0 : i32
    %c0_i32_1 = arith.constant 0 : i32
    %c0_i32_2 = arith.constant 0 : i32
    return %c0_i32, %c0_i32_0, %c0_i32_1 : i32, i32, i32
  }
  func.func @transform_3(%arg0: i32) -> (i32, i32, i32) {
    %c0_i32 = arith.constant 0 : i32
    %c0_i32_0 = arith.constant 0 : i32
    %c0_i32_1 = arith.constant 0 : i32
    %c0_i32_2 = arith.constant 0 : i32
    return %c0_i32, %c0_i32_0, %c0_i32_1 : i32, i32, i32
  }
  func.func @transform_4(%arg0: i32) -> (i32, i32, i32) {
    %c0_i32 = arith.constant 0 : i32
    %c0_i32_0 = arith.constant 0 : i32
    %c0_i32_1 = arith.constant 0 : i32
    %c0_i32_2 = arith.constant 0 : i32
    return %c0_i32, %c0_i32_0, %c0_i32_1 : i32, i32, i32
  }
  func.func @transform_5(%arg0: i32) -> (i32, i32, i32) {
    %c0_i32 = arith.constant 0 : i32
    %c0_i32_0 = arith.constant 0 : i32
    %c0_i32_1 = arith.constant 0 : i32
    %c0_i32_2 = arith.constant 0 : i32
    return %c0_i32, %c0_i32_0, %c0_i32_1 : i32, i32, i32
  }
  func.func @transform_6(%arg0: i32) -> (i32, i32) {
    %c0_i32 = arith.constant 0 : i32
    %c0_i32_0 = arith.constant 0 : i32
    %c0_i32_1 = arith.constant 0 : i32
    return %c0_i32, %c0_i32_0 : i32, i32
  }
  func.func @transform_7(%arg0: i32) -> (i32, i32, i32) {
    %c0_i32 = arith.constant 0 : i32
    %c0_i32_0 = arith.constant 0 : i32
    %c0_i32_1 = arith.constant 0 : i32
    return %arg0, %c0_i32, %c0_i32_0 : i32, i32, i32
  }
}

</mosaic_0001>

<bundles_post_ra>
// kernel: tpu_custom_call.1
= control target key start
LH: loop header
LB: loop body
LE: loop exit
PB: predicated region body
PF: predicated region fallthrough
CT: control target
= control target key end

     0   :  { %s7846_s0 = inlined_call_operand.vmem [shape: f32[2,16,3], index: 0, kind: input, shape index: {}]   ;;  %s7847_s1 = inlined_call_operand.vmem [shape: f32[2,4,8], index: 1, kind: input, shape index: {}]   ;;  %s7848_s2 = inlined_call_operand.vmem [shape: f32[2,32,288], index: 2, kind: input, shape index: {}]   ;;  %s7849_s3 = inlined_call_operand.hbm [shape: f32[2,8,64], index: 3, kind: input, shape index: {}]   ;;  %s7850_s4 = inlined_call_operand.vmem [shape: f32[2,64,32], index: 4, kind: input, shape index: {}]   ;;  %s7851_s5 = inlined_call_operand.vmem [shape: f32[2,13,96], index: 5, kind: input, shape index: {}]   ;;  %s7852_s6 = inlined_call_operand.vmem [shape: f32[7,32], index: 6, kind: input, shape index: {}]   ;;  %s7853_s7 = inlined_call_operand.hbm [shape: f32[2,1,4], index: 7, kind: output, shape index: {}]  }
   0x1   :  { %7885 = sst [smem:[#allocation10_spill]] %s7846_s0 }
   0x2   :  { %7886 = sst [smem:[#allocation11_spill]] %s7847_s1 }
   0x3   :  { %7887 = sst [smem:[#allocation12_spill]] %s7849_s3 }
   0x4   :  { %12 = vsyncpa [#allocation3], 0 }
   0x5   :  { %13 = vsyncpa [#allocation4], 0 }
   0x6   :  { %15 = vsyncpa [#allocation4 + $0x1], 0  ;;  %s6807_s24 = smov 0   ;;  %s6809_s25 = smov 0  }
   0x7   :  { %s6811_s26 = smov 0   ;;  %s6813_s27 = smov 0  }
   0x8 LB: > { %7888 = sst [smem:[#allocation8_spill]] %s6737_s26  ;;  %s6828_s28 = sadd.s32 4294967295, %s6741_s27   ;;  %s6741_s27 = sphi %s6813_s27, %s7916_s27   ;;  %s6737_s26 = sphi %s6811_s26, %s7913_s26   ;;  %s6733_s25 = sphi %s6809_s25, %s7915_s25   ;;  %s6729_s24 = sphi %s6807_s24, %s7914_s24  }
   0x9   : > { %s5629_s29 = sadd.s32 4294967294, %s6741_s27   ;;  %s6832_s30 = sadd.s32 1, %s6741_s27  }
   0xa   : > { %s185_s8 = sadd.s32 1, %s6737_s26  ;;  %s182_s9 = ssub.s32 %s6741_s27, %s6832_s30 }
   0xb   : > { %p195_p0 = scmp.ne.s32.totalorder %s6737_s26, %s6733_s25  ;;  %p183_p1 = scmp.eq.s32.totalorder %s182_s9, 0 }
   0xc   : > { %p196_p2 = scmp.eq.s32.totalorder %s6828_s28, 1  ;;  %p201_p3 = scmp.ne.s32.totalorder %s6733_s25, %s6729_s24 }
   0xd   : > { %p202_p4 = scmp.eq.s32.totalorder %s5629_s29, 1  ;;  %p5630_p7 = scmp.ge.s32.totalorder %s6741_s27, 1 }
   0xe   : > { %s6843_s10 = scalar_select %p183_p1, %s6737_s26, %s185_s8  }
   0xf   : > { %p6845_p5 = por %p196_p2, %p195_p0  ;;  %p6849_p6 = por %p202_p4, %p201_p3 }
  0x10   : > { %7889 = sst [smem:[#allocation9_spill]] %s6843_s10  ;;  %p209_p8 = scmp.lt.s32.totalorder %s6741_s27, 3 }
  0x11   : > { %s7891_s12 = scalar_select %p6849_p6, 1, 0 }
  0x12   : > { %p6411_p9 = scmp.eq.s32.totalorder %s6828_s28, 0  ;;  %p6856_p10 = pnand %p5630_p7, %p209_p8 }
  0x13   : > { %s6743_s14 = smov [#allocation2]  }
  0x14   : > { %s224_s15 = sshll.u32 %s6743_s14, 4  ;;  %p6403_p11 = pneg %p6856_p10  ;;  %s225_s15 = int_to_ptr.vmem [resolvable:$true] %s224_s15 }
  0x15   : > { %s6662_s16 = scalar_lea.vmem %s225_s15, 256  ;;  %p6670_p3 = scmp.lt.s32.totalorder %s225_s15, %s225_s15 }
  0x16   : > { %p6404_p12 = pnand %p6411_p9, %p6403_p11  ;;  %p6663_p0 = scmp.ne.s32.totalorder %s225_s15, %s6662_s16 }
  0x17   : > { %p6671_p4 = scmp.lt.s32.totalorder %s6662_s16, %s6662_s16 }
  0x18   : > { %p6653_p13 = pneg %p6404_p12 }
  0x19   : > { %p6672_p6 = por %p6671_p4, %p6670_p3 }
  0x1a   : > { %p6665_p1 = pnand %p6663_p0, %p6653_p13 }
  0x1c   : > { %p6666_p2 = pneg %p6665_p1 }
  0x1e   : > { %p6673_p7 = pnand %p6672_p6, %p6666_p2 }
  0x20   : > { %6676 = shalt.err (!%p6673_p7)
}
  0x21   : > { %s6744_s17 = smov 128   ;;  %s6745_s18 = smov 8  }
  0x22   : > { %s7893_s3 = sld [smem:[#allocation12_spill]] }
  0x24   : > { %264 = sbr.rel (%p6856_p10) target bundleno = 11926 (0x2e96), region = 48 }
  0x28   : > { %6406 = dma.hbm_to_vmem [thread:$0]  (!%p6404_p12), %s7893_s3, 256, %s225_s15, [#allocation3], %s6744_s17, %s6744_s17, %s6745_s18  }
  0x29   : > { %6720 = dma.done.wait (%p6411_p9), [#allocation3], 256  }
  0x2a   : > { %6722 = vsyncadd (%p6411_p9), [#allocation3], 4294967040  ;;  %p299_p8 = scmp.lt.s32.totalorder %s6828_s28, 1  ;;  %s7894_s0 = sld [smem:[#allocation10_spill]]  ;;  %v342_v12 = vld [vmem:[%s7852_s6] sm:$0x1f] }
  0x2b   : > { %s6746_s9 = smov 127   ;;  %vm350_vm0 = vcmask 1044480   ;;  %s6747_s15 = smov 3   ;;  %vm336_vm1 = vcmask 23552   ;;  %vm339_vm2 = vcmask 31744   ;;  %vm343_vm3 = vcmask 39936  }
  0x2c   : > { %s6875_s21 = scalar_select %p299_p8, %s6828_s28, 1  ;;  %6037 = vmatprep.subr.msk.mxu0 %vm350_vm0, %v342_v12  ;;  %vm432_vm4 = vcmask 261120   ;;  %v6901_v35 = vld [vmem:[%s7848_s2 + $0x48] sm:$0xff]  ;;  %v6906_v36 = vld [vmem:[%s7848_s2 + $0x30] sm:$0xff]  ;;  %v6913_v37 = vld [vmem:[%s7848_s2 + $0x18] sm:$0xff]  ;;  %vm568_vm5 = vcmask 64512  }
  0x2d   : > { %6038 = vmatpush3.msk.msra.mxu0 %vm350_vm0, %v342_v12  ;;  %6042 = vmatprep.subr.mxu1 %v6901_v35  ;;  %v6922_v38 = vld [vmem:[%s7848_s2] sm:$0xff]  ;;  %s7882_s17 = smov 96   ;;  %vm654_vm6 = vcmask 130048   ;;  %s7870_s18 = smov 64   ;;  %vm1398_vm7 = vcmask 195584   ;;  %vm6764_vm8 = vmmov 0  }
  0x2e   : > { %s5835_s22 = sshll.u32 %s6875_s21, 4  ;;  %6043 = vmatpush3.msra.mxu1 %v6901_v35  ;;  %v5641_v46 = vld [vmem:[%s7851_s5] ss:$0 sm:$0xff]  ;;  %v5642_v48 = vld [vmem:[%s7851_s5 + $0x1] ss:$0 sm:$0xff]  ;;  %s7880_s19 = smov 88  }
  0x2f   : > { %6044 = vmatprep.subr.mxu1 %v6906_v36  ;;  %v5643_v55 = vld [vmem:[%s7851_s5 + $0x2] ss:$0 sm:$0xff]  ;;  %s7878_s20 = smov 120   ;;  %s7872_s23 = smov 80   ;;  %vm1832_vm9 = vcmask 1043456   ;;  %vm2854_vm10 = vcmask 523264  }
  0x30   : > { %s303_s8 = scalar_lea.vmem %s7894_s0, %s5835_s22  ;;  %6045 = vmatpush3.msra.mxu1 %v6906_v36  ;;  %s7858_s22 = smov 56   ;;  %vm5535_vm11 = vcmask 24576  }
  0x31   : > { %v308_v0 = vld [vmem:[%s303_s8] sm:$0xff]  ;;  %v309_v1 = vld [vmem:[%s303_s8 + $0x8] sm:$0xff]  ;;  %6046 = vmatprep.subr.mxu1 %v6913_v37  ;;  %s7876_s29 = smov 112   ;;  %s7854_s8 = smov 48  }
  0x32   : > { %v310_v2 = vmul.f32 %v308_v0, %v308_v0  ;;  %v311_v3 = vmul.f32 %v309_v1, %v309_v1  ;;  %6047 = vmatpush3.msra.mxu1 %v6913_v37  ;;  %s7874_s13 = smov 104   ;;  %s7856_s14 = smov 40  }
  0x33   : > { %6048 = vmatprep.subr.mxu1 %v6922_v38  ;;  %s7864_s16 = smov 16   ;;  %s7895_s1 = sld [smem:[#allocation11_spill]] }
  0x34   : > { %314 = vrot.lane.b32.xlu0 %v310_v2, %s6746_s9  ;;  %6049 = vmatpush3.msra.mxu1 %v6922_v38  ;;  %s7907_s0 = smov 112  }
  0x38   : > { %316 = vrot.lane.b32.xlu0 %v311_v3, %s6746_s9  ;;  %s7868_s9 = smov 72  }
  0xa6   : > { %v315_v4 = vpop.permute.xlu0 %314 }
  0xa7   : > { %v320_v5 = vadd.f32 %v315_v4, %v310_v2 }
  0xa9   : > { %v322_v6 = vmul.f32 -0.5, %v320_v5 }
  0xaa   : > { %v317_v7 = vpop.permute.xlu0 %316 }
  0xab   : > { %v324_v8 = vmul.f32 1.442695, %v322_v6  ;;  %v321_v9 = vadd.f32 %v317_v7, %v311_v3 }
  0xad   : > { %6470 = vpow2.f32 %v324_v8  ;;  %v323_v10 = vmul.f32 -0.5, %v321_v9 }
  0xaf   : > { %v326_v11 = vmul.f32 1.442695, %v323_v10 }
  0xb1   : > { %6472 = vpow2.f32 %v326_v11 }
  0xba   : > { %v6471_v13 = vpop.eup %6470 }
  0xbb   : > { %330 = vrot.lane.b32.xlu1 %v6471_v13, %s6747_s15 }
  0xbe   : > { %v6473_v14 = vpop.eup %6472 }
  0xbf   : > { %332 = vrot.lane.b32.xlu1 %v6473_v14, %s6747_s15  ;;  %s7860_s15 = smov 32  }
 0x12d   : > { %v331_v15 = vpop.permute.xlu1 %330 }
 0x12e   : > { %v337_v16 = vsel %vm336_vm1, %v308_v0, %v331_v15 }
 0x12f   : > { %v340_v17 = vsel %vm339_vm2, %v337_v16, 1.0 }
 0x130   : > { %6039 = vmatprep.mubr.msk.f32.mxu0 %vm343_vm3, %v340_v17 }
 0x131   : > { %v333_v18 = vpop.permute.xlu1 %332 }
 0x132   : > { %v338_v19 = vsel %vm336_vm1, %v309_v1, %v333_v18 }
 0x133   : > { %v341_v20 = vsel %vm339_vm2, %v338_v19, 1.0 }
 0x134   : > { %6040 = vmatmul.mubr.msk.f32.vlgmr.msra.gmra.mxu0 %vm343_vm3, %v341_v20 }
 0x1f4   : > { %v6886_v21 = vpop.f32.mrf.mxu0 }
 0x1f5   : > { %v436_v22 = vsel %vm432_vm4, %v6886_v21, 0.0 }
 0x1f6   : > { %437 = vadd.xlane.f32.xlu1 %v436_v22  ;;  %v6890_v23 = vpop.f32.mrf.mxu0 }
 0x1f7   : > { %v433_v24 = vsel %vm432_vm4, %v6890_v23, 0.0 }
 0x1f8   : > { %434 = vadd.xlane.f32.xlu0 %v433_v24 }
 0x27f   : > { %v438_v25 = vpop.xlane.xlu1 %437 }
 0x280   : > { %v441_v26 = vmul.f32 0.03125, %v438_v25 }
 0x281   : > { %v435_v27 = vpop.xlane.xlu0 %434 }
 0x282   : > { %v440_v28 = vmul.f32 0.03125, %v435_v27  ;;  %v443_v29 = vsub.f32 %v6886_v21, %v441_v26 }
 0x284   : > { %v442_v30 = vsub.f32 %v6890_v23, %v440_v28  ;;  %v445_v33 = vmul.f32 %v443_v29, %v443_v29 }
 0x286   : > { %v444_v31 = vmul.f32 %v442_v30, %v442_v30  ;;  %v449_v34 = vsel %vm432_vm4, %v445_v33, 0.0 }
 0x288   : > { %v446_v32 = vsel %vm432_vm4, %v444_v31, 0.0 }
 0x289   : > { %447 = vadd.xlane.f32.xlu0 %v446_v32 }
 0x28d   : > { %450 = vadd.xlane.f32.xlu0 %v449_v34 }
 0x312   : > { %v448_v39 = vpop.xlane.xlu0 %447 }
 0x313   : > { %v452_v40 = vmul.f32 0.03125, %v448_v39 }
 0x315   : > { %v454_v41 = vadd.f32 1e-05, %v452_v40 }
 0x316   : > { %v451_v42 = vpop.xlane.xlu0 %450 }
 0x317   : > { %6474 = vrsqrt.f32 %v454_v41  ;;  %v453_v43 = vmul.f32 0.03125, %v451_v42 }
 0x319   : > { %v455_v44 = vadd.f32 1e-05, %v453_v43 }
 0x31b   : > { %6476 = vrsqrt.f32 %v455_v44 }
 0x324   : > { %v6475_v45 = vpop.eup %6474 }
 0x325   : > { %v458_v47 = vmul.f32 %v6475_v45, %v442_v30 }
 0x327   : > { %v464_v49 = vmul.f32 %v5641_v46, %v458_v47 }
 0x328   : > { %v6477_v50 = vpop.eup %6476 }
 0x329   : > { %v459_v51 = vmul.f32 %v6477_v50, %v443_v29  ;;  %v470_v52 = vadd.f32 %v5642_v48, %v464_v49 }
 0x32b   : > { %v465_v53 = vmul.f32 %v5641_v46, %v459_v51  ;;  %6050 = vmatprep.mubr.msk.f32.mxu1 %vm432_vm4, %v470_v52 }
 0x32d   : > { %v471_v54 = vadd.f32 %v5642_v48, %v465_v53 }
 0x32f   : > { %6051 = vmatmul.mubr.msk.f32.vlgmr.msra.gmra.mxu1 %vm432_vm4, %v471_v54 }
 0x3ef   : > { %v6052_v56 = vpop.f32.mrf.mxu1 }
 0x3f0   : > { %v6937_v57 = vadd.f32 %v6052_v56, %v5643_v55 }
 0x3f1   : > { %v553_v58 = vpop.f32.mrf.mxu1 }
 0x3f2   : > { %v6939_v59 = vadd.f32 %v5643_v55, %v553_v58  ;;  %566 = vrot.lane.b32.xlu1 %v6937_v57, %s7882_s17 }
 0x3f4   : > { %564 = vrot.lane.b32.xlu0 %v6939_v59, %s7882_s17  ;;  %6057 = vmatprep.mubr.msk.f32.mxu0 %vm568_vm5, %v6939_v59 }
 0x464   : > { %v567_v60 = vpop.permute.xlu1 %566 }
 0x465   : > { %6053 = vmatprep.subr.msk.mxu0 %vm568_vm5, %v567_v60 }
 0x466   : > { %6054 = vmatpush3.xpose.msk.msra.mxu0 %vm568_vm5, %v567_v60  ;;  %v565_v61 = vpop.permute.xlu0 %564 }
 0x467   : > { %6055 = vmatprep.subr.msk.mxu0 %vm568_vm5, %v565_v61 }
 0x46a   : > { %6056 = vmatpush3.xpose.msk.msra.mxu0 %vm568_vm5, %v565_v61 }
 0x46d   : > { %6058 = vmatmul.mubr.msk.f32.vlgmr.msra.gmra.mxu0 %vm568_vm5, %v6937_v57 }
 0x52d   : > { %v6059_v62 = vpop.f32.mrf.mxu0 }
 0x52e   : > { %v653_v63 = vmul.f32 0.35355338, %v6059_v62 }
 0x52f   : > { %v643_v0 = vpop.f32.mrf.mxu0 }
 0x530   : > { %v652_v1 = vmul.f32 0.35355338, %v643_v0  ;;  %v658_v2 = vsel %vm654_vm6, %v653_v63, -inf }
 0x531   : > { %659 = vmax.xlane.f32.xlu0 %v658_v2 }
 0x532   : > { %v655_v3 = vsel %vm654_vm6, %v652_v1, -inf }
 0x533   : > { %656 = vmax.xlane.f32.xlu1 %v655_v3 }
 0x544   : > { %679 = vrot.lane.b32.xlu1 %v6937_v57, %s7870_s18 }
 0x548   : > { %770 = vrot.lane.b32.xlu1 %v6937_v57, %s7880_s19 }
 0x54c   : > { %768 = vrot.lane.b32.xlu1 %v6939_v59, %s7880_s19 }
 0x5ba   : > { %v660_v4 = vpop.xlane.xlu0 %659 }
 0x5bb   : > { %v662_v5 = vsub.f32 %v653_v63, %v660_v4 }
 0x5bc   : > { %v657_v6 = vpop.xlane.xlu1 %656 }
 0x5bd   : > { %v665_v7 = vmul.f32 1.442695, %v662_v5  ;;  %v661_v8 = vsub.f32 %v652_v1, %v657_v6 }
 0x5bf   : > { %6478 = vpow2.f32 %v665_v7  ;;  %v663_v9 = vmul.f32 1.442695, %v661_v8 }
 0x5c0   : > { %v680_v10 = vpop.permute.xlu1 %679 }
 0x5c1   : > { %6480 = vpow2.f32 %v663_v9  ;;  %6060 = vmatprep.subr.mxu0 %v680_v10 }
 0x5c2   : > { %6061 = vmatpush3.msra.mxu0 %v680_v10 }
 0x5c4   : > { %v771_v15 = vpop.permute.xlu1 %770 }
 0x5c8   : > { %v769_v16 = vpop.permute.xlu1 %768 }
 0x5cc   : > { %v6479_v11 = vpop.eup %6478 }
 0x5cd   : > { %v670_v12 = vsel %vm654_vm6, %v6479_v11, 0.0 }
 0x5ce   : > { %v6481_v13 = vpop.eup %6480  ;;  %671 = vadd.xlane.f32.xlu0 %v670_v12 }
 0x5cf   : > { %v667_v14 = vsel %vm654_vm6, %v6481_v13, 0.0 }
 0x5d0   : > { %668 = vadd.xlane.f32.xlu1 %v667_v14 }
 0x5e1   : > { %766 = vrot.lane.b32.xlu1 %v6937_v57, %s7878_s20 }
 0x5e4   : > { %677 = vrot.lane.b32.xlu0 %v6939_v59, %s7870_s18  ;;  %s7905_s18 = smov 120  }
 0x5e8   : > { %764 = vrot.lane.b32.xlu0 %v6939_v59, %s7878_s20 }
 0x657   : > { %v672_v17 = vpop.xlane.xlu0 %671 }
 0x658   : > { %6482 = vrcp.f32 %v672_v17 }
 0x659   : > { %v669_v18 = vpop.xlane.xlu1 %668 }
 0x65a   : > { %6484 = vrcp.f32 %v669_v18 }
 0x65b   : > { %v678_v19 = vpop.permute.xlu0 %677 }
 0x65c   : > { %6062 = vmatprep.subr.mxu0 %v678_v19 }
 0x65d   : > { %6063 = vmatpush3.msra.mxu0 %v678_v19  ;;  %v767_v27 = vpop.permute.xlu1 %766 }
 0x65e   : > { %6067 = vmatprep.subr.msk.mxu0 %vm568_vm5, %v771_v15 }
 0x65f   : > { %v765_v26 = vpop.permute.xlu0 %764 }
 0x665   : > { %v6483_v20 = vpop.eup %6482 }
 0x666   : > { %v676_v25 = vmul.f32 %v6483_v20, %v6479_v11 }
 0x667   : > { %v6485_v22 = vpop.eup %6484 }
 0x668   : > { %v675_v24 = vmul.f32 %v6485_v22, %v6481_v13 }
 0x66a   : > { %6064 = vmatprep.mubr.msk.f32.mxu0 %vm654_vm6, %v675_v24 }
 0x66b   : > { %6065 = vmatmul.mubr.msk.f32.vlgmr.msra.gmra.mxu0 %vm654_vm6, %v676_v25 }
 0x66c   : > { %6068 = vmatpush3.xpose.msk.msra.mxu0 %vm568_vm5, %v771_v15  ;;  %6071 = vmatprep.mubr.msk.f32.mxu0 %vm568_vm5, %v765_v26 }
 0x66d   : > { %6069 = vmatprep.subr.msk.mxu0 %vm568_vm5, %v769_v16 }
 0x670   : > { %6070 = vmatpush3.xpose.msk.msra.mxu0 %vm568_vm5, %v769_v16 }
 0x673   : > { %6072 = vmatmul.mubr.msk.f32.vlgmr.msra.gmra.mxu0 %vm568_vm5, %v767_v27 }
 0x72b   : > { %v6977_v28 = vpop.f32.mrf.mxu0 }
 0x72d   : > { %v6979_v29 = vpop.f32.mrf.mxu0 }
 0x733   : > { %v6073_v30 = vpop.f32.mrf.mxu0 }
 0x734   : > { %v856_v31 = vmul.f32 0.35355338, %v6073_v30 }
 0x735   : > { %v846_v32 = vpop.f32.mrf.mxu0 }
 0x736   : > { %v855_v33 = vmul.f32 0.35355338, %v846_v32  ;;  %v860_v34 = vsel %vm654_vm6, %v856_v31, -inf }
 0x737   : > { %861 = vmax.xlane.f32.xlu1 %v860_v34 }
 0x738   : > { %v857_v39 = vsel %vm654_vm6, %v855_v33, -inf }
 0x739   : > { %858 = vmax.xlane.f32.xlu0 %v857_v39 }
 0x748   : > { %881 = vrot.lane.b32.xlu1 %v6937_v57, %s7858_s22 }
 0x74c   : > { %972 = vrot.lane.b32.xlu1 %v6937_v57, %s7872_s23 }
 0x750   : > { %970 = vrot.lane.b32.xlu1 %v6939_v59, %s7872_s23  ;;  %s7906_s23 = smov 56  }
 0x754   : > { %968 = vrot.lane.b32.xlu1 %v6937_v57, %s7876_s29 }
 0x7c0   : > { %v862_v40 = vpop.xlane.xlu1 %861 }
 0x7c1   : > { %v864_v41 = vsub.f32 %v856_v31, %v862_v40 }
 0x7c2   : > { %v859_v42 = vpop.xlane.xlu0 %858 }
 0x7c3   : > { %v867_v43 = vmul.f32 1.442695, %v864_v41  ;;  %v863_v44 = vsub.f32 %v855_v33, %v859_v42 }
 0x7c4   : > { %v882_v45 = vpop.permute.xlu1 %881 }
 0x7c5   : > { %6486 = vpow2.f32 %v867_v43  ;;  %v865_v46 = vmul.f32 1.442695, %v863_v44  ;;  %6074 = vmatprep.subr.mxu1 %v882_v45 }
 0x7c6   : > { %6075 = vmatpush3.msra.mxu1 %v882_v45 }
 0x7c7   : > { %6488 = vpow2.f32 %v865_v46 }
 0x7c8   : > { %v973_v54 = vpop.permute.xlu1 %972 }
 0x7cc   : > { %v971_v62 = vpop.permute.xlu1 %970 }
 0x7d0   : > { %v969_v63 = vpop.permute.xlu1 %968 }
 0x7d2   : > { %v6487_v47 = vpop.eup %6486 }
 0x7d3   : > { %v872_v48 = vsel %vm654_vm6, %v6487_v47, 0.0 }
 0x7d4   : > { %v6489_v49 = vpop.eup %6488  ;;  %873 = vadd.xlane.f32.xlu0 %v872_v48 }
 0x7d5   : > { %v869_v50 = vsel %vm654_vm6, %v6489_v49, 0.0 }
 0x7d8   : > { %870 = vadd.xlane.f32.xlu0 %v869_v50 }
 0x7ee   : > { %879 = vrot.lane.b32.xlu0 %v6939_v59, %s7858_s22  ;;  %s7901_s22 = smov 24  }
 0x7f2   : > { %966 = vrot.lane.b32.xlu0 %v6939_v59, %s7876_s29 }
 0x85d   : > { %v874_v51 = vpop.xlane.xlu0 %873 }
 0x85e   : > { %6490 = vrcp.f32 %v874_v51 }
 0x861   : > { %v871_v52 = vpop.xlane.xlu0 %870 }
 0x862   : > { %6492 = vrcp.f32 %v871_v52 }
 0x865   : > { %v880_v53 = vpop.permute.xlu0 %879 }
 0x866   : > { %6076 = vmatprep.subr.mxu1 %v880_v53 }
 0x867   : > { %6077 = vmatpush3.msra.mxu1 %v880_v53 }
 0x868   : > { %6081 = vmatprep.subr.msk.mxu1 %vm568_vm5, %v973_v54 }
 0x869   : > { %v967_v61 = vpop.permute.xlu0 %966 }
 0x86b   : > { %v6491_v55 = vpop.eup %6490 }
 0x86c   : > { %v878_v60 = vmul.f32 %v6491_v55, %v6487_v47 }
 0x86f   : > { %v6493_v56 = vpop.eup %6492 }
 0x870   : > { %v877_v58 = vmul.f32 %v6493_v56, %v6489_v49 }
 0x872   : > { %6078 = vmatprep.mubr.msk.f32.mxu1 %vm654_vm6, %v877_v58 }
 0x873   : > { %6079 = vmatmul.mubr.msk.f32.vlgmr.msra.gmra.mxu1 %vm654_vm6, %v878_v60 }
 0x874   : > { %6082 = vmatpush3.xpose.msk.msra.mxu1 %vm568_vm5, %v973_v54  ;;  %6085 = vmatprep.mubr.msk.f32.mxu1 %vm568_vm5, %v967_v61 }
 0x875   : > { %6083 = vmatprep.subr.msk.mxu1 %vm568_vm5, %v971_v62 }
 0x878   : > { %6084 = vmatpush3.xpose.msk.msra.mxu1 %vm568_vm5, %v971_v62 }
 0x87b   : > { %6086 = vmatmul.mubr.msk.f32.vlgmr.msra.gmra.mxu1 %vm568_vm5, %v969_v63 }
 0x933   : > { %v7005_v0 = vpop.f32.mrf.mxu1 }
 0x935   : > { %v7007_v1 = vpop.f32.mrf.mxu1 }
 0x93b   : > { %v6087_v2 = vpop.f32.mrf.mxu1 }
 0x93c   : > { %v1058_v3 = vmul.f32 0.35355338, %v6087_v2 }
 0x93d   : > { %v1048_v4 = vpop.f32.mrf.mxu1 }
 0x93e   : > { %v1057_v5 = vmul.f32 0.35355338, %v1048_v4  ;;  %v1062_v6 = vsel %vm654_vm6, %v1058_v3, -inf }
 0x93f   : > { %1063 = vmax.xlane.f32.xlu1 %v1062_v6 }
 0x940   : > { %v1059_v7 = vsel %vm654_vm6, %v1057_v5, -inf }
 0x941   : > { %1060 = vmax.xlane.f32.xlu0 %v1059_v7 }
 0x950   : > { %1083 = vrot.lane.b32.xlu1 %v6937_v57, %s7854_s8 }
 0x954   : > { %1174 = vrot.lane.b32.xlu1 %v6937_v57, %s7868_s9 }
 0x958   : > { %1172 = vrot.lane.b32.xlu1 %v6939_v59, %s7868_s9 }
 0x95c   : > { %1170 = vrot.lane.b32.xlu1 %v6937_v57, %s7874_s13 }
 0x9c8   : > { %v1064_v8 = vpop.xlane.xlu1 %1063 }
 0x9c9   : > { %v1066_v9 = vsub.f32 %v1058_v3, %v1064_v8 }
 0x9ca   : > { %v1061_v10 = vpop.xlane.xlu0 %1060 }
 0x9cb   : > { %v1069_v11 = vmul.f32 1.442695, %v1066_v9  ;;  %v1065_v12 = vsub.f32 %v1057_v5, %v1061_v10 }
 0x9cc   : > { %v1084_v13 = vpop.permute.xlu1 %1083 }
 0x9cd   : > { %6494 = vpow2.f32 %v1069_v11  ;;  %v1067_v14 = vmul.f32 1.442695, %v1065_v12  ;;  %6088 = vmatprep.subr.mxu0 %v1084_v13 }
 0x9ce   : > { %6089 = vmatpush3.msra.mxu0 %v1084_v13 }
 0x9cf   : > { %6496 = vpow2.f32 %v1067_v14 }
 0x9d0   : > { %v1175_v24 = vpop.permute.xlu1 %1174 }
 0x9d4   : > { %v1173_v32 = vpop.permute.xlu1 %1172 }
 0x9d8   : > { %v1171_v33 = vpop.permute.xlu1 %1170 }
 0x9da   : > { %v6495_v15 = vpop.eup %6494 }
 0x9db   : > { %v1074_v16 = vsel %vm654_vm6, %v6495_v15, 0.0 }
 0x9dc   : > { %v6497_v17 = vpop.eup %6496  ;;  %1075 = vadd.xlane.f32.xlu0 %v1074_v16 }
 0x9dd   : > { %v1071_v18 = vsel %vm654_vm6, %v6497_v17, 0.0 }
 0x9e0   : > { %1072 = vadd.xlane.f32.xlu0 %v1071_v18 }
 0x9f6   : > { %1081 = vrot.lane.b32.xlu0 %v6939_v59, %s7854_s8  ;;  %s7866_s8 = smov 8  }
 0x9fa   : > { %1168 = vrot.lane.b32.xlu0 %v6939_v59, %s7874_s13 }
 0xa65   : > { %v1076_v19 = vpop.xlane.xlu0 %1075 }
 0xa66   : > { %6498 = vrcp.f32 %v1076_v19 }
 0xa69   : > { %v1073_v20 = vpop.xlane.xlu0 %1072 }
 0xa6a   : > { %6500 = vrcp.f32 %v1073_v20 }
 0xa6d   : > { %v1082_v22 = vpop.permute.xlu0 %1081 }
 0xa6e   : > { %6090 = vmatprep.subr.mxu0 %v1082_v22 }
 0xa6f   : > { %6091 = vmatpush3.msra.mxu0 %v1082_v22 }
 0xa70   : > { %6095 = vmatprep.subr.msk.mxu0 %vm568_vm5, %v1175_v24 }
 0xa71   : > { %v1169_v31 = vpop.permute.xlu0 %1168 }
 0xa73   : > { %v6499_v25 = vpop.eup %6498 }
 0xa74   : > { %v1080_v30 = vmul.f32 %v6499_v25, %v6495_v15 }
 0xa77   : > { %v6501_v26 = vpop.eup %6500 }
 0xa78   : > { %v1079_v27 = vmul.f32 %v6501_v26, %v6497_v17 }
 0xa7a   : > { %6092 = vmatprep.mubr.msk.f32.mxu0 %vm654_vm6, %v1079_v27 }
 0xa7b   : > { %6093 = vmatmul.mubr.msk.f32.vlgmr.msra.gmra.mxu0 %vm654_vm6, %v1080_v30 }
 0xa7c   : > { %6096 = vmatpush3.xpose.msk.msra.mxu0 %vm568_vm5, %v1175_v24  ;;  %6099 = vmatprep.mubr.msk.f32.mxu0 %vm568_vm5, %v1169_v31 }
 0xa7d   : > { %6097 = vmatprep.subr.msk.mxu0 %vm568_vm5, %v1173_v32 }
 0xa80   : > { %6098 = vmatpush3.xpose.msk.msra.mxu0 %vm568_vm5, %v1173_v32 }
 0xa83   : > { %6100 = vmatmul.mubr.msk.f32.vlgmr.msra.gmra.mxu0 %vm568_vm5, %v1171_v33  ;;  %v1637_v33 = vld [vmem:[#allocation2] sm:$0xff] }
 0xb3b   : > { %v6094_v34 = vpop.f32.mrf.mxu0 }
 0xb3d   : > { %v1159_v39 = vpop.f32.mrf.mxu0 }
 0xb43   : > { %v6101_v40 = vpop.f32.mrf.mxu0 }
 0xb44   : > { %v1260_v41 = vmul.f32 0.35355338, %v6101_v40  ;;  %v7103_v40 = vld [vmem:[%s7848_s2 + $0x38] sm:$0xff] }
 0xb45   : > { %v1250_v42 = vpop.f32.mrf.mxu0 }
 0xb46   : > { %v1259_v43 = vmul.f32 0.35355338, %v1250_v42  ;;  %v1264_v44 = vsel %vm654_vm6, %v1260_v41, -inf  ;;  %v7112_v42 = vld [vmem:[%s7848_s2 + $0x20] sm:$0xff] }
 0xb47   : > { %1265 = vmax.xlane.f32.xlu1 %v1264_v44 }
 0xb48   : > { %v1261_v45 = vsel %vm654_vm6, %v1259_v43, -inf }
 0xb49   : > { %1262 = vmax.xlane.f32.xlu0 %v1261_v45 }
 0xb58   : > { %1285 = vrot.lane.b32.xlu1 %v6937_v57, %s7856_s14 }
 0xb5c   : > { %1411 = vrot.lane.b32.xlu1 %v6901_v35, %s7860_s15 }
 0xb60   : > { %1409 = vrot.lane.b32.xlu1 %v6906_v36, %s7860_s15 }
 0xb64   : > { %1407 = vrot.lane.b32.xlu1 %v6913_v37, %s7860_s15 }
 0xb68   : > { %1380 = vrot.lane.b32.xlu1 %v1159_v39, %s7864_s16  ;;  %v6763_v39 = vmov 0.0  }
 0xbd0   : > { %v1266_v46 = vpop.xlane.xlu1 %1265 }
 0xbd1   : > { %v1268_v47 = vsub.f32 %v1260_v41, %v1266_v46 }
 0xbd2   : > { %v1263_v48 = vpop.xlane.xlu0 %1262 }
 0xbd3   : > { %v1271_v49 = vmul.f32 1.442695, %v1268_v47  ;;  %v1267_v50 = vsub.f32 %v1259_v43, %v1263_v48  ;;  %v7121_v43 = vld [vmem:[%s7848_s2 + $0x8] sm:$0xff] }
 0xbd4   : > { %v1286_v51 = vpop.permute.xlu1 %1285 }
 0xbd5   : > { %6502 = vpow2.f32 %v1271_v49  ;;  %v1269_v57 = vmul.f32 1.442695, %v1267_v50  ;;  %6102 = vmatprep.subr.mxu1 %v1286_v51 }
 0xbd6   : > { %6103 = vmatpush3.msra.mxu1 %v1286_v51  ;;  %v5673_v51 = vld [vmem:[%s7851_s5 + $0x4] ss:$0 sm:$0xff] }
 0xbd7   : > { %6504 = vpow2.f32 %v1269_v57 }
 0xbd8   : > { %v1412_v56 = vpop.permute.xlu1 %1411 }
 0xbdc   : > { %v1410_v60 = vpop.permute.xlu1 %1409 }
 0xbe2   : > { %v6503_v35 = vpop.eup %6502 }
 0xbe3   : > { %v1276_v36 = vsel %vm654_vm6, %v6503_v35, 0.0 }
 0xbe4   : > { %v6505_v52 = vpop.eup %6504  ;;  %1277 = vadd.xlane.f32.xlu0 %v1276_v36 }
 0xbe5   : > { %v1273_v37 = vsel %vm654_vm6, %v6505_v52, 0.0 }
 0xbe8   : > { %1274 = vadd.xlane.f32.xlu0 %v1273_v37 }
 0xbfe   : > { %1283 = vrot.lane.b32.xlu0 %v6939_v59, %s7856_s14  ;;  %s7862_s14 = smov 24  }
 0xc02   : > { %1372 = vrot.lane.b32.xlu0 %v7007_v1, %s7866_s8 }
 0xc06   : > { %1374 = vrot.lane.b32.xlu0 %v7005_v0, %s7866_s8  ;;  %s7896_s8 = smov 80  }
 0xc0a   : > { %1382 = vrot.lane.b32.xlu0 %v6094_v34, %s7864_s16  ;;  %v7089_v34 = vld [vmem:[%s7848_s2 + $0x50] sm:$0xff]  ;;  %s7898_s16 = smov 72  }
 0xc0b   : > { %6120 = vmatprep.subr.mxu0 %v7089_v34 }
 0xc0c   : > { %6121 = vmatpush3.msra.mxu0 %v7089_v34 }
 0xc0d   : > { %6122 = vmatprep.subr.mxu0 %v7103_v40 }
 0xc0e   : > { %1405 = vrot.lane.b32.xlu0 %v6922_v38, %s7860_s15  ;;  %v1408_v38 = vpop.permute.xlu1 %1407  ;;  %6123 = vmatpush3.msra.mxu0 %v7103_v40  ;;  %s7899_s15 = smov 8  }
 0xc0f   : > { %6124 = vmatprep.subr.mxu0 %v7112_v42 }
 0xc10   : > { %6125 = vmatpush3.msra.mxu0 %v7112_v42 }
 0xc11   : > { %6126 = vmatprep.subr.mxu0 %v7121_v43 }
 0xc12   : > { %v1381_v5 = vpop.permute.xlu1 %1380  ;;  %6127 = vmatpush3.msra.mxu0 %v7121_v43 }
 0xc6d   : > { %v1278_v53 = vpop.xlane.xlu0 %1277 }
 0xc6e   : > { %6506 = vrcp.f32 %v1278_v53 }
 0xc71   : > { %v1275_v54 = vpop.xlane.xlu0 %1274 }
 0xc72   : > { %6508 = vrcp.f32 %v1275_v54 }
 0xc75   : > { %v1284_v55 = vpop.permute.xlu0 %1283 }
 0xc76   : > { %6104 = vmatprep.subr.mxu1 %v1284_v55 }
 0xc77   : > { %6105 = vmatpush3.msra.mxu1 %v1284_v55 }
 0xc78   : > { %6109 = vmatprep.subr.mxu1 %v1412_v56 }
 0xc79   : > { %v1373_v63 = vpop.permute.xlu0 %1372 }
 0xc7a   : > { %v1394_v6 = vsel %vm568_vm5, %v6979_v29, %v1373_v63  ;;  %v5672_v29 = vld [vmem:[%s7851_s5 + $0x3] ss:$0 sm:$0xff] }
 0xc7b   : > { %v6507_v59 = vpop.eup %6506  ;;  %v1396_v8 = vsel %vm654_vm6, %v1394_v6, %v1381_v5 }
 0xc7c   : > { %v1282_v62 = vmul.f32 %v6507_v59, %v6503_v35  ;;  %v5674_v35 = vld [vmem:[%s7851_s5 + $0x5] ss:$0 sm:$0xff] }
 0xc7d   : > { %v1375_v0 = vpop.permute.xlu0 %1374 }
 0xc7e   : > { %v1395_v10 = vsel %vm568_vm5, %v6977_v28, %v1375_v0 }
 0xc7f   : > { %v6509_v58 = vpop.eup %6508 }
 0xc80   : > { %v1281_v61 = vmul.f32 %v6509_v58, %v6505_v52 }
 0xc81   : > { %v1383_v1 = vpop.permute.xlu0 %1382 }
 0xc82   : > { %6106 = vmatprep.mubr.msk.f32.mxu1 %vm654_vm6, %v1281_v61  ;;  %v1397_v11 = vsel %vm654_vm6, %v1395_v10, %v1383_v1 }
 0xc83   : > { %6107 = vmatmul.mubr.msk.f32.vlgmr.msra.gmra.mxu1 %vm654_vm6, %v1282_v62  ;;  %v5675_v62 = vld [vmem:[%s7851_s5 + $0x6] ss:$0 sm:$0xff] }
 0xc84   : > { %6110 = vmatpush3.msra.mxu1 %v1412_v56  ;;  %v5678_v56 = vld [vmem:[%s7851_s5 + $0x7] ss:$0 sm:$0xff] }
 0xc85   : > { %6111 = vmatprep.subr.mxu1 %v1410_v60  ;;  %v1406_v2 = vpop.permute.xlu0 %1405 }
 0xc86   : > { %6112 = vmatpush3.msra.mxu1 %v1410_v60 }
 0xc87   : > { %6113 = vmatprep.subr.mxu1 %v1408_v38 }
 0xc88   : > { %6114 = vmatpush3.msra.mxu1 %v1408_v38 }
 0xc89   : > { %6115 = vmatprep.subr.mxu1 %v1406_v2 }
 0xc8a   : > { %6116 = vmatpush3.msra.mxu1 %v1406_v2 }
 0xc8b   : > { %6131 = vmatprep.subr.mxu1 %v6763_v39 }
 0xd43   : > { %v6108_v3 = vpop.f32.mrf.mxu1 }
 0xd45   : > { %v1361_v4 = vpop.f32.mrf.mxu1 }
 0xd46   : > { %1388 = vrot.lane.b32.xlu1 %v1361_v4, %s7862_s14 }
 0xd4a   : > { %1390 = vrot.lane.b32.xlu1 %v6108_v3, %s7862_s14  ;;  %s5637_s14 = sshll.u32 %s6875_s21, 2  ;;  %s7900_s21 = smov 16  }
 0xd4b   : > { %s7098_s9 = scalar_lea.vmem %s7895_s1, %s5637_s14  ;;  %s7897_s14 = smov 64  }
 0xd4c   : > { %v429_v41 = vld [vmem:[%s7098_s9] sm:$0xf]  ;;  %s7908_s1 = smov 48  }
 0xdb8   : > { %v1389_v7 = vpop.permute.xlu1 %1388 }
 0xdb9   : > { %v1399_v9 = vsel %vm1398_vm7, %v1396_v8, %v1389_v7 }
 0xdba   : > { %6117 = vmatprep.mubr.msk.f32.mxu1 %vm432_vm4, %v1399_v9 }
 0xdbc   : > { %v1391_v12 = vpop.permute.xlu1 %1390 }
 0xdbd   : > { %v1400_v13 = vsel %vm1398_vm7, %v1397_v11, %v1391_v12 }
 0xdbe   : > { %6118 = vmatmul.mubr.msk.f32.vlgmr.msra.gmra.mxu1 %vm432_vm4, %v1400_v13 }
 0xdbf   : > { %6133 = vmatprep.mubr.msk.f32.mxu1 %vm6764_vm8, %v6763_v39  ;;  %6132 = vmatpush3.msra.mxu1 %v1637_v33 }
 0xdc2   : > { %6134 = vmatmul.mubr.msk.f32.vlgmr.msra.gmra.mxu1 %vm568_vm5, %v429_v41 }
 0xe7e   : > { %v6119_v14 = vpop.f32.mrf.mxu1 }
 0xe7f   : > { %v1499_v15 = vadd.f32 %v6119_v14, %v6886_v21 }
 0xe80   : > { %v1489_v16 = vpop.f32.mrf.mxu1 }
 0xe81   : > { %v7073_v17 = vadd.f32 %v5672_v29, %v1499_v15  ;;  %v1498_v18 = vadd.f32 %v1489_v16, %v6890_v23 }
 0xe82   : > { %v1712_v59 = vpop.f32.mrf.mxu1 }
 0xe83   : > { %v7076_v28 = vadd.f32 %v5672_v29, %v1498_v18  ;;  %v1512_v19 = vsel %vm432_vm4, %v7073_v17, 0.0  ;;  %v7136_v58 = vadd.f32 %v5678_v56, %v1712_v59 }
 0xe84   : > { %1513 = vadd.xlane.f32.xlu1 %v1512_v19  ;;  %v6135_v60 = vpop.f32.mrf.mxu1 }
 0xe85   : > { %v1509_v20 = vsel %vm432_vm4, %v7076_v28, 0.0  ;;  %6136 = vmatprep.subr.msk.mxu0 %vm568_vm5, %v7136_v58 }
 0xe86   : > { %1510 = vadd.xlane.f32.xlu0 %v1509_v20 }
 0xe95   : > { %1914 = vrot.lane.b32.xlu1 %v7136_v58, %s7878_s20 }
 0xe99   : > { %2110 = vrot.lane.b32.xlu1 %v7136_v58, %s7876_s29 }
 0xf0d   : > { %v1514_v22 = vpop.xlane.xlu1 %1513 }
 0xf0e   : > { %v1516_v24 = vmul.f32 0.03125, %v1514_v22 }
 0xf0f   : > { %v1511_v25 = vpop.xlane.xlu0 %1510 }
 0xf10   : > { %v1515_v21 = vmul.f32 0.03125, %v1511_v25  ;;  %v1518_v26 = vsub.f32 %v7073_v17, %v1516_v24 }
 0xf11   : > { %v1915_v61 = vpop.permute.xlu1 %1914 }
 0xf12   : > { %v1517_v27 = vsub.f32 %v7076_v28, %v1515_v21  ;;  %v1520_v31 = vmul.f32 %v1518_v26, %v1518_v26 }
 0xf14   : > { %v1519_v23 = vmul.f32 %v1517_v27, %v1517_v27  ;;  %v1524_v32 = vsel %vm432_vm4, %v1520_v31, 0.0 }
 0xf15   : > { %v2111_v2 = vpop.permute.xlu1 %2110 }
 0xf16   : > { %v1521_v30 = vsel %vm432_vm4, %v1519_v23, 0.0 }
 0xf17   : > { %1522 = vadd.xlane.f32.xlu0 %v1521_v30 }
 0xf1b   : > { %1525 = vadd.xlane.f32.xlu0 %v1524_v32 }
 0xfa0   : > { %v1523_v44 = vpop.xlane.xlu0 %1522 }
 0xfa1   : > { %v1527_v45 = vmul.f32 0.03125, %v1523_v44 }
 0xfa3   : > { %v1529_v46 = vadd.f32 1e-05, %v1527_v45 }
 0xfa4   : > { %v1526_v47 = vpop.xlane.xlu0 %1525 }
 0xfa5   : > { %6510 = vrsqrt.f32 %v1529_v46  ;;  %v1528_v48 = vmul.f32 0.03125, %v1526_v47 }
 0xfa7   : > { %v1530_v49 = vadd.f32 1e-05, %v1528_v48 }
 0xfa9   : > { %6512 = vrsqrt.f32 %v1530_v49 }
 0xfb2   : > { %v6511_v50 = vpop.eup %6510 }
 0xfb3   : > { %v1533_v57 = vmul.f32 %v6511_v50, %v1517_v27 }
 0xfb5   : > { %v1539_v36 = vmul.f32 %v5673_v51, %v1533_v57 }
 0xfb6   : > { %v6513_v52 = vpop.eup %6512 }
 0xfb7   : > { %v1534_v37 = vmul.f32 %v6513_v52, %v1518_v26  ;;  %v1545_v53 = vadd.f32 %v5674_v35, %v1539_v36 }
 0xfb9   : > { %v1540_v54 = vmul.f32 %v5673_v51, %v1534_v37  ;;  %6128 = vmatprep.mubr.msk.f32.mxu0 %vm432_vm4, %v1545_v53 }
 0xfbb   : > { %v1546_v55 = vadd.f32 %v5674_v35, %v1540_v54 }
 0xfbd   : > { %6129 = vmatmul.mubr.msk.f32.vlgmr.msra.gmra.mxu0 %vm432_vm4, %v1546_v55 }
 0xfbe   : > { %6137 = vmatpush3.xpose.msk.msra.mxu0 %vm568_vm5, %v7136_v58 }
 0xfbf   : > { %6146 = vmatprep.subr.msk.mxu0 %vm568_vm5, %v1915_v61 }
0x107d   : > { %v6130_v38 = vpop.f32.mrf.mxu0 }
0x107e   : > { %v7150_v63 = vadd.f32 %v6130_v38, %v5675_v62 }
0x107f   : > { %v1628_v0 = vpop.f32.mrf.mxu0 }
0x1080   : > { %v7152_v1 = vadd.f32 %v5675_v62, %v1628_v0  ;;  %1912 = vrot.lane.b32.xlu1 %v7150_v63, %s7878_s20 }
0x1082   : > { %1910 = vrot.lane.b32.xlu0 %v7152_v1, %s7878_s20  ;;  %6138 = vmatprep.mubr.msk.f32.mxu0 %vm568_vm5, %v7152_v1  ;;  %s7903_s20 = smov 96  }
0x1083   : > { %6139 = vmatmul.mubr.msk.f32.vlgmr.msra.gmra.mxu0 %vm568_vm5, %v7150_v63 }
0x1084   : > { %2108 = vrot.lane.b32.xlu1 %v7150_v63, %s7876_s29  ;;  %6147 = vmatpush3.xpose.msk.msra.mxu0 %vm568_vm5, %v1915_v61 }
0x1085   : > { %6156 = vmatprep.subr.msk.mxu0 %vm568_vm5, %v2111_v2 }
0x1086   : > { %2106 = vrot.lane.b32.xlu0 %v7152_v1, %s7876_s29  ;;  %s7904_s29 = smov 88  }
0x1088   : > { %2302 = vrot.lane.b32.xlu1 %v7152_v1, %s7874_s13 }
0x108a   : > { %2306 = vrot.lane.b32.xlu0 %v7136_v58, %s7874_s13 }
0x108e   : > { %2304 = vrot.lane.b32.xlu0 %v7150_v63, %s7874_s13  ;;  %s7902_s13 = smov 32  }
0x10f2   : > { %v1913_v3 = vpop.permute.xlu1 %1912 }
0x10f4   : > { %v1911_v4 = vpop.permute.xlu0 %1910 }
0x10f5   : > { %6148 = vmatprep.mubr.msk.f32.mxu0 %vm568_vm5, %v1911_v4 }
0x10f6   : > { %v2109_v5 = vpop.permute.xlu1 %2108  ;;  %6149 = vmatmul.mubr.msk.f32.vlgmr.msra.gmra.mxu0 %vm568_vm5, %v1913_v3 }
0x10f7   : > { %6157 = vmatpush3.xpose.msk.msra.mxu0 %vm568_vm5, %v2111_v2 }
0x10f8   : > { %v2107_v6 = vpop.permute.xlu0 %2106 }
0x10f9   : > { %6158 = vmatprep.mubr.msk.f32.mxu0 %vm568_vm5, %v2107_v6 }
0x10fa   : > { %v2303_v7 = vpop.permute.xlu1 %2302  ;;  %6159 = vmatmul.mubr.msk.f32.vlgmr.msra.gmra.mxu0 %vm568_vm5, %v2109_v5 }
0x10fb   : > { %6168 = vmatprep.mubr.msk.f32.mxu0 %vm568_vm5, %v2303_v7 }
0x10fc   : > { %v2307_v8 = vpop.permute.xlu0 %2306 }
0x10fd   : > { %6166 = vmatprep.subr.msk.mxu0 %vm568_vm5, %v2307_v8 }
0x10fe   : > { %6167 = vmatpush3.xpose.msk.msra.mxu0 %vm568_vm5, %v2307_v8 }
0x1100   : > { %v2305_v9 = vpop.permute.xlu0 %2304 }
0x1101   : > { %6169 = vmatmul.mubr.msk.f32.vlgmr.msra.gmra.mxu0 %vm568_vm5, %v2305_v9 }
0x1143   : > { %v6140_v10 = vpop.f32.mrf.mxu0 }
0x1144   : > { %v1801_v11 = vmul.f32 0.35355338, %v6140_v10 }
0x1145   : > { %v1791_v12 = vpop.f32.mrf.mxu0 }
0x1146   : > { %v1800_v13 = vmul.f32 0.35355338, %v1791_v12  ;;  %v1805_v14 = vsel %vm339_vm2, %v1801_v11, -inf }
0x1147   : > { %1806 = vmax.xlane.f32.xlu0 %v1805_v14 }
0x1148   : > { %v1802_v29 = vsel %vm339_vm2, %v1800_v13, -inf }
0x1149   : > { %1803 = vmax.xlane.f32.xlu1 %v1802_v29 }
0x11b6   : > { %v6150_v15 = vpop.f32.mrf.mxu0 }
0x11b7   : > { %v1998_v16 = vmul.f32 0.35355338, %v6150_v15 }
0x11b8   : > { %v1988_v18 = vpop.f32.mrf.mxu0 }
0x11b9   : > { %v1997_v19 = vmul.f32 0.35355338, %v1988_v18  ;;  %v2002_v20 = vsel %vm339_vm2, %v1998_v16, -inf }
0x11ba   : > { %v6160_v22 = vpop.f32.mrf.mxu0  ;;  %2003 = vmax.xlane.f32.xlu1 %v2002_v20 }
0x11bb   : > { %v2194_v24 = vmul.f32 0.35355338, %v6160_v22  ;;  %v1999_v25 = vsel %vm339_vm2, %v1997_v19, -inf }
0x11bc   : > { %v2184_v21 = vpop.f32.mrf.mxu0  ;;  %2000 = vmax.xlane.f32.xlu0 %v1999_v25 }
0x11bd   : > { %v2193_v26 = vmul.f32 0.35355338, %v2184_v21  ;;  %v2198_v27 = vsel %vm339_vm2, %v2194_v24, -inf }
0x11be   : > { %2199 = vmax.xlane.f32.xlu1 %v2198_v27 }
0x11bf   : > { %v2195_v23 = vsel %vm339_vm2, %v2193_v26, -inf }
0x11c0   : > { %2196 = vmax.xlane.f32.xlu0 %v2195_v23 }
0x11c1   : > { %v6170_v30 = vpop.f32.mrf.mxu0 }
0x11c2   : > { %v2390_v31 = vmul.f32 0.35355338, %v6170_v30 }
0x11c3   : > { %v2380_v32 = vpop.f32.mrf.mxu0 }
0x11c4   : > { %v2389_v33 = vmul.f32 0.35355338, %v2380_v32  ;;  %v2394_v41 = vsel %vm339_vm2, %v2390_v31, -inf }
0x11c5   : > { %2395 = vmax.xlane.f32.xlu1 %v2394_v41 }
0x11c6   : > { %v2391_v44 = vsel %vm339_vm2, %v2389_v33, -inf }
0x11c7   : > { %2392 = vmax.xlane.f32.xlu0 %v2391_v44 }
0x11d0   : > { %v1807_v45 = vpop.xlane.xlu0 %1806 }
0x11d1   : > { %v1809_v47 = vsub.f32 %v1801_v11, %v1807_v45 }
0x11d2   : > { %v1804_v46 = vpop.xlane.xlu1 %1803 }
0x11d3   : > { %v1808_v48 = vsub.f32 %v1800_v13, %v1804_v46  ;;  %v1812_v49 = vmul.f32 1.442695, %v1809_v47 }
0x11d5   : > { %v1810_v50 = vmul.f32 1.442695, %v1808_v48  ;;  %6514 = vpow2.f32 %v1812_v49 }
0x11d6   : > { %2021 = vrot.lane.b32.xlu1 %v7136_v58, %s7880_s19  ;;  %s7910_s19 = smov 40  }
0x11d7   : > { %6516 = vpow2.f32 %v1810_v50 }
0x11dd   : > { %1824 = vrot.lane.b32.xlu0 %v7136_v58, %s7882_s17 }
0x11e2   : > { %v7195_v51 = vpop.eup %6514 }
0x11e3   : > { %v1817_v35 = vsel %vm339_vm2, %v7195_v51, 0.0 }
0x11e4   : > { %v7197_v57 = vpop.eup %6516 }
0x11e5   : > { %v1814_v36 = vsel %vm339_vm2, %v7197_v57, 0.0 }
0x11fa   : > { %1818 = vadd.xlane.f32.xlu1 %v1817_v35 }
0x11fc   : > { %1815 = vadd.xlane.f32.xlu0 %v1814_v36 }
0x1243   : > { %v2004_v52 = vpop.xlane.xlu1 %2003 }
0x1244   : > { %v2006_v37 = vsub.f32 %v1998_v16, %v2004_v52 }
0x1245   : > { %v2001_v53 = vpop.xlane.xlu0 %2000 }
0x1246   : > { %v2009_v54 = vmul.f32 1.442695, %v2006_v37  ;;  %v2005_v55 = vsub.f32 %v1997_v19, %v2001_v53 }
0x1247   : > { %v2200_v56 = vpop.xlane.xlu1 %2199 }
0x1248   : > { %6518 = vpow2.f32 %v2009_v54  ;;  %v2007_v59 = vmul.f32 1.442695, %v2005_v55  ;;  %v2202_v60 = vsub.f32 %v2194_v24, %v2200_v56 }
0x1249   : > { %v2197_v61 = vpop.xlane.xlu0 %2196 }
0x124a   : > { %6520 = vpow2.f32 %v2007_v59  ;;  %v2205_v62 = vmul.f32 1.442695, %v2202_v60  ;;  %v2201_v38 = vsub.f32 %v2193_v26, %v2197_v61 }
0x124c   : > { %6522 = vpow2.f32 %v2205_v62  ;;  %v2203_v0 = vmul.f32 1.442695, %v2201_v38 }
0x124e   : > { %6524 = vpow2.f32 %v2203_v0  ;;  %v2396_v2 = vpop.xlane.xlu1 %2395 }
0x124f   : > { %v2398_v3 = vsub.f32 %v2390_v31, %v2396_v2 }
0x1250   : > { %v2393_v4 = vpop.xlane.xlu0 %2392 }
0x1251   : > { %v2401_v5 = vmul.f32 1.442695, %v2398_v3  ;;  %v2397_v6 = vsub.f32 %v2389_v33, %v2393_v4 }
0x1252   : > { %v2022_v10 = vpop.permute.xlu1 %2021 }
0x1253   : > { %6526 = vpow2.f32 %v2401_v5  ;;  %v2399_v7 = vmul.f32 1.442695, %v2397_v6 }
0x1254   : > { %v1825_v8 = vpop.permute.xlu0 %1824 }
0x1255   : > { %v6519_v9 = vpop.eup %6518  ;;  %6528 = vpow2.f32 %v2399_v7  ;;  %6141 = vmatprep.subr.msk.mxu1 %vm1832_vm9, %v1825_v8 }
0x1256   : > { %6142 = vmatpush3.msk.msra.mxu1 %vm1832_vm9, %v1825_v8  ;;  %v2014_v11 = vsel %vm339_vm2, %v6519_v9, 0.0 }
0x1257   : > { %v6521_v12 = vpop.eup %6520  ;;  %2015 = vadd.xlane.f32.xlu1 %v2014_v11  ;;  %6151 = vmatprep.subr.msk.mxu1 %vm1832_vm9, %v2022_v10 }
0x1258   : > { %v2011_v13 = vsel %vm339_vm2, %v6521_v12, 0.0 }
0x1259   : > { %v6523_v14 = vpop.eup %6522  ;;  %2012 = vadd.xlane.f32.xlu0 %v2011_v13 }
0x125a   : > { %v2210_v29 = vsel %vm339_vm2, %v6523_v14, 0.0 }
0x125b   : > { %v6525_v15 = vpop.eup %6524  ;;  %2211 = vadd.xlane.f32.xlu1 %v2210_v29 }
0x125c   : > { %v2207_v16 = vsel %vm339_vm2, %v6525_v15, 0.0 }
0x125d   : > { %2208 = vadd.xlane.f32.xlu0 %v2207_v16  ;;  %v5704_v16 = vld [vmem:[%s7851_s5 + $0x8] ss:$0 sm:$0xff] }
0x1260   : > { %v6527_v18 = vpop.eup %6526 }
0x1261   : > { %v2406_v19 = vsel %vm339_vm2, %v6527_v18, 0.0 }
0x1262   : > { %v6529_v20 = vpop.eup %6528  ;;  %2407 = vadd.xlane.f32.xlu1 %v2406_v19 }
0x1263   : > { %v2403_v22 = vsel %vm339_vm2, %v6529_v20, 0.0 }
0x1264   : > { %2404 = vadd.xlane.f32.xlu0 %v2403_v22 }
0x1273   : > { %2217 = vrot.lane.b32.xlu1 %v7136_v58, %s7896_s8 }
0x1277   : > { %2543 = vrot.lane.b32.xlu1 %v7089_v34, %s7897_s14 }
0x127a   : > { %2413 = vrot.lane.b32.xlu0 %v7136_v58, %s7898_s16 }
0x127e   : > { %2541 = vrot.lane.b32.xlu0 %v7103_v40, %s7897_s14 }
0x1282   : > { %2539 = vrot.lane.b32.xlu0 %v7112_v42, %s7897_s14 }
0x1283   : > { %v1819_v24 = vpop.xlane.xlu1 %1818 }
0x1284   : > { %6530 = vrcp.f32 %v1819_v24  ;;  %v5708_v24 = vmul.f32 -1.442695, %v7150_v63 }
0x1285   : > { %v1816_v25 = vpop.xlane.xlu0 %1815 }
0x1286   : > { %6532 = vrcp.f32 %v1816_v25  ;;  %v5707_v25 = vmul.f32 -1.442695, %v7152_v1 }
0x1291   : > { %v6531_v21 = vpop.eup %6530 }
0x1292   : > { %v1823_v23 = vmul.f32 %v6531_v21, %v7195_v51 }
0x1293   : > { %v6533_v26 = vpop.eup %6532 }
0x1294   : > { %v1822_v27 = vmul.f32 %v6533_v26, %v7197_v57 }
0x1296   : > { %6143 = vmatprep.mubr.msk.f32.mxu1 %vm339_vm2, %v1822_v27 }
0x1297   : > { %6144 = vmatmul.mubr.msk.f32.vlgmr.msra.gmra.mxu1 %vm339_vm2, %v1823_v23 }
0x1298   : > { %6152 = vmatpush3.msk.msra.mxu1 %vm1832_vm9, %v2022_v10 }
0x12e0   : > { %v2016_v58 = vpop.xlane.xlu1 %2015 }
0x12e1   : > { %6534 = vrcp.f32 %v2016_v58 }
0x12e2   : > { %v2013_v30 = vpop.xlane.xlu0 %2012 }
0x12e3   : > { %6536 = vrcp.f32 %v2013_v30 }
0x12e4   : > { %v2212_v31 = vpop.xlane.xlu1 %2211 }
0x12e5   : > { %6538 = vrcp.f32 %v2212_v31 }
0x12e6   : > { %v2209_v32 = vpop.xlane.xlu0 %2208 }
0x12e7   : > { %6540 = vrcp.f32 %v2209_v32 }
0x12eb   : > { %v2408_v33 = vpop.xlane.xlu1 %2407 }
0x12ec   : > { %6542 = vrcp.f32 %v2408_v33 }
0x12ed   : > { %v2405_v41 = vpop.xlane.xlu0 %2404 }
0x12ee   : > { %6544 = vrcp.f32 %v2405_v41  ;;  %v6535_v44 = vpop.eup %6534 }
0x12ef   : > { %v2218_v45 = vpop.permute.xlu1 %2217  ;;  %v2020_v48 = vmul.f32 %v6535_v44, %v6519_v9  ;;  %6546 = vpow2.f32 %v5708_v24  ;;  %v2850_v24 = vld [vmem:[%s7850_s4 + $0x20] sm:$0xff] }
0x12f0   : > { %v6537_v46 = vpop.eup %6536  ;;  %6161 = vmatprep.subr.msk.mxu1 %vm1832_vm9, %v2218_v45  ;;  %6548 = vpow2.f32 %v5707_v25  ;;  %v2849_v25 = vld [vmem:[%s7850_s4 + $0x18] sm:$0xff] }
0x12f1   : > { %v2019_v47 = vmul.f32 %v6537_v46, %v6521_v12  ;;  %v2414_v51 = vpop.permute.xlu0 %2413 }
0x12f2   : > { %v6539_v49 = vpop.eup %6538 }
0x12f3   : > { %6153 = vmatprep.mubr.msk.f32.mxu1 %vm339_vm2, %v2019_v47  ;;  %v2216_v35 = vmul.f32 %v6539_v49, %v6523_v14  ;;  %v2544_v54 = vpop.permute.xlu1 %2543 }
0x12f4   : > { %v6541_v50 = vpop.eup %6540  ;;  %6154 = vmatmul.mubr.msk.f32.vlgmr.msra.gmra.mxu1 %vm339_vm2, %v2020_v48  ;;  %6176 = vmatprep.subr.mxu0 %v2544_v54  ;;  %v2709_v48 = vld [vmem:[%s7848_s2 + $0x58] sm:$0xff] }
0x12f5   : > { %6162 = vmatpush3.msk.msra.mxu1 %vm1832_vm9, %v2218_v45  ;;  %v2215_v57 = vmul.f32 %v6541_v50, %v6525_v15  ;;  %v2542_v55 = vpop.permute.xlu0 %2541  ;;  %6177 = vmatpush3.msra.mxu0 %v2544_v54 }
0x12f6   : > { %6171 = vmatprep.subr.msk.mxu1 %vm1832_vm9, %v2414_v51  ;;  %6178 = vmatprep.subr.mxu0 %v2542_v55 }
0x12f7   : > { %6163 = vmatprep.mubr.msk.f32.mxu1 %vm339_vm2, %v2215_v57  ;;  %6179 = vmatpush3.msra.mxu0 %v2542_v55 }
0x12f8   : > { %6164 = vmatmul.mubr.msk.f32.vlgmr.msra.gmra.mxu1 %vm339_vm2, %v2216_v35 }
0x12f9   : > { %6172 = vmatpush3.msk.msra.mxu1 %vm1832_vm9, %v2414_v51  ;;  %v6543_v36 = vpop.eup %6542  ;;  %v2540_v56 = vpop.permute.xlu0 %2539 }
0x12fa   : > { %v2412_v53 = vmul.f32 %v6543_v36, %v6527_v18  ;;  %6180 = vmatprep.subr.mxu0 %v2540_v56 }
0x12fb   : > { %v6545_v52 = vpop.eup %6544  ;;  %6181 = vmatpush3.msra.mxu0 %v2540_v56 }
0x12fc   : > { %v2411_v37 = vmul.f32 %v6545_v52, %v6529_v20  ;;  %v6547_v21 = vpop.eup %6546 }
0x12fd   : > { %v6549_v26 = vpop.eup %6548  ;;  %v2637_v27 = vadd.f32 1.0, %v6547_v21  ;;  %v2848_v21 = vld [vmem:[%s7850_s4 + $0x10] sm:$0xff] }
0x12fe   : > { %6173 = vmatprep.mubr.msk.f32.mxu1 %vm339_vm2, %v2411_v37  ;;  %v2636_v23 = vadd.f32 1.0, %v6549_v26  ;;  %v2847_v26 = vld [vmem:[%s7850_s4 + $0x8] sm:$0xff] }
0x12ff   : > { %6174 = vmatmul.mubr.msk.f32.vlgmr.msra.gmra.mxu1 %vm339_vm2, %v2412_v53  ;;  %6550 = vrcp.f32 %v2637_v27  ;;  %v2846_v27 = vld [vmem:[%s7850_s4] sm:$0xff] }
0x1300   : > { %6552 = vrcp.f32 %v2636_v23  ;;  %v5711_v23 = vld [vmem:[%s7851_s5 + $0xb] ss:$0 sm:$0xff] }
0x130c   : > { %v6551_v58 = vpop.eup %6550 }
0x130d   : > { %v6553_v32 = vpop.eup %6552 }
0x1357   : > { %v6145_v59 = vpop.f32.mrf.mxu1 }
0x1359   : > { %v1901_v60 = vpop.f32.mrf.mxu1 }
0x13b4   : > { %v6155_v61 = vpop.f32.mrf.mxu1 }
0x13b5   : > { %2502 = vrot.lane.b32.xlu1 %v6155_v61, %s7899_s15 }
0x13b6   : > { %v2097_v62 = vpop.f32.mrf.mxu1 }
0x13b8   : > { %v6165_v38 = vpop.f32.mrf.mxu1 }
0x13b9   : > { %2500 = vrot.lane.b32.xlu1 %v2097_v62, %s7899_s15 }
0x13ba   : > { %v2293_v0 = vpop.f32.mrf.mxu1 }
0x13bb   : > { %2508 = vrot.lane.b32.xlu0 %v2293_v0, %s7900_s21 }
0x13bd   : > { %2510 = vrot.lane.b32.xlu1 %v6165_v38, %s7900_s21 }
0x13bf   : > { %v6175_v2 = vpop.f32.mrf.mxu1 }
0x13c1   : > { %v2489_v3 = vpop.f32.mrf.mxu1  ;;  %2537 = vrot.lane.b32.xlu1 %v7121_v43, %s7897_s14 }
0x13c2   : > { %2516 = vrot.lane.b32.xlu0 %v2489_v3, %s7901_s22 }
0x13c6   : > { %2518 = vrot.lane.b32.xlu0 %v6175_v2, %s7901_s22 }
0x1427   : > { %v2503_v4 = vpop.permute.xlu1 %2502 }
0x1428   : > { %v2523_v13 = vsel %vm568_vm5, %v6145_v59, %v2503_v4  ;;  %v2705_v59 = vld [vmem:[%s7848_s2 + $0x28] sm:$0xff] }
0x142b   : > { %v2501_v5 = vpop.permute.xlu1 %2500 }
0x142c   : > { %v2522_v8 = vsel %vm568_vm5, %v1901_v60, %v2501_v5  ;;  %v2703_v60 = vld [vmem:[%s7848_s2 + $0x10] sm:$0xff] }
0x142d   : > { %v2509_v7 = vpop.permute.xlu0 %2508 }
0x142e   : > { %v2524_v10 = vsel %vm654_vm6, %v2522_v8, %v2509_v7 }
0x142f   : > { %v2511_v6 = vpop.permute.xlu1 %2510 }
0x1430   : > { %v2525_v14 = vsel %vm654_vm6, %v2523_v13, %v2511_v6 }
0x1433   : > { %v2538_v9 = vpop.permute.xlu1 %2537 }
0x1434   : > { %v2517_v11 = vpop.permute.xlu0 %2516  ;;  %6182 = vmatprep.subr.mxu0 %v2538_v9 }
0x1435   : > { %v2526_v12 = vsel %vm1398_vm7, %v2524_v10, %v2517_v11  ;;  %6183 = vmatpush3.msra.mxu0 %v2538_v9  ;;  %v5709_v10 = vld [vmem:[%s7851_s5 + $0x9] ss:$0 sm:$0xff] }
0x1436   : > { %6184 = vmatprep.mubr.msk.f32.mxu0 %vm432_vm4, %v2526_v12 }
0x1438   : > { %v2519_v29 = vpop.permute.xlu0 %2518 }
0x1439   : > { %v2527_v15 = vsel %vm1398_vm7, %v2525_v14, %v2519_v29  ;;  %v5710_v29 = vld [vmem:[%s7851_s5 + $0xa] ss:$0 sm:$0xff] }
0x143a   : > { %6185 = vmatmul.mubr.msk.f32.vlgmr.msra.gmra.mxu0 %vm432_vm4, %v2527_v15 }
0x14fa   : > { %v6186_v18 = vpop.f32.mrf.mxu0 }
0x14fb   : > { %v2627_v19 = vadd.f32 %v6186_v18, %v5704_v16 }
0x14fc   : > { %v2621_v20 = vpop.f32.mrf.mxu0 }
0x14fd   : > { %v2622_v22 = vadd.f32 %v5704_v16, %v2621_v20  ;;  %2646 = vrot.lane.b32.xlu0 %v2627_v19, %s7902_s13  ;;  %v2853_v19 = vld [vmem:[%s7850_s4 + $0x38] sm:$0xff]  ;;  %v2852_v20 = vld [vmem:[%s7850_s4 + $0x30] sm:$0xff] }
0x14fe   : > { %6198 = vmatprep.subr.mxu0 %v2853_v19 }
0x14ff   : > { %2644 = vrot.lane.b32.xlu1 %v2622_v22, %s7902_s13  ;;  %6199 = vmatpush3.msra.mxu0 %v2853_v19  ;;  %v2851_v22 = vld [vmem:[%s7850_s4 + $0x28] sm:$0xff] }
0x1500   : > { %6200 = vmatprep.subr.mxu0 %v2852_v20 }
0x1501   : > { %6201 = vmatpush3.msra.mxu0 %v2852_v20 }
0x1502   : > { %6202 = vmatprep.subr.mxu0 %v2851_v22 }
0x1503   : > { %6203 = vmatpush3.msra.mxu0 %v2851_v22 }
0x1504   : > { %6204 = vmatprep.subr.mxu0 %v2850_v24 }
0x1505   : > { %6205 = vmatpush3.msra.mxu0 %v2850_v24  ;;  %v5720_v24 = vld [vmem:[%s7851_s5 + $0x11] ss:$0 sm:$0xff] }
0x1506   : > { %6206 = vmatprep.subr.mxu0 %v2849_v25 }
0x1507   : > { %6207 = vmatpush3.msra.mxu0 %v2849_v25 }
0x1508   : > { %6208 = vmatprep.subr.mxu0 %v2848_v21 }
0x1509   : > { %6209 = vmatpush3.msra.mxu0 %v2848_v21 }
0x150a   : > { %6210 = vmatprep.subr.mxu0 %v2847_v26 }
0x150b   : > { %6211 = vmatpush3.msra.mxu0 %v2847_v26 }
0x150c   : > { %6212 = vmatprep.subr.mxu0 %v2846_v27 }
0x150d   : > { %6213 = vmatpush3.msra.mxu0 %v2846_v27  ;;  %v5726_v27 = vld [vmem:[%s7851_s5 + $0x12] ss:$0 sm:$0xff] }
0x156f   : > { %v2647_v30 = vpop.permute.xlu0 %2646 }
0x1570   : > { %v2651_v31 = vmul.f32 %v6551_v58, %v2647_v30 }
0x1571   : > { %v2645_v33 = vpop.permute.xlu1 %2644 }
0x1572   : > { %v2650_v41 = vmul.f32 %v6553_v32, %v2645_v33  ;;  %2656 = vrot.lane.b32.xlu0 %v2651_v31, %s7882_s17 }
0x1574   : > { %2654 = vrot.lane.b32.xlu1 %v2650_v41, %s7882_s17  ;;  %s7909_s17 = smov 104  }
0x15e4   : > { %v2657_v63 = vpop.permute.xlu0 %2656 }
0x15e5   : > { %v7263_v1 = vadd.f32 %v2657_v63, %v7073_v17  ;;  %v2707_v17 = vld [vmem:[%s7848_s2 + $0x40] sm:$0xff] }
0x15e6   : > { %v2655_v44 = vpop.permute.xlu1 %2654 }
0x15e7   : > { %v7266_v45 = vadd.f32 %v2655_v44, %v7076_v28  ;;  %v2667_v46 = vsel %vm432_vm4, %v7263_v1, 0.0 }
0x15e8   : > { %2668 = vadd.xlane.f32.xlu0 %v2667_v46 }
0x15e9   : > { %v2664_v47 = vsel %vm432_vm4, %v7266_v45, 0.0 }
0x15ea   : > { %2665 = vadd.xlane.f32.xlu1 %v2664_v47 }
0x15fb   : > { %2737 = vrot.lane.b32.xlu1 %v2709_v48, %s7902_s13 }
0x15fe   : > { %2735 = vrot.lane.b32.xlu0 %v7089_v34, %s7902_s13 }
0x15ff   : > { %2731 = vrot.lane.b32.xlu1 %v7103_v40, %s7902_s13 }
0x1602   : > { %2733 = vrot.lane.b32.xlu0 %v2707_v17, %s7902_s13 }
0x1603   : > { %2727 = vrot.lane.b32.xlu1 %v7112_v42, %s7902_s13 }
0x1671   : > { %v2669_v28 = vpop.xlane.xlu0 %2668 }
0x1672   : > { %v2671_v49 = vmul.f32 0.03125, %v2669_v28 }
0x1673   : > { %v2666_v50 = vpop.xlane.xlu1 %2665 }
0x1674   : > { %v2673_v51 = vsub.f32 %v7263_v1, %v2671_v49  ;;  %v2670_v57 = vmul.f32 0.03125, %v2666_v50 }
0x1675   : > { %v2736_v35 = vpop.permute.xlu0 %2735 }
0x1676   : > { %v2672_v34 = vsub.f32 %v7266_v45, %v2670_v57  ;;  %v2675_v36 = vmul.f32 %v2673_v51, %v2673_v51 }
0x1677   : > { %v2738_v40 = vpop.permute.xlu1 %2737 }
0x1678   : > { %v2679_v52 = vsel %vm432_vm4, %v2675_v36, 0.0  ;;  %v2674_v37 = vmul.f32 %v2672_v34, %v2672_v34  ;;  %v2742_v53 = vsel %vm432_vm4, %v2736_v35, %v2738_v40 }
0x1679   : > { %2680 = vadd.xlane.f32.xlu1 %v2679_v52  ;;  %6187 = vmatprep.subr.mxu1 %v2742_v53  ;;  %v2734_v54 = vpop.permute.xlu0 %2733 }
0x167a   : > { %v2676_v42 = vsel %vm432_vm4, %v2674_v37, 0.0  ;;  %6188 = vmatpush3.msra.mxu1 %v2742_v53  ;;  %v5716_v53 = vld [vmem:[%s7851_s5 + $0xc] ss:$0 sm:$0xff] }
0x167b   : > { %2677 = vadd.xlane.f32.xlu0 %v2676_v42  ;;  %v2732_v55 = vpop.permute.xlu1 %2731 }
0x167c   : > { %v2741_v56 = vsel %vm432_vm4, %v2732_v55, %v2734_v54 }
0x167d   : > { %6189 = vmatprep.subr.mxu1 %v2741_v56 }
0x167e   : > { %6190 = vmatpush3.msra.mxu1 %v2741_v56 }
0x167f   : > { %v2728_v61 = vpop.permute.xlu1 %2727 }
0x168a   : > { %2723 = vrot.lane.b32.xlu1 %v7121_v43, %s7902_s13 }
0x1691   : > { %2729 = vrot.lane.b32.xlu0 %v2705_v59, %s7902_s13 }
0x1695   : > { %2725 = vrot.lane.b32.xlu0 %v2703_v60, %s7902_s13 }
0x1702   : > { %v2681_v62 = vpop.xlane.xlu1 %2680 }
0x1703   : > { %v2683_v38 = vmul.f32 0.03125, %v2681_v62 }
0x1704   : > { %v2678_v0 = vpop.xlane.xlu0 %2677 }
0x1705   : > { %v2685_v2 = vadd.f32 1e-05, %v2683_v38  ;;  %v2682_v3 = vmul.f32 0.03125, %v2678_v0 }
0x1706   : > { %v2724_v6 = vpop.permute.xlu1 %2723 }
0x1707   : > { %6554 = vrsqrt.f32 %v2685_v2  ;;  %v2684_v43 = vadd.f32 1e-05, %v2682_v3 }
0x1708   : > { %v2730_v4 = vpop.permute.xlu0 %2729 }
0x1709   : > { %6556 = vrsqrt.f32 %v2684_v43  ;;  %v2740_v5 = vsel %vm432_vm4, %v2728_v61, %v2730_v4 }
0x170a   : > { %6191 = vmatprep.subr.mxu1 %v2740_v5 }
0x170b   : > { %6192 = vmatpush3.msra.mxu1 %v2740_v5 }
0x170c   : > { %v2726_v7 = vpop.permute.xlu0 %2725 }
0x170d   : > { %v2739_v8 = vsel %vm432_vm4, %v2724_v6, %v2726_v7  ;;  %v7361_v6 = vld [vmem:[%s7848_s2 + $0xa8] sm:$0xff]  ;;  %v7366_v7 = vld [vmem:[%s7848_s2 + $0x90] sm:$0xff] }
0x170e   : > { %6193 = vmatprep.subr.mxu1 %v2739_v8 }
0x170f   : > { %6194 = vmatpush3.msra.mxu1 %v2739_v8  ;;  %v7373_v8 = vld [vmem:[%s7848_s2 + $0x78] sm:$0xff] }
0x1710   : > { %6217 = vmatprep.subr.mxu1 %v7361_v6 }
0x1714   : > { %v6555_v9 = vpop.eup %6554 }
0x1715   : > { %v2689_v11 = vmul.f32 %v6555_v9, %v2673_v51  ;;  %v7380_v9 = vld [vmem:[%s7848_s2 + $0x60] sm:$0xff] }
0x1716   : > { %v6557_v12 = vpop.eup %6556 }
0x1717   : > { %v2688_v13 = vmul.f32 %v6557_v12, %v2672_v34  ;;  %v2695_v14 = vmul.f32 %v5709_v10, %v2689_v11 }
0x1719   : > { %v2694_v15 = vmul.f32 %v5709_v10, %v2688_v13  ;;  %v2701_v18 = vadd.f32 %v5710_v29, %v2695_v14 }
0x171b   : > { %v2700_v16 = vadd.f32 %v5710_v29, %v2694_v15 }
0x171d   : > { %6195 = vmatprep.mubr.msk.f32.mxu1 %vm432_vm4, %v2700_v16  ;;  %v5719_v16 = vld [vmem:[%s7851_s5 + $0x10] ss:$0 sm:$0xff] }
0x171e   : > { %6196 = vmatmul.mubr.msk.f32.vlgmr.msra.gmra.mxu1 %vm432_vm4, %v2701_v18 }
0x171f   : > { %6218 = vmatpush3.msra.mxu1 %v7361_v6 }
0x1720   : > { %6219 = vmatprep.subr.mxu1 %v7366_v7 }
0x1721   : > { %6220 = vmatpush3.msra.mxu1 %v7366_v7 }
0x1722   : > { %6221 = vmatprep.subr.mxu1 %v7373_v8 }
0x1723   : > { %6222 = vmatpush3.msra.mxu1 %v7373_v8 }
0x1724   : > { %6223 = vmatprep.subr.mxu1 %v7380_v9 }
0x1725   : > { %6224 = vmatpush3.msra.mxu1 %v7380_v9 }
0x17de   : > { %v6197_v58 = vpop.f32.mrf.mxu1 }
0x17df   : > { %v2825_v30 = vadd.f32 %v6197_v58, %v5711_v23 }
0x17e0   : > { %v2819_v31 = vpop.f32.mrf.mxu1 }
0x17e1   : > { %v2829_v32 = vmul.f32 %v2825_v30, %v2825_v30  ;;  %v2820_v33 = vadd.f32 %v5711_v23, %v2819_v31 }
0x17e3   : > { %v2831_v41 = vmul.f32 %v2829_v32, %v2825_v30  ;;  %v2828_v63 = vmul.f32 %v2820_v33, %v2820_v33 }
0x17e5   : > { %v2833_v44 = vmul.f32 0.044715, %v2831_v41  ;;  %v2830_v46 = vmul.f32 %v2828_v63, %v2820_v33 }
0x17e7   : > { %v2835_v47 = vadd.f32 %v2833_v44, %v2825_v30  ;;  %v2832_v48 = vmul.f32 0.044715, %v2830_v46 }
0x17e9   : > { %v2837_v17 = vmul.f32 0.7978846, %v2835_v47  ;;  %v2834_v28 = vadd.f32 %v2832_v48, %v2820_v33 }
0x17eb   : > { %6558 = vtanh.f32 %v2837_v17  ;;  %v2836_v49 = vmul.f32 0.7978846, %v2834_v28 }
0x17ed   : > { %6560 = vtanh.f32 %v2836_v49 }
0x17f8   : > { %v6559_v50 = vpop.eup %6558 }
0x17f9   : > { %v2841_v51 = vadd.f32 1.0, %v6559_v50 }
0x17fa   : > { %v6561_v57 = vpop.eup %6560 }
0x17fb   : > { %v2840_v35 = vadd.f32 1.0, %v6561_v57  ;;  %v2843_v34 = vmul.f32 0.5, %v2841_v51 }
0x17fd   : > { %v2842_v36 = vmul.f32 0.5, %v2840_v35  ;;  %v2845_v52 = vmul.f32 %v2843_v34, %v2825_v30 }
0x17ff   : > { %v2844_v40 = vmul.f32 %v2842_v36, %v2820_v33 }
0x1801   : > { %6214 = vmatprep.mubr.msk.f32.mxu0 %vm2854_vm10, %v2844_v40 }
0x1802   : > { %6215 = vmatmul.mubr.msk.f32.vlgmr.msra.gmra.mxu0 %vm2854_vm10, %v2845_v52 }
0x18c2   : > { %v6216_v37 = vpop.f32.mrf.mxu0 }
0x18c3   : > { %v2937_v54 = vadd.f32 %v6216_v37, %v7263_v1 }
0x18c4   : > { %v2927_v42 = vpop.f32.mrf.mxu0 }
0x18c5   : > { %v7345_v55 = vadd.f32 %v5716_v53, %v2937_v54  ;;  %v2936_v56 = vadd.f32 %v2927_v42, %v7266_v45 }
0x18c7   : > { %v7348_v59 = vadd.f32 %v5716_v53, %v2936_v56  ;;  %v2951_v60 = vsel %vm432_vm4, %v7345_v55, 0.0 }
0x18c8   : > { %2952 = vadd.xlane.f32.xlu0 %v2951_v60 }
0x18c9   : > { %v2948_v61 = vsel %vm432_vm4, %v7348_v59, 0.0 }
0x18ca   : > { %2949 = vadd.xlane.f32.xlu1 %v2948_v61 }
0x1951   : > { %v2953_v62 = vpop.xlane.xlu0 %2952 }
0x1952   : > { %v2955_v38 = vmul.f32 0.03125, %v2953_v62 }
0x1953   : > { %v2950_v0 = vpop.xlane.xlu1 %2949 }
0x1954   : > { %v2957_v1 = vsub.f32 %v7345_v55, %v2955_v38  ;;  %v2954_v2 = vmul.f32 0.03125, %v2950_v0 }
0x1956   : > { %v2956_v3 = vsub.f32 %v7348_v59, %v2954_v2  ;;  %v2959_v43 = vmul.f32 %v2957_v1, %v2957_v1 }
0x1958   : > { %v2963_v45 = vsel %vm432_vm4, %v2959_v43, 0.0  ;;  %v2958_v4 = vmul.f32 %v2956_v3, %v2956_v3 }
0x1959   : > { %2964 = vadd.xlane.f32.xlu1 %v2963_v45 }
0x195a   : > { %v2960_v5 = vsel %vm432_vm4, %v2958_v4, 0.0 }
0x195b   : > { %2961 = vadd.xlane.f32.xlu0 %v2960_v5 }
0x19e2   : > { %v2965_v10 = vpop.xlane.xlu1 %2964 }
0x19e3   : > { %v2967_v11 = vmul.f32 0.03125, %v2965_v10 }
0x19e4   : > { %v2962_v12 = vpop.xlane.xlu0 %2961 }
0x19e5   : > { %v2969_v13 = vadd.f32 1e-05, %v2967_v11  ;;  %v2966_v14 = vmul.f32 0.03125, %v2962_v12 }
0x19e7   : > { %6562 = vrsqrt.f32 %v2969_v13  ;;  %v2968_v29 = vadd.f32 1e-05, %v2966_v14 }
0x19e9   : > { %6564 = vrsqrt.f32 %v2968_v29 }
0x19f4   : > { %v6563_v15 = vpop.eup %6562 }
0x19f5   : > { %v2973_v18 = vmul.f32 %v6563_v15, %v2957_v1 }
0x19f6   : > { %v6565_v19 = vpop.eup %6564 }
0x19f7   : > { %v2972_v20 = vmul.f32 %v6565_v19, %v2956_v3  ;;  %v2979_v22 = vmul.f32 %v5719_v16, %v2973_v18 }
0x19f9   : > { %v2978_v25 = vmul.f32 %v5719_v16, %v2972_v20  ;;  %v2985_v26 = vadd.f32 %v5720_v24, %v2979_v22 }
0x19fb   : > { %v2984_v21 = vadd.f32 %v5720_v24, %v2978_v25 }
0x19fd   : > { %6225 = vmatprep.mubr.msk.f32.mxu1 %vm432_vm4, %v2984_v21 }
0x19fe   : > { %6226 = vmatmul.mubr.msk.f32.vlgmr.msra.gmra.mxu1 %vm432_vm4, %v2985_v26 }
0x1abe   : > { %v6227_v23 = vpop.f32.mrf.mxu1 }
0x1abf   : > { %v7397_v58 = vadd.f32 %v6227_v23, %v5726_v27 }
0x1ac0   : > { %v3068_v30 = vpop.f32.mrf.mxu1 }
0x1ac1   : > { %v7399_v31 = vadd.f32 %v5726_v27, %v3068_v30  ;;  %3081 = vrot.lane.b32.xlu0 %v7397_v58, %s7903_s20 }
0x1ac3   : > { %3079 = vrot.lane.b32.xlu1 %v7399_v31, %s7903_s20  ;;  %6232 = vmatprep.mubr.msk.f32.mxu1 %vm568_vm5, %v7399_v31 }
0x1ac5   : > { %3281 = vrot.lane.b32.xlu0 %v7399_v31, %s7904_s29 }
0x1ac7   : > { %3283 = vrot.lane.b32.xlu1 %v7397_v58, %s7904_s29 }
0x1ac9   : > { %3279 = vrot.lane.b32.xlu0 %v7397_v58, %s7905_s18 }
0x1acb   : > { %3277 = vrot.lane.b32.xlu1 %v7399_v31, %s7905_s18 }
0x1b33   : > { %v3082_v32 = vpop.permute.xlu0 %3081 }
0x1b34   : > { %6228 = vmatprep.subr.msk.mxu1 %vm568_vm5, %v3082_v32 }
0x1b35   : > { %6229 = vmatpush3.xpose.msk.msra.mxu1 %vm568_vm5, %v3082_v32  ;;  %v3080_v33 = vpop.permute.xlu1 %3079 }
0x1b36   : > { %6230 = vmatprep.subr.msk.mxu1 %vm568_vm5, %v3080_v33 }
0x1b37   : > { %v3282_v63 = vpop.permute.xlu0 %3281 }
0x1b39   : > { %6231 = vmatpush3.xpose.msk.msra.mxu1 %vm568_vm5, %v3080_v33  ;;  %v3284_v41 = vpop.permute.xlu1 %3283 }
0x1b3a   : > { %6242 = vmatprep.subr.msk.mxu1 %vm568_vm5, %v3284_v41 }
0x1b3b   : > { %v3280_v46 = vpop.permute.xlu0 %3279 }
0x1b3c   : > { %6233 = vmatmul.mubr.msk.f32.vlgmr.msra.gmra.mxu1 %vm568_vm5, %v7397_v58 }
0x1b3d   : > { %v3278_v44 = vpop.permute.xlu1 %3277  ;;  %6243 = vmatpush3.xpose.msk.msra.mxu1 %vm568_vm5, %v3284_v41 }
0x1b3e   : > { %6244 = vmatprep.subr.msk.mxu1 %vm568_vm5, %v3282_v63  ;;  %6246 = vmatprep.mubr.msk.f32.mxu1 %vm568_vm5, %v3278_v44 }
0x1b41   : > { %6245 = vmatpush3.xpose.msk.msra.mxu1 %vm568_vm5, %v3282_v63 }
0x1b44   : > { %6247 = vmatmul.mubr.msk.f32.vlgmr.msra.gmra.mxu1 %vm568_vm5, %v3280_v46 }
0x1bfc   : > { %v6234_v47 = vpop.f32.mrf.mxu1 }
0x1bfd   : > { %v3167_v48 = vmul.f32 0.35355338, %v6234_v47 }
0x1bfe   : > { %v3157_v17 = vpop.f32.mrf.mxu1 }
0x1bff   : > { %v3166_v28 = vmul.f32 0.35355338, %v3157_v17  ;;  %v3171_v49 = vsel %vm654_vm6, %v3167_v48, -inf }
0x1c00   : > { %3172 = vmax.xlane.f32.xlu0 %v3171_v49 }
0x1c01   : > { %v3168_v50 = vsel %vm654_vm6, %v3166_v28, -inf }
0x1c02   : > { %3169 = vmax.xlane.f32.xlu1 %v3168_v50 }
0x1c04   : > { %v6248_v51 = vpop.f32.mrf.mxu1 }
0x1c05   : > { %v3369_v57 = vmul.f32 0.35355338, %v6248_v51 }
0x1c06   : > { %v3359_v35 = vpop.f32.mrf.mxu1 }
0x1c07   : > { %v3368_v34 = vmul.f32 0.35355338, %v3359_v35  ;;  %v3373_v36 = vsel %vm654_vm6, %v3369_v57, -inf }
0x1c08   : > { %3374 = vmax.xlane.f32.xlu1 %v3373_v36 }
0x1c09   : > { %v3370_v40 = vsel %vm654_vm6, %v3368_v34, -inf }
0x1c0a   : > { %3371 = vmax.xlane.f32.xlu0 %v3370_v40 }
0x1c19   : > { %3190 = vrot.lane.b32.xlu1 %v7399_v31, %s7897_s14 }
0x1c1d   : > { %3394 = vrot.lane.b32.xlu1 %v7397_v58, %s7906_s23 }
0x1c20   : > { %3192 = vrot.lane.b32.xlu0 %v7397_v58, %s7897_s14 }
0x1c89   : > { %v3173_v52 = vpop.xlane.xlu0 %3172 }
0x1c8a   : > { %v3175_v37 = vsub.f32 %v3167_v48, %v3173_v52 }
0x1c8b   : > { %v3170_v53 = vpop.xlane.xlu1 %3169 }
0x1c8c   : > { %v3178_v54 = vmul.f32 1.442695, %v3175_v37  ;;  %v3174_v42 = vsub.f32 %v3166_v28, %v3170_v53 }
0x1c8e   : > { %6566 = vpow2.f32 %v3178_v54  ;;  %v3176_v56 = vmul.f32 1.442695, %v3174_v42 }
0x1c90   : > { %6568 = vpow2.f32 %v3176_v56 }
0x1c91   : > { %v3375_v60 = vpop.xlane.xlu1 %3374 }
0x1c92   : > { %v3377_v61 = vsub.f32 %v3369_v57, %v3375_v60 }
0x1c93   : > { %v3372_v62 = vpop.xlane.xlu0 %3371 }
0x1c94   : > { %v3380_v38 = vmul.f32 1.442695, %v3377_v61  ;;  %v3376_v0 = vsub.f32 %v3368_v34, %v3372_v62 }
0x1c95   : > { %v3191_v1 = vpop.permute.xlu1 %3190 }
0x1c96   : > { %6570 = vpow2.f32 %v3380_v38  ;;  %v3378_v2 = vmul.f32 1.442695, %v3376_v0 }
0x1c97   : > { %v3193_v3 = vpop.permute.xlu0 %3192 }
0x1c98   : > { %6572 = vpow2.f32 %v3378_v2  ;;  %6235 = vmatprep.subr.mxu0 %v3193_v3 }
0x1c99   : > { %6236 = vmatpush3.msra.mxu0 %v3193_v3  ;;  %v3395_v45 = vpop.permute.xlu1 %3394 }
0x1c9a   : > { %6237 = vmatprep.subr.mxu0 %v3191_v1 }
0x1c9b   : > { %v6567_v43 = vpop.eup %6566  ;;  %6238 = vmatpush3.msra.mxu0 %v3191_v1 }
0x1c9c   : > { %6249 = vmatprep.subr.mxu0 %v3395_v45  ;;  %v3183_v4 = vsel %vm654_vm6, %v6567_v43, 0.0 }
0x1c9d   : > { %v6569_v5 = vpop.eup %6568  ;;  %3184 = vadd.xlane.f32.xlu1 %v3183_v4 }
0x1c9e   : > { %v3180_v10 = vsel %vm654_vm6, %v6569_v5, 0.0 }
0x1c9f   : > { %3181 = vadd.xlane.f32.xlu0 %v3180_v10 }
0x1ca3   : > { %v6571_v11 = vpop.eup %6570 }
0x1ca4   : > { %v3385_v12 = vsel %vm654_vm6, %v6571_v11, 0.0 }
0x1ca5   : > { %v6573_v13 = vpop.eup %6572  ;;  %3386 = vadd.xlane.f32.xlu1 %v3385_v12 }
0x1ca6   : > { %v3382_v14 = vsel %vm654_vm6, %v6573_v13, 0.0 }
0x1ca7   : > { %3383 = vadd.xlane.f32.xlu0 %v3382_v14 }
0x1cb6   : > { %3485 = vrot.lane.b32.xlu1 %v7397_v58, %s7896_s8 }
0x1cba   : > { %3479 = vrot.lane.b32.xlu1 %v7399_v31, %s7907_s0 }
0x1cbd   : > { %3392 = vrot.lane.b32.xlu0 %v7399_v31, %s7906_s23 }
0x1cc1   : > { %3483 = vrot.lane.b32.xlu0 %v7399_v31, %s7896_s8 }
0x1cc5   : > { %3481 = vrot.lane.b32.xlu0 %v7397_v58, %s7907_s0 }
0x1d26   : > { %v3185_v29 = vpop.xlane.xlu1 %3184 }
0x1d27   : > { %6574 = vrcp.f32 %v3185_v29 }
0x1d28   : > { %v3182_v15 = vpop.xlane.xlu0 %3181 }
0x1d29   : > { %6576 = vrcp.f32 %v3182_v15 }
0x1d2e   : > { %v3387_v16 = vpop.xlane.xlu1 %3386 }
0x1d2f   : > { %6578 = vrcp.f32 %v3387_v16 }
0x1d30   : > { %v3384_v18 = vpop.xlane.xlu0 %3383 }
0x1d31   : > { %6580 = vrcp.f32 %v3384_v18 }
0x1d32   : > { %v3486_v21 = vpop.permute.xlu1 %3485 }
0x1d34   : > { %v6575_v19 = vpop.eup %6574  ;;  %v3393_v25 = vpop.permute.xlu0 %3392 }
0x1d35   : > { %v3189_v24 = vmul.f32 %v6575_v19, %v6567_v43 }
0x1d36   : > { %v6577_v20 = vpop.eup %6576  ;;  %v3480_v32 = vpop.permute.xlu1 %3479 }
0x1d37   : > { %v3188_v22 = vmul.f32 %v6577_v20, %v6569_v5 }
0x1d38   : > { %v3484_v33 = vpop.permute.xlu0 %3483 }
0x1d39   : > { %6239 = vmatprep.mubr.msk.f32.mxu0 %vm654_vm6, %v3188_v22 }
0x1d3a   : > { %6240 = vmatmul.mubr.msk.f32.vlgmr.msra.gmra.mxu0 %vm654_vm6, %v3189_v24 }
0x1d3b   : > { %6250 = vmatpush3.msra.mxu0 %v3395_v45 }
0x1d3c   : > { %6251 = vmatprep.subr.mxu0 %v3393_v25  ;;  %v6579_v26 = vpop.eup %6578  ;;  %v3482_v41 = vpop.permute.xlu0 %3481 }
0x1d3d   : > { %6252 = vmatpush3.msra.mxu0 %v3393_v25  ;;  %v3391_v30 = vmul.f32 %v6579_v26, %v6571_v11 }
0x1d3e   : > { %v6581_v27 = vpop.eup %6580  ;;  %6256 = vmatprep.subr.msk.mxu0 %vm568_vm5, %v3486_v21 }
0x1d3f   : > { %v3390_v23 = vmul.f32 %v6581_v27, %v6573_v13 }
0x1d41   : > { %6253 = vmatprep.mubr.msk.f32.mxu0 %vm654_vm6, %v3390_v23 }
0x1d42   : > { %6254 = vmatmul.mubr.msk.f32.vlgmr.msra.gmra.mxu0 %vm654_vm6, %v3391_v30 }
0x1d43   : > { %6257 = vmatpush3.xpose.msk.msra.mxu0 %vm568_vm5, %v3486_v21  ;;  %6260 = vmatprep.mubr.msk.f32.mxu0 %vm568_vm5, %v3480_v32 }
0x1d44   : > { %6258 = vmatprep.subr.msk.mxu0 %vm568_vm5, %v3484_v33 }
0x1d47   : > { %6259 = vmatpush3.xpose.msk.msra.mxu0 %vm568_vm5, %v3484_v33 }
0x1d4a   : > { %6261 = vmatmul.mubr.msk.f32.vlgmr.msra.gmra.mxu0 %vm568_vm5, %v3482_v41 }
0x1dfa   : > { %v7461_v63 = vpop.f32.mrf.mxu0 }
0x1dfc   : > { %v7463_v44 = vpop.f32.mrf.mxu0 }
0x1e02   : > { %v7465_v46 = vpop.f32.mrf.mxu0 }
0x1e04   : > { %v7467_v47 = vpop.f32.mrf.mxu0 }
0x1e0a   : > { %v6262_v48 = vpop.f32.mrf.mxu0 }
0x1e0b   : > { %v3571_v17 = vmul.f32 0.35355338, %v6262_v48 }
0x1e0c   : > { %v3561_v28 = vpop.f32.mrf.mxu0 }
0x1e0d   : > { %v3570_v49 = vmul.f32 0.35355338, %v3561_v28  ;;  %v3575_v50 = vsel %vm654_vm6, %v3571_v17, -inf }
0x1e0e   : > { %3576 = vmax.xlane.f32.xlu0 %v3575_v50 }
0x1e0f   : > { %v3572_v51 = vsel %vm654_vm6, %v3570_v49, -inf }
0x1e10   : > { %3573 = vmax.xlane.f32.xlu1 %v3572_v51 }
0x1e97   : > { %v3577_v57 = vpop.xlane.xlu0 %3576 }
0x1e98   : > { %v3579_v35 = vsub.f32 %v3571_v17, %v3577_v57 }
0x1e99   : > { %v3574_v34 = vpop.xlane.xlu1 %3573 }
0x1e9a   : > { %v3582_v36 = vmul.f32 1.442695, %v3579_v35  ;;  %v3578_v40 = vsub.f32 %v3570_v49, %v3574_v34 }
0x1e9c   : > { %6582 = vpow2.f32 %v3582_v36  ;;  %v3580_v52 = vmul.f32 1.442695, %v3578_v40 }
0x1e9e   : > { %6584 = vpow2.f32 %v3580_v52 }
0x1ea9   : > { %v6583_v37 = vpop.eup %6582 }
0x1eaa   : > { %v3587_v53 = vsel %vm654_vm6, %v6583_v37, 0.0 }
0x1eab   : > { %v6585_v54 = vpop.eup %6584  ;;  %3588 = vadd.xlane.f32.xlu1 %v3587_v53  ;;  %v5756_v53 = vld [vmem:[%s7851_s5 + $0x13] ss:$0 sm:$0xff] }
0x1eac   : > { %v3584_v42 = vsel %vm654_vm6, %v6585_v54, 0.0 }
0x1ead   : > { %3585 = vadd.xlane.f32.xlu0 %v3584_v42 }
0x1ebc   : > { %3594 = vrot.lane.b32.xlu1 %v7399_v31, %s7908_s1 }
0x1ec0   : > { %3687 = vrot.lane.b32.xlu1 %v7397_v58, %s7898_s16 }
0x1ec3   : > { %3596 = vrot.lane.b32.xlu0 %v7397_v58, %s7908_s1 }
0x1ec4   : > { %3681 = vrot.lane.b32.xlu1 %v7399_v31, %s7909_s17 }
0x1ec7   : > { %3685 = vrot.lane.b32.xlu0 %v7399_v31, %s7898_s16 }
0x1ecb   : > { %3683 = vrot.lane.b32.xlu0 %v7397_v58, %s7909_s17 }
0x1f34   : > { %v3589_v56 = vpop.xlane.xlu1 %3588 }
0x1f35   : > { %6586 = vrcp.f32 %v3589_v56 }
0x1f36   : > { %v3586_v60 = vpop.xlane.xlu0 %3585 }
0x1f37   : > { %6588 = vrcp.f32 %v3586_v60 }
0x1f38   : > { %v3595_v61 = vpop.permute.xlu1 %3594 }
0x1f3a   : > { %v3597_v62 = vpop.permute.xlu0 %3596 }
0x1f3b   : > { %6263 = vmatprep.subr.mxu1 %v3597_v62 }
0x1f3c   : > { %6264 = vmatpush3.msra.mxu1 %v3597_v62  ;;  %v3688_v38 = vpop.permute.xlu1 %3687 }
0x1f3d   : > { %6265 = vmatprep.subr.mxu1 %v3595_v61 }
0x1f3e   : > { %6266 = vmatpush3.msra.mxu1 %v3595_v61  ;;  %v3686_v45 = vpop.permute.xlu0 %3685 }
0x1f3f   : > { %6270 = vmatprep.subr.msk.mxu1 %vm568_vm5, %v3688_v38 }
0x1f40   : > { %v3682_v43 = vpop.permute.xlu1 %3681 }
0x1f42   : > { %v6587_v0 = vpop.eup %6586  ;;  %v3684_v4 = vpop.permute.xlu0 %3683 }
0x1f43   : > { %v3593_v3 = vmul.f32 %v6587_v0, %v6583_v37 }
0x1f44   : > { %v6589_v1 = vpop.eup %6588 }
0x1f45   : > { %v3592_v2 = vmul.f32 %v6589_v1, %v6585_v54 }
0x1f47   : > { %6267 = vmatprep.mubr.msk.f32.mxu1 %vm654_vm6, %v3592_v2 }
0x1f48   : > { %6268 = vmatmul.mubr.msk.f32.vlgmr.msra.gmra.mxu1 %vm654_vm6, %v3593_v3 }
0x1f49   : > { %6271 = vmatpush3.xpose.msk.msra.mxu1 %vm568_vm5, %v3688_v38  ;;  %6274 = vmatprep.mubr.msk.f32.mxu1 %vm568_vm5, %v3682_v43 }
0x1f4a   : > { %6272 = vmatprep.subr.msk.mxu1 %vm568_vm5, %v3686_v45 }
0x1f4d   : > { %6273 = vmatpush3.xpose.msk.msra.mxu1 %vm568_vm5, %v3686_v45 }
0x1f50   : > { %6275 = vmatmul.mubr.msk.f32.vlgmr.msra.gmra.mxu1 %vm568_vm5, %v3684_v4 }
0x2008   : > { %v6269_v5 = vpop.f32.mrf.mxu1 }
0x200a   : > { %v3672_v10 = vpop.f32.mrf.mxu1 }
0x2010   : > { %v6276_v11 = vpop.f32.mrf.mxu1 }
0x2011   : > { %v3773_v12 = vmul.f32 0.35355338, %v6276_v11  ;;  %v7557_v11 = vld [vmem:[%s7848_s2 + $0x98] sm:$0xff] }
0x2012   : > { %v3763_v13 = vpop.f32.mrf.mxu1 }
0x2013   : > { %v3772_v14 = vmul.f32 0.35355338, %v3763_v13  ;;  %v3777_v29 = vsel %vm654_vm6, %v3773_v12, -inf  ;;  %v7566_v13 = vld [vmem:[%s7848_s2 + $0x80] sm:$0xff] }
0x2014   : > { %3778 = vmax.xlane.f32.xlu0 %v3777_v29 }
0x2015   : > { %v3774_v15 = vsel %vm654_vm6, %v3772_v14, -inf }
0x2016   : > { %3775 = vmax.xlane.f32.xlu1 %v3774_v15 }
0x209d   : > { %v3779_v16 = vpop.xlane.xlu0 %3778 }
0x209e   : > { %v3781_v18 = vsub.f32 %v3773_v12, %v3779_v16  ;;  %v6650_v12 = vld [vmem:[%s7098_s9] sm:$0xf] }
0x209f   : > { %v3776_v19 = vpop.xlane.xlu1 %3775 }
0x20a0   : > { %v3784_v20 = vmul.f32 1.442695, %v3781_v18  ;;  %v3780_v22 = vsub.f32 %v3772_v14, %v3776_v19  ;;  %v7573_v14 = vld [vmem:[%s7848_s2 + $0x68] sm:$0xff] }
0x20a2   : > { %6590 = vpow2.f32 %v3784_v20  ;;  %v3782_v24 = vmul.f32 1.442695, %v3780_v22 }
0x20a4   : > { %6592 = vpow2.f32 %v3782_v24  ;;  %v5759_v24 = vld [vmem:[%s7851_s5 + $0x14] ss:$0 sm:$0xff] }
0x20af   : > { %v6591_v25 = vpop.eup %6590 }
0x20b0   : > { %v3789_v21 = vsel %vm654_vm6, %v6591_v25, 0.0 }
0x20b1   : > { %v6593_v26 = vpop.eup %6592  ;;  %3790 = vadd.xlane.f32.xlu1 %v3789_v21 }
0x20b2   : > { %v3786_v27 = vsel %vm654_vm6, %v6593_v26, 0.0 }
0x20b3   : > { %3787 = vadd.xlane.f32.xlu0 %v3786_v27 }
0x20c2   : > { %3796 = vrot.lane.b32.xlu1 %v7399_v31, %s7910_s19 }
0x20c6   : > { %3923 = vrot.lane.b32.xlu1 %v7361_v6, %s7902_s13 }
0x20c9   : > { %3798 = vrot.lane.b32.xlu0 %v7397_v58, %s7910_s19 }
0x20ca   : > { %3885 = vrot.lane.b32.xlu1 %v7467_v47, %s7899_s15 }
0x20cd   : > { %3921 = vrot.lane.b32.xlu0 %v7366_v7, %s7902_s13 }
0x20ce   : > { %3887 = vrot.lane.b32.xlu1 %v7465_v46, %s7899_s15 }
0x20d1   : > { %3919 = vrot.lane.b32.xlu0 %v7373_v8, %s7902_s13 }
0x20d2   : > { %3895 = vrot.lane.b32.xlu1 %v6269_v5, %s7900_s21  ;;  %v4150_v5 = vld [vmem:[#allocation2 + $0x8] sm:$0xff] }
0x20d5   : > { %3893 = vrot.lane.b32.xlu0 %v3672_v10, %s7900_s21  ;;  %v7552_v10 = vld [vmem:[%s7848_s2 + $0xb0] sm:$0xff] }
0x20d6   : > { %3917 = vrot.lane.b32.xlu1 %v7380_v9, %s7902_s13  ;;  %6295 = vmatprep.subr.mxu1 %v7552_v10 }
0x20d7   : > { %6296 = vmatpush3.msra.mxu1 %v7552_v10 }
0x20d8   : > { %6297 = vmatprep.subr.mxu1 %v7557_v11 }
0x20d9   : > { %6298 = vmatpush3.msra.mxu1 %v7557_v11 }
0x20da   : > { %6299 = vmatprep.subr.mxu1 %v7566_v13 }
0x20db   : > { %6300 = vmatpush3.msra.mxu1 %v7566_v13 }
0x20dc   : > { %6301 = vmatprep.subr.mxu1 %v7573_v14 }
0x20dd   : > { %6302 = vmatpush3.msra.mxu1 %v7573_v14 }
0x213a   : > { %v3791_v6 = vpop.xlane.xlu1 %3790 }
0x213b   : > { %6594 = vrcp.f32 %v3791_v6  ;;  %v5760_v6 = vld [vmem:[%s7851_s5 + $0x15] ss:$0 sm:$0xff] }
0x213c   : > { %v3788_v58 = vpop.xlane.xlu0 %3787 }
0x213d   : > { %6596 = vrcp.f32 %v3788_v58 }
0x213e   : > { %v3797_v31 = vpop.permute.xlu1 %3796 }
0x2140   : > { %v3799_v23 = vpop.permute.xlu0 %3798 }
0x2141   : > { %6277 = vmatprep.subr.mxu0 %v3799_v23 }
0x2142   : > { %6278 = vmatpush3.msra.mxu0 %v3799_v23  ;;  %v3924_v7 = vpop.permute.xlu1 %3923 }
0x2143   : > { %6279 = vmatprep.subr.mxu0 %v3797_v31 }
0x2144   : > { %6280 = vmatpush3.msra.mxu0 %v3797_v31  ;;  %v3922_v32 = vpop.permute.xlu0 %3921 }
0x2145   : > { %6284 = vmatprep.subr.mxu0 %v3924_v7 }
0x2146   : > { %v3886_v46 = vpop.permute.xlu1 %3885 }
0x2147   : > { %v3907_v51 = vsel %vm568_vm5, %v7463_v44, %v3886_v46 }
0x2148   : > { %v6595_v8 = vpop.eup %6594  ;;  %v3920_v9 = vpop.permute.xlu0 %3919 }
0x2149   : > { %v3795_v41 = vmul.f32 %v6595_v8, %v6591_v25 }
0x214a   : > { %v6597_v30 = vpop.eup %6596  ;;  %v3888_v47 = vpop.permute.xlu1 %3887 }
0x214b   : > { %v3794_v33 = vmul.f32 %v6597_v30, %v6593_v26  ;;  %v3908_v36 = vsel %vm568_vm5, %v7461_v63, %v3888_v47 }
0x214c   : > { %v3894_v50 = vpop.permute.xlu0 %3893 }
0x214d   : > { %6281 = vmatprep.mubr.msk.f32.mxu0 %vm654_vm6, %v3794_v33  ;;  %v3909_v57 = vsel %vm654_vm6, %v3907_v51, %v3894_v50 }
0x214e   : > { %6282 = vmatmul.mubr.msk.f32.vlgmr.msra.gmra.mxu0 %vm654_vm6, %v3795_v41  ;;  %v3896_v48 = vpop.permute.xlu1 %3895  ;;  %v5766_v41 = vld [vmem:[%s7851_s5 + $0x16] ss:$0 sm:$0xff] }
0x214f   : > { %6285 = vmatpush3.msra.mxu0 %v3924_v7  ;;  %v3910_v40 = vsel %vm654_vm6, %v3908_v36, %v3896_v48  ;;  %v5770_v7 = vld [vmem:[%s7851_s5 + $0x17] ss:$0 sm:$0xff] }
0x2150   : > { %6286 = vmatprep.subr.mxu0 %v3922_v32 }
0x2151   : > { %6287 = vmatpush3.msra.mxu0 %v3922_v32 }
0x2152   : > { %6288 = vmatprep.subr.mxu0 %v3920_v9  ;;  %v3918_v17 = vpop.permute.xlu1 %3917 }
0x2153   : > { %6289 = vmatpush3.msra.mxu0 %v3920_v9 }
0x2154   : > { %6290 = vmatprep.subr.mxu0 %v3918_v17 }
0x2155   : > { %6291 = vmatpush3.msra.mxu0 %v3918_v17 }
0x2156   : > { %6306 = vmatprep.subr.mxu0 %v6763_v39 }
0x220e   : > { %v6283_v28 = vpop.f32.mrf.mxu0 }
0x2210   : > { %v3874_v49 = vpop.f32.mrf.mxu0 }
0x2211   : > { %3901 = vrot.lane.b32.xlu0 %v3874_v49, %s7901_s22 }
0x2215   : > { %3903 = vrot.lane.b32.xlu0 %v6283_v28, %s7901_s22 }
0x2283   : > { %v3902_v35 = vpop.permute.xlu0 %3901 }
0x2284   : > { %v3911_v34 = vsel %vm1398_vm7, %v3909_v57, %v3902_v35 }
0x2285   : > { %6292 = vmatprep.mubr.msk.f32.mxu0 %vm432_vm4, %v3911_v34 }
0x2287   : > { %v3904_v52 = vpop.permute.xlu0 %3903 }
0x2288   : > { %v3912_v37 = vsel %vm1398_vm7, %v3910_v40, %v3904_v52 }
0x2289   : > { %6293 = vmatmul.mubr.msk.f32.vlgmr.msra.gmra.mxu0 %vm432_vm4, %v3912_v37 }
0x228a   : > { %6308 = vmatprep.mubr.msk.f32.mxu0 %vm6764_vm8, %v6763_v39  ;;  %6307 = vmatpush3.msra.mxu0 %v4150_v5 }
0x228d   : > { %6309 = vmatmul.mubr.msk.f32.vlgmr.msra.gmra.mxu0 %vm568_vm5, %v6650_v12 }
0x2349   : > { %v6294_v44 = vpop.f32.mrf.mxu0 }
0x234a   : > { %v4011_v54 = vadd.f32 %v6294_v44, %v7345_v55 }
0x234b   : > { %v4001_v42 = vpop.f32.mrf.mxu0 }
0x234c   : > { %v7536_v56 = vadd.f32 %v5756_v53, %v4011_v54  ;;  %v4010_v63 = vadd.f32 %v4001_v42, %v7348_v59 }
0x234d   : > { %v4222_v8 = vpop.f32.mrf.mxu0 }
0x234e   : > { %v7539_v60 = vadd.f32 %v5756_v53, %v4010_v63  ;;  %v4024_v61 = vsel %vm432_vm4, %v7536_v56, 0.0  ;;  %v7590_v30 = vadd.f32 %v5770_v7, %v4222_v8 }
0x234f   : > { %4025 = vadd.xlane.f32.xlu0 %v4024_v61  ;;  %v6310_v32 = vpop.f32.mrf.mxu0 }
0x2350   : > { %v4021_v62 = vsel %vm432_vm4, %v7539_v60, 0.0  ;;  %6311 = vmatprep.subr.msk.mxu1 %vm568_vm5, %v7590_v30 }
0x2351   : > { %4022 = vadd.xlane.f32.xlu1 %v4021_v62 }
0x23d8   : > { %v4026_v38 = vpop.xlane.xlu0 %4025 }
0x23d9   : > { %v4028_v0 = vmul.f32 0.03125, %v4026_v38 }
0x23da   : > { %v4023_v1 = vpop.xlane.xlu1 %4022 }
0x23db   : > { %v4030_v55 = vsub.f32 %v7536_v56, %v4028_v0  ;;  %v4027_v2 = vmul.f32 0.03125, %v4023_v1 }
0x23dd   : > { %v4029_v3 = vsub.f32 %v7539_v60, %v4027_v2  ;;  %v4032_v59 = vmul.f32 %v4030_v55, %v4030_v55 }
0x23df   : > { %v4036_v43 = vsel %vm432_vm4, %v4032_v59, 0.0  ;;  %v4031_v45 = vmul.f32 %v4029_v3, %v4029_v3 }
0x23e0   : > { %4037 = vadd.xlane.f32.xlu1 %v4036_v43 }
0x23e1   : > { %v4033_v4 = vsel %vm432_vm4, %v4031_v45, 0.0 }
0x23e2   : > { %4034 = vadd.xlane.f32.xlu0 %v4033_v4 }
0x23f8   : > { %4423 = vrot.lane.b32.xlu0 %v7590_v30, %s7905_s18 }
0x23fc   : > { %4619 = vrot.lane.b32.xlu0 %v7590_v30, %s7907_s0 }
0x2469   : > { %v4038_v29 = vpop.xlane.xlu1 %4037 }
0x246a   : > { %v4040_v15 = vmul.f32 0.03125, %v4038_v29 }
0x246b   : > { %v4035_v16 = vpop.xlane.xlu0 %4034 }
0x246c   : > { %v4042_v18 = vadd.f32 1e-05, %v4040_v15  ;;  %v4039_v19 = vmul.f32 0.03125, %v4035_v16 }
0x246e   : > { %6598 = vrsqrt.f32 %v4042_v18  ;;  %v4041_v20 = vadd.f32 1e-05, %v4039_v19 }
0x246f   : > { %v4424_v33 = vpop.permute.xlu0 %4423 }
0x2470   : > { %6600 = vrsqrt.f32 %v4041_v20 }
0x2473   : > { %v4620_v17 = vpop.permute.xlu0 %4619 }
0x247b   : > { %v6599_v22 = vpop.eup %6598 }
0x247c   : > { %v4046_v25 = vmul.f32 %v6599_v22, %v4030_v55 }
0x247d   : > { %v6601_v21 = vpop.eup %6600 }
0x247e   : > { %v4045_v26 = vmul.f32 %v6601_v21, %v4029_v3  ;;  %v4052_v27 = vmul.f32 %v5759_v24, %v4046_v25 }
0x2480   : > { %v4051_v58 = vmul.f32 %v5759_v24, %v4045_v26  ;;  %v4058_v23 = vadd.f32 %v5760_v6, %v4052_v27 }
0x2482   : > { %v4057_v31 = vadd.f32 %v5760_v6, %v4051_v58 }
0x2484   : > { %6303 = vmatprep.mubr.msk.f32.mxu1 %vm432_vm4, %v4057_v31 }
0x2485   : > { %6304 = vmatmul.mubr.msk.f32.vlgmr.msra.gmra.mxu1 %vm432_vm4, %v4058_v23 }
0x2486   : > { %6312 = vmatpush3.xpose.msk.msra.mxu1 %vm568_vm5, %v7590_v30 }
0x2487   : > { %6321 = vmatprep.subr.msk.mxu1 %vm568_vm5, %v4424_v33 }
0x2545   : > { %v6305_v9 = vpop.f32.mrf.mxu1 }
0x2546   : > { %v7604_v46 = vadd.f32 %v6305_v9, %v5766_v41 }
0x2547   : > { %v4140_v47 = vpop.f32.mrf.mxu1 }
0x2548   : > { %v7606_v48 = vadd.f32 %v5766_v41, %v4140_v47  ;;  %4617 = vrot.lane.b32.xlu0 %v7604_v46, %s7907_s0  ;;  %4421 = vrot.lane.b32.xlu1 %v7604_v46, %s7905_s18 }
0x254a   : > { %6313 = vmatprep.mubr.msk.f32.mxu1 %vm568_vm5, %v7606_v48 }
0x254b   : > { %6314 = vmatmul.mubr.msk.f32.vlgmr.msra.gmra.mxu1 %vm568_vm5, %v7604_v46 }
0x254c   : > { %4811 = vrot.lane.b32.xlu0 %v7606_v48, %s7909_s17  ;;  %4419 = vrot.lane.b32.xlu1 %v7606_v48, %s7905_s18 }
0x254d   : > { %6322 = vmatpush3.xpose.msk.msra.mxu1 %vm568_vm5, %v4424_v33 }
0x254e   : > { %6331 = vmatprep.subr.msk.mxu1 %vm568_vm5, %v4620_v17 }
0x2550   : > { %4615 = vrot.lane.b32.xlu1 %v7606_v48, %s7907_s0 }
0x2554   : > { %4815 = vrot.lane.b32.xlu1 %v7590_v30, %s7909_s17 }
0x2558   : > { %4813 = vrot.lane.b32.xlu1 %v7604_v46, %s7909_s17 }
0x25ba   : > { %v4422_v28 = vpop.permute.xlu1 %4421  ;;  %v4618_v49 = vpop.permute.xlu0 %4617 }
0x25be   : > { %v4420_v50 = vpop.permute.xlu1 %4419  ;;  %v4812_v57 = vpop.permute.xlu0 %4811 }
0x25bf   : > { %6323 = vmatprep.mubr.msk.f32.mxu1 %vm568_vm5, %v4420_v50 }
0x25c0   : > { %6324 = vmatmul.mubr.msk.f32.vlgmr.msra.gmra.mxu1 %vm568_vm5, %v4422_v28 }
0x25c1   : > { %6332 = vmatpush3.xpose.msk.msra.mxu1 %vm568_vm5, %v4620_v17 }
0x25c2   : > { %v4616_v51 = vpop.permute.xlu1 %4615 }
0x25c3   : > { %6333 = vmatprep.mubr.msk.f32.mxu1 %vm568_vm5, %v4616_v51 }
0x25c4   : > { %6334 = vmatmul.mubr.msk.f32.vlgmr.msra.gmra.mxu1 %vm568_vm5, %v4618_v49 }
0x25c5   : > { %6343 = vmatprep.mubr.msk.f32.mxu1 %vm568_vm5, %v4812_v57 }
0x25c6   : > { %v4816_v35 = vpop.permute.xlu1 %4815 }
0x25c7   : > { %6341 = vmatprep.subr.msk.mxu1 %vm568_vm5, %v4816_v35 }
0x25c8   : > { %6342 = vmatpush3.xpose.msk.msra.mxu1 %vm568_vm5, %v4816_v35 }
0x25ca   : > { %v4814_v34 = vpop.permute.xlu1 %4813 }
0x25cb   : > { %6344 = vmatmul.mubr.msk.f32.vlgmr.msra.gmra.mxu1 %vm568_vm5, %v4814_v34 }
0x260b   : > { %v6315_v36 = vpop.f32.mrf.mxu1 }
0x260c   : > { %v4311_v40 = vmul.f32 0.35355338, %v6315_v36 }
0x260d   : > { %v4301_v52 = vpop.f32.mrf.mxu1 }
0x260e   : > { %v4310_v37 = vmul.f32 0.35355338, %v4301_v52  ;;  %v4315_v44 = vsel %vm339_vm2, %v4311_v40, -inf }
0x260f   : > { %4316 = vmax.xlane.f32.xlu1 %v4315_v44 }
0x2610   : > { %v4312_v53 = vsel %vm339_vm2, %v4310_v37, -inf }
0x2611   : > { %4313 = vmax.xlane.f32.xlu0 %v4312_v53 }
0x2680   : > { %v6325_v54 = vpop.f32.mrf.mxu1 }
0x2681   : > { %v4507_v62 = vmul.f32 0.35355338, %v6325_v54 }
0x2682   : > { %v4497_v42 = vpop.f32.mrf.mxu1 }
0x2683   : > { %v4506_v63 = vmul.f32 0.35355338, %v4497_v42  ;;  %v4511_v3 = vsel %vm339_vm2, %v4507_v62, -inf }
0x2684   : > { %v6335_v61 = vpop.f32.mrf.mxu1 }
0x2685   : > { %v4508_v38 = vsel %vm339_vm2, %v4506_v63, -inf  ;;  %v4703_v55 = vmul.f32 0.35355338, %v6335_v61 }
0x2686   : > { %v4693_v0 = vpop.f32.mrf.mxu1  ;;  %4509 = vmax.xlane.f32.xlu0 %v4508_v38 }
0x2687   : > { %v4702_v1 = vmul.f32 0.35355338, %v4693_v0  ;;  %v4707_v4 = vsel %vm339_vm2, %v4703_v55, -inf }
0x2689   : > { %v4704_v2 = vsel %vm339_vm2, %v4702_v1, -inf }
0x268a   : > { %4705 = vmax.xlane.f32.xlu1 %v4704_v2  ;;  %4512 = vmax.xlane.f32.xlu0 %v4511_v3 }
0x268b   : > { %v6345_v59 = vpop.f32.mrf.mxu1 }
0x268c   : > { %v4899_v43 = vmul.f32 0.35355338, %v6345_v59 }
0x268d   : > { %v4889_v45 = vpop.f32.mrf.mxu1 }
0x268e   : > { %v7643_v5 = vmul.f32 0.35355338, %v4889_v45  ;;  %4708 = vmax.xlane.f32.xlu0 %v4707_v4  ;;  %v4903_v29 = vsel %vm339_vm2, %v4899_v43, -inf }
0x2690   : > { %v4900_v12 = vsel %vm339_vm2, %v7643_v5, -inf }
0x2691   : > { %4901 = vmax.xlane.f32.xlu1 %v4900_v12 }
0x2692   : > { %4904 = vmax.xlane.f32.xlu0 %v4903_v29 }
0x2698   : > { %v4317_v15 = vpop.xlane.xlu1 %4316 }
0x2699   : > { %v4319_v16 = vsub.f32 %v4311_v40, %v4317_v15 }
0x269a   : > { %v4314_v20 = vpop.xlane.xlu0 %4313 }
0x269b   : > { %v4322_v18 = vmul.f32 1.442695, %v4319_v16  ;;  %v4318_v24 = vsub.f32 %v4310_v37, %v4314_v20 }
0x269d   : > { %6602 = vpow2.f32 %v4322_v18  ;;  %v4320_v25 = vmul.f32 1.442695, %v4318_v24 }
0x269f   : > { %6604 = vpow2.f32 %v4320_v25 }
0x26a2   : > { %4334 = vrot.lane.b32.xlu1 %v7590_v30, %s7903_s20 }
0x26aa   : > { %v7650_v19 = vpop.eup %6602 }
0x26ab   : > { %v4327_v22 = vsel %vm339_vm2, %v7650_v19, 0.0 }
0x26ac   : > { %4328 = vadd.xlane.f32.xlu0 %v4327_v22  ;;  %v6605_v21 = vpop.eup %6604 }
0x26ad   : > { %v4324_v26 = vsel %vm339_vm2, %v6605_v21, 0.0 }
0x26c6   : > { %4325 = vadd.xlane.f32.xlu1 %v4324_v26 }
0x270f   : > { %v4510_v27 = vpop.xlane.xlu0 %4509 }
0x2710   : > { %v4514_v6 = vsub.f32 %v4506_v63, %v4510_v27 }
0x2712   : > { %v4516_v58 = vmul.f32 1.442695, %v4514_v6 }
0x2713   : > { %v4706_v31 = vpop.xlane.xlu1 %4705  ;;  %v4513_v23 = vpop.xlane.xlu0 %4512 }
0x2714   : > { %6606 = vpow2.f32 %v4516_v58  ;;  %v4710_v7 = vsub.f32 %v4702_v1, %v4706_v31  ;;  %v4515_v8 = vsub.f32 %v4507_v62, %v4513_v23 }
0x2716   : > { %v4712_v32 = vmul.f32 1.442695, %v4710_v7  ;;  %v4518_v33 = vmul.f32 1.442695, %v4515_v8 }
0x2717   : > { %v4709_v41 = vpop.xlane.xlu0 %4708 }
0x2718   : > { %6608 = vpow2.f32 %v4712_v32  ;;  %v4711_v9 = vsub.f32 %v4703_v55, %v4709_v41 }
0x2719   : > { %6610 = vpow2.f32 %v4518_v33 }
0x271a   : > { %v4714_v47 = vmul.f32 1.442695, %v4711_v9  ;;  %v4902_v17 = vpop.xlane.xlu1 %4901 }
0x271b   : > { %v4905_v28 = vpop.xlane.xlu0 %4904  ;;  %v4906_v42 = vsub.f32 %v7643_v5, %v4902_v17 }
0x271c   : > { %6612 = vpow2.f32 %v4714_v47  ;;  %v4907_v49 = vsub.f32 %v4899_v43, %v4905_v28 }
0x271d   : > { %v4908_v63 = vmul.f32 1.442695, %v4906_v42  ;;  %v5797_v42 = vld [vmem:[%s7851_s5 + $0x18] ss:$0 sm:$0xff] }
0x271e   : > { %v4910_v50 = vmul.f32 1.442695, %v4907_v49  ;;  %v4335_v51 = vpop.permute.xlu1 %4334 }
0x271f   : > { %6316 = vmatprep.subr.msk.mxu0 %vm1832_vm9, %v4335_v51 }
0x2720   : > { %6614 = vpow2.f32 %v4910_v50  ;;  %6317 = vmatpush3.msk.msra.mxu0 %vm1832_vm9, %v4335_v51 }
0x2721   : > { %v6607_v57 = vpop.eup %6606  ;;  %6616 = vpow2.f32 %v4908_v63 }
0x2722   : > { %v4520_v35 = vsel %vm339_vm2, %v6607_v57, 0.0 }
0x2723   : > { %4521 = vadd.xlane.f32.xlu1 %v4520_v35 }
0x2725   : > { %v6609_v34 = vpop.eup %6608 }
0x2726   : > { %v6611_v36 = vpop.eup %6610  ;;  %v4716_v40 = vsel %vm339_vm2, %v6609_v34, 0.0 }
0x2727   : > { %4717 = vadd.xlane.f32.xlu1 %v4716_v40  ;;  %v4523_v52 = vsel %vm339_vm2, %v6611_v36, 0.0 }
0x2728   : > { %4524 = vadd.xlane.f32.xlu0 %v4523_v52 }
0x2729   : > { %v6613_v37 = vpop.eup %6612 }
0x272a   : > { %v4719_v44 = vsel %vm339_vm2, %v6613_v37, 0.0 }
0x272c   : > { %4720 = vadd.xlane.f32.xlu0 %v4719_v44 }
0x272d   : > { %v6615_v53 = vpop.eup %6614 }
0x272e   : > { %v4915_v54 = vsel %vm339_vm2, %v6615_v53, 0.0  ;;  %v6617_v38 = vpop.eup %6616 }
0x272f   : > { %v4912_v0 = vsel %vm339_vm2, %v6617_v38, 0.0 }
0x2730   : > { %4916 = vadd.xlane.f32.xlu0 %v4915_v54 }
0x2735   : > { %v4329_v61 = vpop.xlane.xlu0 %4328 }
0x2736   : > { %6618 = vrcp.f32 %v4329_v61 }
0x2738   : > { %4726 = vrot.lane.b32.xlu1 %v7590_v30, %s7896_s8  ;;  %s297_s8 = sand.u32 1, %s6733_s25  }
0x2743   : > { %v6619_v1 = vpop.eup %6618 }
0x2744   : > { %v4333_v3 = vmul.f32 %v6619_v1, %v7650_v19  ;;  %v5800_v1 = vmul.f32 -1.442695, %v7606_v48 }
0x2746   : > { %4530 = vrot.lane.b32.xlu0 %v7590_v30, %s7904_s29  ;;  %s5538_s29 = scalar_lea.sflag [#allocation4], %s297_s8 }
0x274a   : > { %5052 = vrot.lane.b32.xlu0 %v7552_v10, %s7897_s14 }
0x274f   : > { %v4326_v62 = vpop.xlane.xlu1 %4325 }
0x2750   : > { %6620 = vrcp.f32 %v4326_v62 }
0x275c   : > { %4913 = vadd.xlane.f32.xlu1 %v4912_v0  ;;  %v5801_v0 = vmul.f32 -1.442695, %v7604_v46 }
0x275d   : > { %v6621_v55 = vpop.eup %6620 }
0x275e   : > { %v4332_v2 = vmul.f32 %v6621_v55, %v6605_v21 }
0x2760   : > { %6318 = vmatprep.mubr.msk.f32.mxu0 %vm339_vm2, %v4332_v2 }
0x2761   : > { %6319 = vmatmul.mubr.msk.f32.vlgmr.msra.gmra.mxu0 %vm339_vm2, %v4333_v3 }
0x276d   : > { %4922 = vrot.lane.b32.xlu1 %v7590_v30, %s7898_s16  ;;  %s298_s16 = scalar_lea.vmem [#allocation5], %s297_s8 }
0x2771   : > { %5050 = vrot.lane.b32.xlu1 %v7557_v11, %s7897_s14 }
0x2775   : > { %5048 = vrot.lane.b32.xlu1 %v7566_v13, %s7897_s14 }
0x27ac   : > { %v4522_v59 = vpop.xlane.xlu1 %4521 }
0x27ad   : > { %6622 = vrcp.f32 %v4522_v59 }
0x27b0   : > { %v4718_v43 = vpop.xlane.xlu1 %4717 }
0x27b1   : > { %6624 = vrcp.f32 %v4718_v43  ;;  %v4525_v45 = vpop.xlane.xlu0 %4524 }
0x27b2   : > { %6626 = vrcp.f32 %v4525_v45 }
0x27b4   : > { %v4727_v18 = vpop.permute.xlu1 %4726 }
0x27b5   : > { %v4721_v4 = vpop.xlane.xlu0 %4720 }
0x27b6   : > { %6628 = vrcp.f32 %v4721_v4 }
0x27b9   : > { %v4917_v5 = vpop.xlane.xlu0 %4916 }
0x27ba   : > { %v6623_v12 = vpop.eup %6622  ;;  %6630 = vrcp.f32 %v4917_v5 }
0x27bb   : > { %v4528_v29 = vmul.f32 %v6623_v12, %v6607_v57 }
0x27bd   : > { %v4531_v15 = vpop.permute.xlu0 %4530  ;;  %6328 = vmatprep.mubr.msk.f32.mxu0 %vm339_vm2, %v4528_v29 }
0x27be   : > { %v6625_v30 = vpop.eup %6624  ;;  %6326 = vmatprep.subr.msk.mxu0 %vm1832_vm9, %v4531_v15 }
0x27bf   : > { %v6627_v16 = vpop.eup %6626  ;;  %6327 = vmatpush3.msk.msra.mxu0 %vm1832_vm9, %v4531_v15  ;;  %v4724_v19 = vmul.f32 %v6625_v30, %v6609_v34 }
0x27c0   : > { %6336 = vmatprep.subr.msk.mxu0 %vm1832_vm9, %v4727_v18  ;;  %v4529_v20 = vmul.f32 %v6627_v16, %v6611_v36 }
0x27c1   : > { %v5053_v31 = vpop.permute.xlu0 %5052 }
0x27c2   : > { %6329 = vmatmul.mubr.msk.f32.vlgmr.msra.gmra.mxu0 %vm339_vm2, %v4529_v20  ;;  %6351 = vmatprep.subr.mxu1 %v5053_v31 }
0x27c3   : > { %v6629_v22 = vpop.eup %6628  ;;  %6337 = vmatpush3.msk.msra.mxu0 %vm1832_vm9, %v4727_v18  ;;  %6338 = vmatprep.mubr.msk.f32.mxu0 %vm339_vm2, %v4724_v19  ;;  %v5813_v19 = vld [vmem:[%s7848_s2 + $0xb8] sm:$0xff] }
0x27c4   : > { %v4725_v24 = vmul.f32 %v6629_v22, %v6613_v37  ;;  %6352 = vmatpush3.msra.mxu1 %v5053_v31 }
0x27c6   : > { %6339 = vmatmul.mubr.msk.f32.vlgmr.msra.gmra.mxu0 %vm339_vm2, %v4725_v24 }
0x27c7   : > { %v6631_v26 = vpop.eup %6630 }
0x27c8   : > { %v4921_v58 = vmul.f32 %v6631_v26, %v6615_v53 }
0x27e5   : > { %v4914_v25 = vpop.xlane.xlu1 %4913 }
0x27e6   : > { %6632 = vrcp.f32 %v4914_v25 }
0x27e7   : > { %6634 = vpow2.f32 %v5801_v0  ;;  %v5821_v0 = vld [vmem:[%s7850_s4 + $0x58] sm:$0xff] }
0x27e8   : > { %6636 = vpow2.f32 %v5800_v1  ;;  %v5820_v1 = vld [vmem:[%s7850_s4 + $0x50] sm:$0xff] }
0x27e9   : > { %v4923_v21 = vpop.permute.xlu1 %4922 }
0x27ea   : > { %6346 = vmatprep.subr.msk.mxu0 %vm1832_vm9, %v4923_v21 }
0x27eb   : > { %6347 = vmatpush3.msk.msra.mxu0 %vm1832_vm9, %v4923_v21 }
0x27ed   : > { %v5051_v23 = vpop.permute.xlu1 %5050 }
0x27ee   : > { %6353 = vmatprep.subr.mxu1 %v5051_v23 }
0x27ef   : > { %6354 = vmatpush3.msra.mxu1 %v5051_v23 }
0x27f1   : > { %v5049_v7 = vpop.permute.xlu1 %5048 }
0x27f2   : > { %6355 = vmatprep.subr.mxu1 %v5049_v7 }
0x27f3   : > { %v6633_v27 = vpop.eup %6632  ;;  %6356 = vmatpush3.msra.mxu1 %v5049_v7 }
0x27f4   : > { %v4920_v6 = vmul.f32 %v6633_v27, %v6617_v38  ;;  %v6635_v55 = vpop.eup %6634 }
0x27f5   : > { %v6637_v2 = vpop.eup %6636  ;;  %v5146_v3 = vadd.f32 1.0, %v6635_v55  ;;  %v5819_v55 = vld [vmem:[%s7850_s4 + $0x48] sm:$0xff] }
0x27f6   : > { %6348 = vmatprep.mubr.msk.f32.mxu0 %vm339_vm2, %v4920_v6  ;;  %v5145_v59 = vadd.f32 1.0, %v6637_v2  ;;  %v5818_v2 = vld [vmem:[%s7850_s4 + $0x40] sm:$0xff] }
0x27f7   : > { %6349 = vmatmul.mubr.msk.f32.vlgmr.msra.gmra.mxu0 %vm339_vm2, %v4921_v58  ;;  %6638 = vrcp.f32 %v5146_v3  ;;  %v5815_v3 = vld [vmem:[%s7851_s5 + $0x1b] ss:$0 sm:$0xff] }
0x27f8   : > { %6640 = vrcp.f32 %v5145_v59 }
0x2804   : > { %v6639_v43 = vpop.eup %6638 }
0x2805   : > { %v6641_v5 = vpop.eup %6640 }
0x2821   : > { %v6320_v8 = vpop.f32.mrf.mxu0 }
0x2823   : > { %v4410_v32 = vpop.f32.mrf.mxu0 }
0x2882   : > { %v6330_v33 = vpop.f32.mrf.mxu0 }
0x2883   : > { %5011 = vrot.lane.b32.xlu0 %v6330_v33, %s7899_s15 }
0x2884   : > { %v4606_v41 = vpop.f32.mrf.mxu0 }
0x2886   : > { %v6340_v9 = vpop.f32.mrf.mxu0 }
0x2887   : > { %5009 = vrot.lane.b32.xlu0 %v4606_v41, %s7899_s15  ;;  %s5550_s15 = sshll.u32 %s298_s16, 4  ;;  %s5551_s15 = int_to_ptr.vmem [resolvable:$true] %s5550_s15 }
0x2888   : > { %v4802_v47 = vpop.f32.mrf.mxu0  ;;  %s6677_s18 = scalar_lea.vmem %s5551_s15, 16 }
0x2889   : > { %5017 = vrot.lane.b32.xlu1 %v4802_v47, %s7900_s21  ;;  %p6678_p6 = scmp.ne.s32.totalorder %s5551_s15, %s6677_s18 }
0x288b   : > { %5019 = vrot.lane.b32.xlu0 %v6340_v9, %s7900_s21  ;;  %p6679_p9 = pnand %p6678_p6, %p6845_p5 }
0x288d   : > { %p6680_p10 = pneg %p6679_p9 }
0x288f   : > { %5046 = vrot.lane.b32.xlu0 %v7573_v14, %s7897_s14  ;;  %s5832_s14 = sshll.u32 %s6828_s28, 4  ;;  %s6766_s28 = smov [#allocation5]  }
0x2890   : > { %s6681_s0 = sshll.u32 %s6766_s28, 4  ;;  %s6682_s0 = int_to_ptr.vmem [resolvable:$false] %s6681_s0 }
0x2891   : > { %p6684_p11 = scmp.lt.s32.totalorder %s5551_s15, %s6682_s0 }
0x28b7   : > { %v6350_v17 = vpop.f32.mrf.mxu0 }
0x28b9   : > { %v4998_v28 = vpop.f32.mrf.mxu0 }
0x28ba   : > { %5025 = vrot.lane.b32.xlu1 %v4998_v28, %s7901_s22 }
0x28be   : > { %5027 = vrot.lane.b32.xlu1 %v6350_v17, %s7901_s22 }
0x28f5   : > { %v5012_v49 = vpop.permute.xlu0 %5011 }
0x28f6   : > { %v5032_v37 = vsel %vm568_vm5, %v6320_v8, %v5012_v49 }
0x28f9   : > { %v5010_v50 = vpop.permute.xlu0 %5009 }
0x28fa   : > { %v5031_v34 = vsel %vm568_vm5, %v4410_v32, %v5010_v50 }
0x28fb   : > { %v5018_v35 = vpop.permute.xlu1 %5017 }
0x28fc   : > { %v5033_v36 = vsel %vm654_vm6, %v5031_v34, %v5018_v35 }
0x28fd   : > { %v5020_v51 = vpop.permute.xlu0 %5019 }
0x28fe   : > { %v5034_v44 = vsel %vm654_vm6, %v5032_v37, %v5020_v51 }
0x2901   : > { %v5047_v57 = vpop.permute.xlu0 %5046 }
0x2902   : > { %6357 = vmatprep.subr.mxu1 %v5047_v57 }
0x2903   : > { %6358 = vmatpush3.msra.mxu1 %v5047_v57 }
0x292c   : > { %v5026_v40 = vpop.permute.xlu1 %5025 }
0x292d   : > { %v5035_v52 = vsel %vm1398_vm7, %v5033_v36, %v5026_v40  ;;  %v5804_v40 = vld [vmem:[%s7851_s5 + $0x19] ss:$0 sm:$0xff] }
0x292e   : > { %6359 = vmatprep.mubr.msk.f32.mxu1 %vm432_vm4, %v5035_v52 }
0x2930   : > { %v5028_v53 = vpop.permute.xlu1 %5027 }
0x2931   : > { %v5036_v54 = vsel %vm1398_vm7, %v5034_v44, %v5028_v53  ;;  %v5805_v53 = vld [vmem:[%s7851_s5 + $0x1a] ss:$0 sm:$0xff] }
0x2932   : > { %6360 = vmatmul.mubr.msk.f32.vlgmr.msra.gmra.mxu1 %vm432_vm4, %v5036_v54 }
0x29f2   : > { %v6361_v63 = vpop.f32.mrf.mxu1 }
0x29f3   : > { %v5136_v61 = vadd.f32 %v6361_v63, %v5797_v42 }
0x29f4   : > { %v5130_v62 = vpop.f32.mrf.mxu1 }
0x29f5   : > { %v5131_v38 = vadd.f32 %v5797_v42, %v5130_v62  ;;  %5155 = vrot.lane.b32.xlu1 %v5136_v61, %s7902_s13  ;;  %v5825_v61 = vld [vmem:[%s7850_s4 + $0x78] sm:$0xff]  ;;  %v5824_v62 = vld [vmem:[%s7850_s4 + $0x70] sm:$0xff] }
0x29f6   : > { %6373 = vmatprep.subr.mxu1 %v5825_v61 }
0x29f7   : > { %5153 = vrot.lane.b32.xlu0 %v5131_v38, %s7902_s13  ;;  %6374 = vmatpush3.msra.mxu1 %v5825_v61  ;;  %v5823_v38 = vld [vmem:[%s7850_s4 + $0x68] sm:$0xff] }
0x29f8   : > { %6375 = vmatprep.subr.mxu1 %v5824_v62 }
0x29f9   : > { %6376 = vmatpush3.msra.mxu1 %v5824_v62 }
0x29fa   : > { %6377 = vmatprep.subr.mxu1 %v5823_v38 }
0x29fb   : > { %6378 = vmatpush3.msra.mxu1 %v5823_v38 }
0x2a67   : > { %v5156_v45 = vpop.permute.xlu1 %5155 }
0x2a68   : > { %v5160_v4 = vmul.f32 %v6639_v43, %v5156_v45 }
0x2a69   : > { %v5154_v12 = vpop.permute.xlu0 %5153 }
0x2a6a   : > { %v5159_v29 = vmul.f32 %v6641_v5, %v5154_v12  ;;  %5165 = vrot.lane.b32.xlu1 %v5160_v4, %s7903_s20 }
0x2a6c   : > { %5163 = vrot.lane.b32.xlu0 %v5159_v29, %s7903_s20  ;;  %s7811_s20 = scalar_lea.hbm %s7853_s7, %s5832_s14 }
0x2adc   : > { %v5166_v46 = vpop.permute.xlu1 %5165 }
0x2add   : > { %v7717_v48 = vadd.f32 %v5166_v46, %v7536_v56  ;;  %v5811_v56 = vld [vmem:[%s7848_s2 + $0xa0] sm:$0xff] }
0x2ade   : > { %v5164_v15 = vpop.permute.xlu0 %5163 }
0x2adf   : > { %v5169_v30 = vadd.f32 %v5164_v15, %v7539_v60  ;;  %v5176_v16 = vsel %vm432_vm4, %v7717_v48, 0.0  ;;  %v5809_v60 = vld [vmem:[%s7848_s2 + $0x88] sm:$0xff] }
0x2ae0   : > { %5177 = vadd.xlane.f32.xlu1 %v5176_v16 }
0x2ae1   : > { %v5173_v18 = vsel %vm432_vm4, %v5169_v30, 0.0 }
0x2ae2   : > { %5174 = vadd.xlane.f32.xlu0 %v5173_v18 }
0x2af1   : > { %5244 = vrot.lane.b32.xlu1 %v7552_v10, %s7902_s13  ;;  %v5807_v10 = vld [vmem:[%s7848_s2 + $0x70] sm:$0xff] }
0x2af5   : > { %5240 = vrot.lane.b32.xlu1 %v7557_v11, %s7902_s13 }
0x2af8   : > { %5246 = vrot.lane.b32.xlu0 %v5813_v19, %s7902_s13 }
0x2af9   : > { %5242 = vrot.lane.b32.xlu1 %v5811_v56, %s7902_s13 }
0x2afd   : > { %5238 = vrot.lane.b32.xlu1 %v5809_v60, %s7902_s13 }
0x2b01   : > { %5234 = vrot.lane.b32.xlu1 %v5807_v10, %s7902_s13 }
0x2b69   : > { %v5178_v11 = vpop.xlane.xlu1 %5177 }
0x2b6a   : > { %v5180_v20 = vmul.f32 0.03125, %v5178_v11 }
0x2b6b   : > { %v5175_v22 = vpop.xlane.xlu0 %5174 }
0x2b6c   : > { %v5182_v24 = vsub.f32 %v7717_v48, %v5180_v20  ;;  %v5179_v25 = vmul.f32 0.03125, %v5175_v22 }
0x2b6d   : > { %v5245_v21 = vpop.permute.xlu1 %5244 }
0x2b6e   : > { %v5181_v26 = vsub.f32 %v5169_v30, %v5179_v25  ;;  %v5184_v27 = vmul.f32 %v5182_v24, %v5182_v24 }
0x2b6f   : > { %v5247_v6 = vpop.permute.xlu0 %5246 }
0x2b70   : > { %v5188_v58 = vsel %vm432_vm4, %v5184_v27, 0.0  ;;  %v5183_v31 = vmul.f32 %v5181_v26, %v5181_v26  ;;  %v5251_v23 = vsel %vm432_vm4, %v5245_v21, %v5247_v6  ;;  %v6765_v27 = vmov 0  }
0x2b71   : > { %5189 = vadd.xlane.f32.xlu0 %v5188_v58  ;;  %6362 = vmatprep.subr.mxu0 %v5251_v23  ;;  %v5241_v8 = vpop.permute.xlu1 %5240  ;;  %v5829_v58 = vld [vmem:[%s7851_s5 + $0x1c] ss:$0 sm:$0xff] }
0x2b72   : > { %6363 = vmatpush3.msra.mxu0 %v5251_v23  ;;  %v5185_v7 = vsel %vm432_vm4, %v5183_v31, 0.0  ;;  %6469 = vset.pattern.permute.xlu0 %v6765_v27 }
0x2b75   : > { %5186 = vadd.xlane.f32.xlu0 %v5185_v7  ;;  %v5243_v32 = vpop.permute.xlu1 %5242 }
0x2b76   : > { %v5250_v33 = vsel %vm432_vm4, %v5241_v8, %v5243_v32  ;;  %v5451_v32 = vld [vmem:[%s7852_s6 + $0x5] sm:$0x1] }
0x2b77   : > { %6364 = vmatprep.subr.mxu0 %v5250_v33 }
0x2b78   : > { %6365 = vmatpush3.msra.mxu0 %v5250_v33 }
0x2b79   : > { %v5239_v28 = vpop.permute.xlu1 %5238 }
0x2b7d   : > { %v5235_v35 = vpop.permute.xlu1 %5234 }
0x2b8b   : > { %5236 = vrot.lane.b32.xlu0 %v7566_v13, %s7902_s13 }
0x2b8f   : > { %5232 = vrot.lane.b32.xlu0 %v7573_v14, %s7902_s13  ;;  %s6683_s13 = scalar_lea.vmem %s6682_s0, 32 }
0x2b90   : > { %p6685_p12 = scmp.lt.s32.totalorder %s6683_s13, %s6677_s18 }
0x2b92   : > { %p6686_p13 = por %p6685_p12, %p6684_p11 }
0x2b94   : > { %p6687_p0 = pnand %p6686_p13, %p6680_p10 }
0x2bfa   : > { %v5190_v41 = vpop.xlane.xlu0 %5189 }
0x2bfb   : > { %v5192_v9 = vmul.f32 0.03125, %v5190_v41 }
0x2bfd   : > { %v5194_v47 = vadd.f32 1e-05, %v5192_v9 }
0x2bfe   : > { %v5187_v17 = vpop.xlane.xlu0 %5186 }
0x2bff   : > { %6642 = vrsqrt.f32 %v5194_v47  ;;  %v5191_v49 = vmul.f32 0.03125, %v5187_v17 }
0x2c01   : > { %v5193_v50 = vadd.f32 1e-05, %v5191_v49 }
0x2c02   : > { %v5237_v51 = vpop.permute.xlu0 %5236 }
0x2c03   : > { %6644 = vrsqrt.f32 %v5193_v50  ;;  %v5249_v57 = vsel %vm432_vm4, %v5237_v51, %v5239_v28 }
0x2c04   : > { %6366 = vmatprep.subr.mxu0 %v5249_v57 }
0x2c05   : > { %6367 = vmatpush3.msra.mxu0 %v5249_v57 }
0x2c06   : > { %v5233_v34 = vpop.permute.xlu0 %5232 }
0x2c07   : > { %v5248_v13 = vsel %vm432_vm4, %v5233_v34, %v5235_v35 }
0x2c08   : > { %6368 = vmatprep.subr.mxu0 %v5248_v13 }
0x2c09   : > { %6369 = vmatpush3.msra.mxu0 %v5248_v13 }
0x2c0a   : > { %6392 = vmatprep.subr.mxu0 %v6763_v39 }
0x2c0c   : > { %v6643_v14 = vpop.eup %6642 }
0x2c0d   : > { %v5198_v36 = vmul.f32 %v6643_v14, %v5182_v24 }
0x2c0f   : > { %v5204_v44 = vmul.f32 %v5804_v40, %v5198_v36 }
0x2c10   : > { %v6645_v52 = vpop.eup %6644 }
0x2c11   : > { %v5197_v37 = vmul.f32 %v6645_v52, %v5181_v26  ;;  %v5210_v63 = vadd.f32 %v5805_v53, %v5204_v44  ;;  %v5452_v26 = vld [vmem:[%s7852_s6 + $0x6] sm:$0x1] }
0x2c12   : > { %5455 = vperm.xlu0 %6469, %v5452_v26  }
0x2c13   : > { %v5203_v54 = vmul.f32 %v5804_v40, %v5197_v37 }
0x2c15   : > { %v5209_v42 = vadd.f32 %v5805_v53, %v5203_v54 }
0x2c17   : > { %6370 = vmatprep.mubr.msk.f32.mxu0 %vm432_vm4, %v5209_v42 }
0x2c18   : > { %6371 = vmatmul.mubr.msk.f32.vlgmr.msra.gmra.mxu0 %vm432_vm4, %v5210_v63 }
0x2c19   : > { %6394 = vmatprep.mubr.msk.f32.mxu0 %vm6764_vm8, %v6763_v39  ;;  %v5822_v39 = vld [vmem:[%s7850_s4 + $0x60] sm:$0xff] }
0x2c1a   : > { %6379 = vmatprep.subr.mxu1 %v5822_v39 }
0x2c1b   : > { %6380 = vmatpush3.msra.mxu1 %v5822_v39 }
0x2c1c   : > { %6381 = vmatprep.subr.mxu1 %v5821_v0 }
0x2c1d   : > { %6382 = vmatpush3.msra.mxu1 %v5821_v0 }
0x2c1e   : > { %6383 = vmatprep.subr.mxu1 %v5820_v1 }
0x2c1f   : > { %6384 = vmatpush3.msra.mxu1 %v5820_v1 }
0x2c20   : > { %6385 = vmatprep.subr.mxu1 %v5819_v55 }
0x2c21   : > { %6386 = vmatpush3.msra.mxu1 %v5819_v55 }
0x2c22   : > { %6387 = vmatprep.subr.mxu1 %v5818_v2 }
0x2c23   : > { %6388 = vmatpush3.msra.mxu1 %v5818_v2 }
0x2c8d   : > { %v5456_v33 = vpop.permute.xlu0 %5455 }
0x2cd8   : > { %v6372_v59 = vpop.f32.mrf.mxu0 }
0x2cd9   : > { %v5334_v43 = vadd.f32 %v6372_v59, %v5815_v3 }
0x2cda   : > { %v5328_v45 = vpop.f32.mrf.mxu0 }
0x2cdb   : > { %v5338_v4 = vmul.f32 %v5334_v43, %v5334_v43  ;;  %v5329_v5 = vadd.f32 %v5815_v3, %v5328_v45 }
0x2cdd   : > { %v5340_v12 = vmul.f32 %v5338_v4, %v5334_v43  ;;  %v5337_v29 = vmul.f32 %v5329_v5, %v5329_v5 }
0x2cdf   : > { %v5342_v46 = vmul.f32 0.044715, %v5340_v12  ;;  %v5339_v15 = vmul.f32 %v5337_v29, %v5329_v5 }
0x2ce1   : > { %v5344_v30 = vadd.f32 %v5342_v46, %v5334_v43  ;;  %v5341_v16 = vmul.f32 0.044715, %v5339_v15 }
0x2ce3   : > { %v5346_v18 = vmul.f32 0.7978846, %v5344_v30  ;;  %v5343_v19 = vadd.f32 %v5341_v16, %v5329_v5 }
0x2ce5   : > { %6646 = vtanh.f32 %v5346_v18  ;;  %v5345_v56 = vmul.f32 0.7978846, %v5343_v19 }
0x2ce7   : > { %6648 = vtanh.f32 %v5345_v56 }
0x2cf2   : > { %v6647_v60 = vpop.eup %6646 }
0x2cf3   : > { %v5350_v10 = vadd.f32 1.0, %v6647_v60 }
0x2cf4   : > { %v6649_v11 = vpop.eup %6648 }
0x2cf5   : > { %v5349_v20 = vadd.f32 1.0, %v6649_v11  ;;  %v5352_v22 = vmul.f32 0.5, %v5350_v10 }
0x2cf7   : > { %v5351_v24 = vmul.f32 0.5, %v5349_v20  ;;  %v5354_v21 = vmul.f32 %v5352_v22, %v5334_v43 }
0x2cf9   : > { %v5353_v25 = vmul.f32 %v5351_v24, %v5329_v5 }
0x2cfb   : > { %6389 = vmatprep.mubr.msk.f32.mxu1 %vm2854_vm10, %v5353_v25 }
0x2cfc   : > { %6390 = vmatmul.mubr.msk.f32.vlgmr.msra.gmra.mxu1 %vm2854_vm10, %v5354_v21 }
0x2dbc   : > { %v6391_v6 = vpop.f32.mrf.mxu1 }
0x2dbd   : > { %v5444_v31 = vadd.f32 %v6391_v6, %v7717_v48 }
0x2dbe   : > { %v5436_v23 = vpop.f32.mrf.mxu1 }
0x2dbf   : > { %v5450_v7 = vadd.f32 %v5829_v58, %v5444_v31 }
0x2dc1   : > { %v5459_v8 = vrot.slane %v5450_v7, 4 }
0x2dc3   : > { %6393 = vmatpush3.xpose.msk.msra.mxu0 %vm432_vm4, %v5459_v8 }
0x2dc6   : > { %6395 = vmatmul.mubr.msk.f32.vlgmr.msra.gmra.mxu0 %vm432_vm4, %v5451_v32 }
0x2e86   : > { %v5531_v41 = vpop.f32.mrf.mxu0 }
0x2e87   : > { %v5532_v48 = vadd.f32 %v5531_v41, %v5456_v33 }
0x2e88   : > { %v6396_v9 = vpop.f32.mrf.mxu0 }
0x2e89   : > { %5536 = vst.msk [vmem:[%s298_s16] sm:$0x1] %vm5535_vm11, %v5532_v48 }
0x2e8a   : > { %6690 = shalt.err (!%p6687_p0)
}
0x2e8b   : > { %s6691_s17 = scalar_lea.hbm %s7811_s20, 16  ;;  %s6695_s23 = scalar_lea.hbm %s7853_s7, 32 }
0x2e8c   : > { %p6692_p1 = scmp.ne.s32.totalorder %s7811_s20, %s6691_s17  ;;  %p6696_p4 = scmp.lt.s32.totalorder %s7811_s20, %s7853_s7 }
0x2e8d   : > { %p6697_p7 = scmp.lt.s32.totalorder %s6695_s23, %s6691_s17 }
0x2e8e   : > { %p6693_p2 = pnand %p6692_p1, %p6845_p5 }
0x2e8f   : > { %p6698_p8 = por %p6697_p7, %p6696_p4 }
0x2e90   : > { %p6694_p3 = pneg %p6693_p2 }
0x2e92   : > { %p6699_p6 = pnand %p6698_p8, %p6694_p3 }
0x2e94   : > { %6702 = shalt.err (!%p6699_p6)
}
0x2e95   : > { %6401 = dma.vmem_to_hbm [thread:$0]  (%p6845_p5), %s5551_s15, 16, %s7811_s20, %s5538_s29  }
0x2e96 PF: > { %p6413_p9 = scmp.ge.s32.totalorder %s6741_s27, 2  ;;  %s5562_s19 = sand.u32 1, %s6729_s24  }
0x2e97   : > { %p7911_p10 = scmp.ne.s32.totalorder %s7891_s12, 0  ;;  %s5563_s26 = scalar_lea.sflag [#allocation4], %s5562_s19 }
0x2e99   : > { %p6408_p11 = pnand %p6413_p9, %p7911_p10 }
0x2e9b   : > { %p6409_p12 = pneg %p6408_p11 }
0x2e9d   : > { %6724 = dma.done.wait (%p6409_p12), %s5563_s26, 16  }
0x2e9e   : > { %6726 = vsyncadd (%p6409_p12), %s5563_s26, 4294967280  ;;  %s7912_s8 = sld [smem:[#allocation8_spill]]  ;;  %p18_p13 = scmp.ge.s32.totalorder %s6832_s30, 4  }
0x2e9f   : > { %s7913_s26 = sld [smem:[#allocation9_spill]]  ;;  %s7914_s24 = smov %s6733_s25 }
0x2ea0   : > { %s7916_s27 = smov %s6832_s30  ;;  %20 = sbr.rel (!%p18_p13) target bundleno = 8 (0x8), region = 95 }
0x2ea4   : > { %s7915_s25 = smov %s7912_s8 }
0x2ea5   :  { %5567 = vsyncpa [#allocation3], 1 }
0x2ea6   :  { %5569 = vsyncpa [#allocation3 + $0x1], 1 }
0x2ea7   :  { %5570 = vsyncpa [#allocation4], 1 }
0x2ea8   :  { %5572 = vsyncpa [#allocation4 + $0x1], 1 }

</bundles_post_ra>
